<compile_context>
chip_gen: v7x
topology: tpu7x:2x2x1
jax: 0.10.0
libtpu: 0.0.40
codegen_flags: <defaults>
</compile_context>

<pallas_src>
import functools

import jax
import jax.numpy as jnp
from jax import lax
from jax.experimental import pallas as pl
from jax.experimental.pallas import tpu as pltpu

SLOPE = 0.1   # leakyrelu_negative_slope
LANE = 128    # TPU lane width
SUB = 8       # sublane granularity


def _round_up(x, m):
    return ((x + m - 1) // m) * m


def _pad2d(x, rows, cols):
    return jnp.pad(x, ((0, rows - x.shape[0]), (0, cols - x.shape[1])))


# ------------------------------ fused kernel -------------------------------- #

def fused_gearnet_kernel(
    # inputs (VMEM)
    hv_full_ref, hv_tile_ref, he_ref, nin_ref, nout_ref, rel_ref,
    s_id_ref, b_id_ref, w_id_ref,
    s_i1_ref, b_i1_ref, w_in_ref, bias_in_ref, s_i2_ref, b_i2_ref,
    s_e1_ref, b_e1_ref, w_e_ref, bias_e_ref, s_e2_ref, b_e2_ref,
    s_lin_ref, b_lin_ref, w_lin_ref,
    s_out_ref, b_out_ref, w_out_ref,
    # output
    o_ref,
    # scratch (persist across grid steps)
    hvt_scr, upd_scr,
    *, num_relation, d_pad, slope):
    f32, bf16 = jnp.float32, jnp.bfloat16
    j = pl.program_id(1)
    tile_n = o_ref.shape[0]
    tile_e = he_ref.shape[0]
    n_full = hvt_scr.shape[0]

    def leaky(x):
        return jnp.where(x >= 0, x, slope * x)

    def mxu(a, b):  # bf16 operands, f32 accumulation
        return jnp.dot(a.astype(bf16), b, preferred_element_type=f32)

    # ---- first edge block of this node tile: compute transformed node features
    #      (self.input MLP) for ALL nodes into persistent bf16 scratch, zero accumulator.
    @pl.when(j == 0)
    def _init():
        h = leaky(hv_full_ref[...] * s_i1_ref[...] + b_i1_ref[...])
        y = mxu(h, w_in_ref[...]) + bias_in_ref[...]
        hvt_scr[...] = leaky(y * s_i2_ref[...] + b_i2_ref[...]).astype(bf16)
        upd_scr[...] = jnp.zeros_like(upd_scr)

    # ---- self.edge_input : MLP(D_edge -> D_in) on this edge block
    h = leaky(he_ref[...] * s_e1_ref[...] + b_e1_ref[...])
    y = mxu(h, w_e_ref[...]) + bias_e_ref[...]
    e_t = leaky(y * s_e2_ref[...] + b_e2_ref[...])

    # ---- gather h_v'[node_in] via one-hot matmul on the MXU (exact for bf16 values)
    src_iota = lax.broadcasted_iota(jnp.int32, (tile_e, n_full), 1)
    g_sel = jnp.where(nin_ref[...] == src_iota, 1.0, 0.0).astype(bf16)
    msg = (jnp.dot(g_sel, hvt_scr[...], preferred_element_type=f32) + e_t).astype(bf16)

    # ---- scatter_sum into the node-major accumulator: one 128-lane block per relation,
    #      vectorized as per-relation one-hot matmuls (padded edges have node_out = -1).
    dst_iota = (lax.broadcasted_iota(jnp.int32, (tile_n, tile_e), 0)
                + pl.program_id(0) * tile_n)
    hit = nout_ref[...] == dst_iota
    for r in range(num_relation):                      # static, small
        sel = jnp.where(hit & (rel_ref[...] == r), 1.0, 0.0).astype(bf16)
        sl = slice(r * d_pad, (r + 1) * d_pad)         # 128-aligned lane block
        upd_scr[:, sl] = upd_scr[:, sl] + jnp.dot(sel, msg, preferred_element_type=f32)

    # ---- last edge block: self.linear (one long-K matmul), self.output, identity, residual
    @pl.when(j == pl.num_programs(1) - 1)
    def _finalize():
        h_lin = leaky(upd_scr[...] * s_lin_ref[...] + b_lin_ref[...])
        out_lin = mxu(h_lin, w_lin_ref[...])                           # K = R*DI, single pass
        ident = mxu(leaky(hv_tile_ref[...] * s_id_ref[...] + b_id_ref[...]), w_id_ref[...])
        h_out = leaky(out_lin * s_out_ref[...] + b_out_ref[...])
        o_ref[...] = mxu(h_out, w_out_ref[...]) + ident


# ------------------------------ host wrapper -------------------------------- #

def gearnet_forward_pallas(h_v, h_e, node_in, node_out, rel, p, num_relation,
                           slope=SLOPE, tile_n=64, tile_e=128):
    N, D_IN = h_v.shape
    E, D_EDGE = h_e.shape
    D_OUT = p["w_out"].shape[1]
    R = num_relation

    assert tile_n % SUB == 0 and tile_e % LANE == 0
    DI = _round_up(D_IN, LANE)
    DO = _round_up(D_OUT, LANE)
    DE = _round_up(D_EDGE, LANE)
    RK = R * DI
    N_P = _round_up(N, tile_n)
    E_P = _round_up(E, tile_e)

    f32, bf16 = jnp.float32, jnp.bfloat16

    hv_p = _pad2d(h_v.astype(f32), N_P, DI)
    he_p = _pad2d(h_e.astype(f32), E_P, DE)

    def pad_idx(v):
        return jnp.pad(v.astype(jnp.int32), (0, E_P - E), constant_values=-1)

    nin_col = pad_idx(node_in).reshape(E_P, 1)
    nout_row = pad_idx(node_out).reshape(1, E_P)
    rel_row = pad_idx(rel).reshape(1, E_P)

    def vec(v, c):                      # (C,) or (1,C) -> (1,c) f32, zero-padded
        return _pad2d(v.reshape(1, -1).astype(f32), 1, c)

    def mat(w, r, c):                   # (r0,c0) -> (r,c) bf16, zero-padded
        return _pad2d(w.astype(f32), r, c).astype(bf16)

    # pack the relational BN + Linear into the node-major (.., R*DI) lane layout
    s_lin_rd = p["s_lin"].reshape(R, D_IN)
    b_lin_rd = p["b_lin"].reshape(R, D_IN)

    def pack_rel_vec(v_rd):             # (R, D_IN) -> (1, R*DI)
        return jnp.concatenate(
            [_pad2d(v_rd[r:r + 1].astype(f32), 1, DI) for r in range(R)], axis=1)

    def pack_rel_mat(w):                # (R*D_IN, D_OUT) -> (R*DI, DO) bf16
        blocks = [_pad2d(w[r * D_IN:(r + 1) * D_IN, :].astype(f32), DI, DO) for r in range(R)]
        return jnp.concatenate(blocks, axis=0).astype(bf16)

    inputs = [
        hv_p,                                        # full (for the input MLP / gather source)
        hv_p,                                        # tiled (for the identity path)
        he_p,
        nin_col, nout_row, rel_row,
        vec(p["s_id"], DI), vec(p["b_id"], DI), mat(p["w_id"], DI, DO),
        vec(p["s_i1"], DI), vec(p["b_i1"], DI), mat(p["w_in"], DI, DI), vec(p["bias_in"], DI),
        vec(p["s_i2"], DI), vec(p["b_i2"], DI),
        vec(p["s_e1"], DE), vec(p["b_e1"], DE), mat(p["w_e"], DE, DI), vec(p["bias_e"], DI),
        vec(p["s_e2"], DI), vec(p["b_e2"], DI),
        pack_rel_vec(s_lin_rd), pack_rel_vec(b_lin_rd), pack_rel_mat(p["w_lin"]),
        vec(p["s_out"], DO), vec(p["b_out"], DO), mat(p["w_out"], DO, DO),
    ]

    def const_spec(a):
        zeros = (0,) * a.ndim
        return pl.BlockSpec(a.shape, lambda i, j, z=zeros: z)

    in_specs = [
        pl.BlockSpec((N_P, DI), lambda i, j: (0, 0)),       # hv (full)
        pl.BlockSpec((tile_n, DI), lambda i, j: (i, 0)),    # hv (node tile)
        pl.BlockSpec((tile_e, DE), lambda i, j: (j, 0)),    # he (edge block)
        pl.BlockSpec((tile_e, 1), lambda i, j: (j, 0)),     # node_in
        pl.BlockSpec((1, tile_e), lambda i, j: (0, j)),     # node_out
        pl.BlockSpec((1, tile_e), lambda i, j: (0, j)),     # relation
    ] + [const_spec(a) for a in inputs[6:]]

    kernel = functools.partial(
        fused_gearnet_kernel, num_relation=R, d_pad=DI, slope=slope)

    grid = (N_P // tile_n, E_P // tile_e)

    scratch_shapes = [
        pltpu.VMEM((N_P, DI), bf16),     # transformed node features (bf16: matmul operand only)
        pltpu.VMEM((tile_n, RK), f32),   # node-major scatter accumulator for this node tile
    ]

    # explicit VMEM budget (inputs double-buffered + output + scratch + slack)
    est = (2 * sum(int(a.size) * a.dtype.itemsize for a in inputs)
           + 2 * tile_n * DO * 4
           + N_P * DI * 2 + tile_n * RK * 4
           + (2 << 20))
    vmem_limit = int(min(max(est, 32 << 20), 64 << 20))

    grid_spec = pltpu.PrefetchScalarGridSpec(
        num_scalar_prefetch=0,
        grid=grid,
        in_specs=in_specs,
        out_specs=pl.BlockSpec((tile_n, DO), lambda i, j: (i, 0)),
        scratch_shapes=scratch_shapes,
    )

    out_p = pl.pallas_call(
        kernel,
        out_shape=jax.ShapeDtypeStruct((N_P, DO), f32),
        grid_spec=grid_spec,
        compiler_params=pltpu.CompilerParams(
            dimension_semantics=("parallel", "arbitrary"),   # node tiles shard across cores (v7x)
            vmem_limit_bytes=vmem_limit),
    )(*inputs)

    return out_p[:N, :D_OUT]


# -------------------------- parameter construction -------------------------- #

def make_bn(key, c, eps=1e-5):
    k1, k2, k3, k4 = jax.random.split(key, 4)
    gamma = jax.random.uniform(k1, (c,), jnp.float32, 0.5, 1.5)
    beta = jax.random.normal(k2, (c,), jnp.float32) * 0.1
    mean = jax.random.normal(k3, (c,), jnp.float32) * 0.1
    var = jax.random.uniform(k4, (c,), jnp.float32, 0.5, 1.5)
    scale = gamma / jnp.sqrt(var + eps)
    shift = beta - mean * scale
    return scale.reshape(1, c), shift.reshape(1, c)


def make_linear(key, cin, cout, bias):
    k1, k2 = jax.random.split(key)
    bound = 1.0 / (cin ** 0.5)
    w = jax.random.uniform(k1, (cin, cout), jnp.float32, -bound, bound)
    b = jax.random.uniform(k2, (1, cout), jnp.float32, -bound, bound) if bias else None
    return w, b


# ------------------------------- reference ---------------------------------- #

def forward_ref(h_v, h_e, node_in, node_out, rel, p, R, slope=SLOPE):
    """Plain-JAX reference with the same eval-mode semantics and the same intentional
    bf16-operand / f32-accumulation rounding points as the kernel."""
    f32, bf16 = jnp.float32, jnp.bfloat16

    def leaky(x):
        return jnp.where(x >= 0, x, slope * x)

    def dot(x, w):
        return jnp.dot(x.astype(bf16), w.astype(bf16), preferred_element_type=f32)

    ident = dot(leaky(h_v * p["s_id"] + p["b_id"]), p["w_id"])
    hv_t = leaky((dot(leaky(h_v * p["s_i1"] + p["b_i1"]), p["w_in"]) + p["bias_in"])
                 * p["s_i2"] + p["b_i2"])
    hv_t = hv_t.astype(bf16).astype(f32)              # kernel stores transformed nodes in bf16
    e_t = leaky((dot(leaky(h_e * p["s_e1"] + p["b_e1"]), p["w_e"]) + p["bias_e"])
                * p["s_e2"] + p["b_e2"])
    msg = (hv_t[node_in] + e_t).astype(bf16).astype(f32)   # kernel scatters bf16 messages
    tgt = node_out * R + rel
    N, D_IN = h_v.shape
    upd = jnp.zeros((N * R, D_IN), f32).at[tgt].add(msg)
    upd = upd.reshape(N, R * D_IN)
    output = dot(leaky(upd * p["s_lin"] + p["b_lin"]), p["w_lin"])
    return dot(leaky(output * p["s_out"] + p["b_out"]), p["w_out"]) + ident


# ---------------------------------- main ------------------------------------ #

if __name__ == "__main__":
    N, E = 200, 300         # nodes, edges  (grid: 4 node tiles x 3 edge blocks)
    D_IN, D_OUT = 32, 64    # input_dim, output_dim
    R = 3                   # num_relation
    D_EDGE = 16             # edge_input_dim

    key = jax.random.PRNGKey(0)
    ks = jax.random.split(key, 20)

    # inputs
    h_v = jax.random.normal(ks[0], (N, D_IN), jnp.float32)
    h_e = jax.random.normal(ks[1], (E, D_EDGE), jnp.float32)
    node_in = jax.random.randint(ks[2], (E,), 0, N, dtype=jnp.int32)
    node_out = jax.random.randint(ks[3], (E,), 0, N, dtype=jnp.int32)
    rel = jax.random.randint(ks[4], (E,), 0, R, dtype=jnp.int32)

    # parameters (eval-mode BN folded into scale/shift)
    s_id, b_id = make_bn(ks[5], D_IN)                      # self.identity : Linear(D_IN -> D_OUT)
    w_id, _ = make_linear(ks[6], D_IN, D_OUT, bias=False)
    s_i1, b_i1 = make_bn(ks[7], D_IN)                      # self.input : MLP(D_IN -> D_IN)
    w_in, bias_in = make_linear(ks[8], D_IN, D_IN, bias=True)
    s_i2, b_i2 = make_bn(ks[9], D_IN)
    s_e1, b_e1 = make_bn(ks[10], D_EDGE)                   # self.edge_input : MLP(D_EDGE -> D_IN)
    w_e, bias_e = make_linear(ks[11], D_EDGE, D_IN, bias=True)
    s_e2, b_e2 = make_bn(ks[12], D_IN)
    s_lin, b_lin = make_bn(ks[13], R * D_IN)               # self.linear : Linear(R*D_IN -> D_OUT)
    w_lin, _ = make_linear(ks[14], R * D_IN, D_OUT, bias=False)
    s_out, b_out = make_bn(ks[15], D_OUT)                  # self.output : Linear(D_OUT -> D_OUT)
    w_out, _ = make_linear(ks[16], D_OUT, D_OUT, bias=False)

    params = dict(
        s_id=s_id, b_id=b_id, w_id=w_id,
        s_i1=s_i1, b_i1=b_i1, w_in=w_in, bias_in=bias_in, s_i2=s_i2, b_i2=b_i2,
        s_e1=s_e1, b_e1=b_e1, w_e=w_e, bias_e=bias_e, s_e2=s_e2, b_e2=b_e2,
        s_lin=s_lin, b_lin=b_lin, w_lin=w_lin,
        s_out=s_out, b_out=b_out, w_out=w_out,
    )

    out = jax.block_until_ready(
        gearnet_forward_pallas(h_v, h_e, node_in, node_out, rel, params, R))
    ref = jax.block_until_ready(
        forward_ref(h_v, h_e, node_in, node_out, rel, params, R))

    assert out.shape == (N, D_OUT) and out.dtype == jnp.float32
    assert jnp.allclose(out, ref, atol=5e-3, rtol=5e-3), "Pallas output mismatch vs reference"
    print("KERNEL_OK")
</pallas_src>

<mosaic_0001>
module attributes {stable_mosaic.version = 11 : i64} {
  func.func @fused_gearnet_kernel(%arg0: i32, %arg1: i32, %arg2: memref<256x128xf32, #tpu.memory_space<vmem>>, %arg3: memref<64x128xf32, #tpu.memory_space<vmem>>, %arg4: memref<128x128xf32, #tpu.memory_space<vmem>>, %arg5: memref<128x1xi32, #tpu.memory_space<vmem>>, %arg6: memref<1x128xi32, #tpu.memory_space<vmem>>, %arg7: memref<1x128xi32, #tpu.memory_space<vmem>>, %arg8: memref<1x128xf32, #tpu.memory_space<vmem>>, %arg9: memref<1x128xf32, #tpu.memory_space<vmem>>, %arg10: memref<128x128xbf16, #tpu.memory_space<vmem>>, %arg11: memref<1x128xf32, #tpu.memory_space<vmem>>, %arg12: memref<1x128xf32, #tpu.memory_space<vmem>>, %arg13: memref<128x128xbf16, #tpu.memory_space<vmem>>, %arg14: memref<1x128xf32, #tpu.memory_space<vmem>>, %arg15: memref<1x128xf32, #tpu.memory_space<vmem>>, %arg16: memref<1x128xf32, #tpu.memory_space<vmem>>, %arg17: memref<1x128xf32, #tpu.memory_space<vmem>>, %arg18: memref<1x128xf32, #tpu.memory_space<vmem>>, %arg19: memref<128x128xbf16, #tpu.memory_space<vmem>>, %arg20: memref<1x128xf32, #tpu.memory_space<vmem>>, %arg21: memref<1x128xf32, #tpu.memory_space<vmem>>, %arg22: memref<1x128xf32, #tpu.memory_space<vmem>>, %arg23: memref<1x384xf32, #tpu.memory_space<vmem>>, %arg24: memref<1x384xf32, #tpu.memory_space<vmem>>, %arg25: memref<384x128xbf16, #tpu.memory_space<vmem>>, %arg26: memref<1x128xf32, #tpu.memory_space<vmem>>, %arg27: memref<1x128xf32, #tpu.memory_space<vmem>>, %arg28: memref<128x128xbf16, #tpu.memory_space<vmem>>, %arg29: memref<64x128xf32, #tpu.memory_space<vmem>>, %arg30: memref<256x128xbf16, #tpu.memory_space<vmem>>, %arg31: memref<64x384xf32, #tpu.memory_space<vmem>>) attributes {dimension_semantics = [#tpu.dimension_semantics<parallel>, #tpu.dimension_semantics<arbitrary>], iteration_bounds = array<i64: 4, 3>, scalar_prefetch = 0 : i64, scratch_operands = 2 : i64, tpu.core_type = #tpu.core_type<tc>, window_params = [{pipeline_mode = #tpu.pipeline_mode<synchronous>, transform_indices = @transform_0, window_bounds = array<i64: 256, 128>}, {transform_indices = @transform_1, window_bounds = array<i64: 64, 128>}, {transform_indices = @transform_2, window_bounds = array<i64: 128, 128>}, {transform_indices = @transform_3, window_bounds = array<i64: 128, 1>}, {transform_indices = @transform_4, window_bounds = array<i64: 1, 128>}, {transform_indices = @transform_5, window_bounds = array<i64: 1, 128>}, {pipeline_mode = #tpu.pipeline_mode<synchronous>, transform_indices = @transform_6, window_bounds = array<i64: 1, 128>}, {pipeline_mode = #tpu.pipeline_mode<synchronous>, transform_indices = @transform_7, window_bounds = array<i64: 1, 128>}, {pipeline_mode = #tpu.pipeline_mode<synchronous>, transform_indices = @transform_8, window_bounds = array<i64: 128, 128>}, {pipeline_mode = #tpu.pipeline_mode<synchronous>, transform_indices = @transform_9, window_bounds = array<i64: 1, 128>}, {pipeline_mode = #tpu.pipeline_mode<synchronous>, transform_indices = @transform_10, window_bounds = array<i64: 1, 128>}, {pipeline_mode = #tpu.pipeline_mode<synchronous>, transform_indices = @transform_11, window_bounds = array<i64: 128, 128>}, {pipeline_mode = #tpu.pipeline_mode<synchronous>, transform_indices = @transform_12, window_bounds = array<i64: 1, 128>}, {pipeline_mode = #tpu.pipeline_mode<synchronous>, transform_indices = @transform_13, window_bounds = array<i64: 1, 128>}, {pipeline_mode = #tpu.pipeline_mode<synchronous>, transform_indices = @transform_14, window_bounds = array<i64: 1, 128>}, {pipeline_mode = #tpu.pipeline_mode<synchronous>, transform_indices = @transform_15, window_bounds = array<i64: 1, 128>}, {pipeline_mode = #tpu.pipeline_mode<synchronous>, transform_indices = @transform_16, window_bounds = array<i64: 1, 128>}, {pipeline_mode = #tpu.pipeline_mode<synchronous>, transform_indices = @transform_17, window_bounds = array<i64: 128, 128>}, {pipeline_mode = #tpu.pipeline_mode<synchronous>, transform_indices = @transform_18, window_bounds = array<i64: 1, 128>}, {pipeline_mode = #tpu.pipeline_mode<synchronous>, transform_indices = @transform_19, window_bounds = array<i64: 1, 128>}, {pipeline_mode = #tpu.pipeline_mode<synchronous>, transform_indices = @transform_20, window_bounds = array<i64: 1, 128>}, {pipeline_mode = #tpu.pipeline_mode<synchronous>, transform_indices = @transform_21, window_bounds = array<i64: 1, 384>}, {pipeline_mode = #tpu.pipeline_mode<synchronous>, transform_indices = @transform_22, window_bounds = array<i64: 1, 384>}, {pipeline_mode = #tpu.pipeline_mode<synchronous>, transform_indices = @transform_23, window_bounds = array<i64: 384, 128>}, {pipeline_mode = #tpu.pipeline_mode<synchronous>, transform_indices = @transform_24, window_bounds = array<i64: 1, 128>}, {pipeline_mode = #tpu.pipeline_mode<synchronous>, transform_indices = @transform_25, window_bounds = array<i64: 1, 128>}, {pipeline_mode = #tpu.pipeline_mode<synchronous>, transform_indices = @transform_26, window_bounds = array<i64: 128, 128>}, {transform_indices = @transform_27, window_bounds = array<i64: 64, 128>}]} {
    %c0_i32 = arith.constant 0 : i32
    %0 = arith.cmpi eq, %arg1, %c0_i32 : i32
    %1 = arith.extui %0 : i1 to i32
    %c0_i32_0 = arith.constant 0 : i32
    %2 = arith.cmpi ne, %1, %c0_i32_0 : i32
    scf.if %2 {
      %c0_55 = arith.constant 0 : index
      %c0_56 = arith.constant 0 : index
      %93 = vector.load %arg2[%c0_55, %c0_56] : memref<256x128xf32, #tpu.memory_space<vmem>>, vector<256x128xf32>
      %c0_57 = arith.constant 0 : index
      %c0_58 = arith.constant 0 : index
      %94 = vector.load %arg11[%c0_57, %c0_58] : memref<1x128xf32, #tpu.memory_space<vmem>>, vector<1x128xf32>
      %95 = vector.broadcast %94 : vector<1x128xf32> to vector<256x128xf32>
      %96 = arith.mulf %93, %95 : vector<256x128xf32>
      %c0_59 = arith.constant 0 : index
      %c0_60 = arith.constant 0 : index
      %97 = vector.load %arg12[%c0_59, %c0_60] : memref<1x128xf32, #tpu.memory_space<vmem>>, vector<1x128xf32>
      %98 = vector.broadcast %97 : vector<1x128xf32> to vector<256x128xf32>
      %99 = arith.addf %96, %98 : vector<256x128xf32>
      %cst_61 = arith.constant 0.000000e+00 : f32
      %100 = vector.broadcast %cst_61 : f32 to vector<256x128xf32>
      %101 = arith.cmpf oge, %99, %100 : vector<256x128xf32>
      %cst_62 = arith.constant 1.000000e-01 : f32
      %102 = vector.broadcast %cst_62 : f32 to vector<256x128xf32>
      %103 = arith.mulf %102, %99 : vector<256x128xf32>
      %104 = arith.select %101, %99, %103 : vector<256x128xi1>, vector<256x128xf32>
      %c0_63 = arith.constant 0 : index
      %c0_64 = arith.constant 0 : index
      %105 = vector.load %arg13[%c0_63, %c0_64] : memref<128x128xbf16, #tpu.memory_space<vmem>>, vector<128x128xbf16>
      %106 = arith.truncf %104 : vector<256x128xf32> to vector<256x128xbf16>
      %cst_65 = arith.constant dense<0.000000e+00> : vector<256x128xf32>
      %107 = tpu.matmul %106, %105, %cst_65 {dimension_numbers = #tpu.dot_dimension_numbers<[1], [0], [0], [1], [0, 0, 1, 1], [], []>} : vector<256x128xbf16>, vector<128x128xbf16>, vector<256x128xf32> -> vector<256x128xf32>
      %c0_66 = arith.constant 0 : index
      %c0_67 = arith.constant 0 : index
      %108 = vector.load %arg14[%c0_66, %c0_67] : memref<1x128xf32, #tpu.memory_space<vmem>>, vector<1x128xf32>
      %109 = vector.broadcast %108 : vector<1x128xf32> to vector<256x128xf32>
      %110 = arith.addf %107, %109 : vector<256x128xf32>
      %c0_68 = arith.constant 0 : index
      %c0_69 = arith.constant 0 : index
      %111 = vector.load %arg15[%c0_68, %c0_69] : memref<1x128xf32, #tpu.memory_space<vmem>>, vector<1x128xf32>
      %112 = vector.broadcast %111 : vector<1x128xf32> to vector<256x128xf32>
      %113 = arith.mulf %110, %112 : vector<256x128xf32>
      %c0_70 = arith.constant 0 : index
      %c0_71 = arith.constant 0 : index
      %114 = vector.load %arg16[%c0_70, %c0_71] : memref<1x128xf32, #tpu.memory_space<vmem>>, vector<1x128xf32>
      %115 = vector.broadcast %114 : vector<1x128xf32> to vector<256x128xf32>
      %116 = arith.addf %113, %115 : vector<256x128xf32>
      %cst_72 = arith.constant 0.000000e+00 : f32
      %117 = vector.broadcast %cst_72 : f32 to vector<256x128xf32>
      %118 = arith.cmpf oge, %116, %117 : vector<256x128xf32>
      %cst_73 = arith.constant 1.000000e-01 : f32
      %119 = vector.broadcast %cst_73 : f32 to vector<256x128xf32>
      %120 = arith.mulf %119, %116 : vector<256x128xf32>
      %121 = arith.select %118, %116, %120 : vector<256x128xi1>, vector<256x128xf32>
      %122 = arith.truncf %121 : vector<256x128xf32> to vector<256x128xbf16>
      %c0_74 = arith.constant 0 : index
      %c0_75 = arith.constant 0 : index
      %123 = vector.load %arg30[%c0_74, %c0_75] : memref<256x128xbf16, #tpu.memory_space<vmem>>, vector<256x128xbf16>
      tpu.vector_store %arg30[%c0_74, %c0_75], %122 {strides = array<i32>} : memref<256x128xbf16, #tpu.memory_space<vmem>>, vector<256x128xbf16>,
      %cst_76 = arith.constant 0.000000e+00 : f32
      %124 = vector.broadcast %cst_76 : f32 to vector<64x384xf32>
      %c0_77 = arith.constant 0 : index
      %c0_78 = arith.constant 0 : index
      %125 = vector.load %arg31[%c0_77, %c0_78] : memref<64x384xf32, #tpu.memory_space<vmem>>, vector<64x384xf32>
      tpu.vector_store %arg31[%c0_77, %c0_78], %124 {strides = array<i32>} : memref<64x384xf32, #tpu.memory_space<vmem>>, vector<64x384xf32>,
    } else {
    }
    %c0 = arith.constant 0 : index
    %c0_1 = arith.constant 0 : index
    %3 = vector.load %arg4[%c0, %c0_1] : memref<128x128xf32, #tpu.memory_space<vmem>>, vector<128x128xf32>
    %c0_2 = arith.constant 0 : index
    %c0_3 = arith.constant 0 : index
    %4 = vector.load %arg17[%c0_2, %c0_3] : memref<1x128xf32, #tpu.memory_space<vmem>>, vector<1x128xf32>
    %5 = vector.broadcast %4 : vector<1x128xf32> to vector<128x128xf32>
    %6 = arith.mulf %3, %5 : vector<128x128xf32>
    %c0_4 = arith.constant 0 : index
    %c0_5 = arith.constant 0 : index
    %7 = vector.load %arg18[%c0_4, %c0_5] : memref<1x128xf32, #tpu.memory_space<vmem>>, vector<1x128xf32>
    %8 = vector.broadcast %7 : vector<1x128xf32> to vector<128x128xf32>
    %9 = arith.addf %6, %8 : vector<128x128xf32>
    %cst = arith.constant 0.000000e+00 : f32
    %10 = vector.broadcast %cst : f32 to vector<128x128xf32>
    %11 = arith.cmpf oge, %9, %10 : vector<128x128xf32>
    %cst_6 = arith.constant 1.000000e-01 : f32
    %12 = vector.broadcast %cst_6 : f32 to vector<128x128xf32>
    %13 = arith.mulf %12, %9 : vector<128x128xf32>
    %14 = arith.select %11, %9, %13 : vector<128x128xi1>, vector<128x128xf32>
    %c0_7 = arith.constant 0 : index
    %c0_8 = arith.constant 0 : index
    %15 = vector.load %arg19[%c0_7, %c0_8] : memref<128x128xbf16, #tpu.memory_space<vmem>>, vector<128x128xbf16>
    %16 = arith.truncf %14 : vector<128x128xf32> to vector<128x128xbf16>
    %cst_9 = arith.constant dense<0.000000e+00> : vector<128x128xf32>
    %17 = tpu.matmul %16, %15, %cst_9 {dimension_numbers = #tpu.dot_dimension_numbers<[1], [0], [0], [1], [0, 0, 1, 1], [], []>} : vector<128x128xbf16>, vector<128x128xbf16>, vector<128x128xf32> -> vector<128x128xf32>
    %c0_10 = arith.constant 0 : index
    %c0_11 = arith.constant 0 : index
    %18 = vector.load %arg20[%c0_10, %c0_11] : memref<1x128xf32, #tpu.memory_space<vmem>>, vector<1x128xf32>
    %19 = vector.broadcast %18 : vector<1x128xf32> to vector<128x128xf32>
    %20 = arith.addf %17, %19 : vector<128x128xf32>
    %c0_12 = arith.constant 0 : index
    %c0_13 = arith.constant 0 : index
    %21 = vector.load %arg21[%c0_12, %c0_13] : memref<1x128xf32, #tpu.memory_space<vmem>>, vector<1x128xf32>
    %22 = vector.broadcast %21 : vector<1x128xf32> to vector<128x128xf32>
    %23 = arith.mulf %20, %22 : vector<128x128xf32>
    %c0_14 = arith.constant 0 : index
    %c0_15 = arith.constant 0 : index
    %24 = vector.load %arg22[%c0_14, %c0_15] : memref<1x128xf32, #tpu.memory_space<vmem>>, vector<1x128xf32>
    %25 = vector.broadcast %24 : vector<1x128xf32> to vector<128x128xf32>
    %26 = arith.addf %23, %25 : vector<128x128xf32>
    %cst_16 = arith.constant 0.000000e+00 : f32
    %27 = vector.broadcast %cst_16 : f32 to vector<128x128xf32>
    %28 = arith.cmpf oge, %26, %27 : vector<128x128xf32>
    %cst_17 = arith.constant 1.000000e-01 : f32
    %29 = vector.broadcast %cst_17 : f32 to vector<128x128xf32>
    %30 = arith.mulf %29, %26 : vector<128x128xf32>
    %31 = arith.select %28, %26, %30 : vector<128x128xi1>, vector<128x128xf32>
    %32 = tpu.iota {dimensions = array<i32: 1>} : vector<128x256xi32>
    %c0_18 = arith.constant 0 : index
    %c0_19 = arith.constant 0 : index
    %33 = vector.load %arg5[%c0_18, %c0_19] : memref<128x1xi32, #tpu.memory_space<vmem>>, vector<128x1xi32>
    %34 = vector.broadcast %33 : vector<128x1xi32> to vector<128x256xi32>
    %35 = arith.cmpi eq, %34, %32 : vector<128x256xi32>
    %cst_20 = arith.constant 1.000000e+00 : f32
    %cst_21 = arith.constant 0.000000e+00 : f32
    %36 = vector.broadcast %cst_20 : f32 to vector<128x256xf32>
    %37 = vector.broadcast %cst_21 : f32 to vector<128x256xf32>
    %38 = arith.select %35, %36, %37 : vector<128x256xi1>, vector<128x256xf32>
    %39 = arith.truncf %38 : vector<128x256xf32> to vector<128x256xbf16>
    %c0_22 = arith.constant 0 : index
    %c0_23 = arith.constant 0 : index
    %40 = vector.load %arg30[%c0_22, %c0_23] : memref<256x128xbf16, #tpu.memory_space<vmem>>, vector<256x128xbf16>
    %cst_24 = arith.constant dense<0.000000e+00> : vector<128x128xf32>
    %41 = tpu.matmul %39, %40, %cst_24 {dimension_numbers = #tpu.dot_dimension_numbers<[1], [0], [0], [1], [0, 0, 1, 1], [], []>} : vector<128x256xbf16>, vector<256x128xbf16>, vector<128x128xf32> -> vector<128x128xf32>
    %42 = arith.addf %41, %31 : vector<128x128xf32>
    %43 = arith.truncf %42 : vector<128x128xf32> to vector<128x128xbf16>
    %44 = tpu.iota {dimensions = array<i32: 0>} : vector<64x128xi32>
    %c64_i32 = arith.constant 64 : i32
    %45 = arith.muli %arg0, %c64_i32 : i32
    %46 = vector.broadcast %45 : i32 to vector<64x128xi32>
    %47 = arith.addi %44, %46 : vector<64x128xi32>
    %c0_25 = arith.constant 0 : index
    %c0_26 = arith.constant 0 : index
    %48 = vector.load %arg6[%c0_25, %c0_26] : memref<1x128xi32, #tpu.memory_space<vmem>>, vector<1x128xi32>
    %49 = vector.broadcast %48 : vector<1x128xi32> to vector<64x128xi32>
    %50 = arith.cmpi eq, %49, %47 : vector<64x128xi32>
    %c0_27 = arith.constant 0 : index
    %c0_28 = arith.constant 0 : index
    %51 = vector.load %arg7[%c0_27, %c0_28] : memref<1x128xi32, #tpu.memory_space<vmem>>, vector<1x128xi32>
    %c0_i32_29 = arith.constant 0 : i32
    %52 = vector.broadcast %c0_i32_29 : i32 to vector<1x128xi32>
    %53 = arith.cmpi eq, %51, %52 : vector<1x128xi32>
    %54 = vector.broadcast %53 : vector<1x128xi1> to vector<64x128xi1>
    %55 = arith.andi %50, %54 : vector<64x128xi1>
    %cst_30 = arith.constant 1.000000e+00 : f32
    %cst_31 = arith.constant 0.000000e+00 : f32
    %56 = vector.broadcast %cst_30 : f32 to vector<64x128xf32>
    %57 = vector.broadcast %cst_31 : f32 to vector<64x128xf32>
    %58 = arith.select %55, %56, %57 : vector<64x128xi1>, vector<64x128xf32>
    %59 = arith.truncf %58 : vector<64x128xf32> to vector<64x128xbf16>
    %c0_32 = arith.constant 0 : index
    %c0_33 = arith.constant 0 : index
    %60 = vector.load %arg31[%c0_32, %c0_33] : memref<64x384xf32, #tpu.memory_space<vmem>>, vector<64x128xf32>
    %cst_34 = arith.constant dense<0.000000e+00> : vector<64x128xf32>
    %61 = tpu.matmul %59, %43, %cst_34 {dimension_numbers = #tpu.dot_dimension_numbers<[1], [0], [0], [1], [0, 0, 1, 1], [], []>} : vector<64x128xbf16>, vector<128x128xbf16>, vector<64x128xf32> -> vector<64x128xf32>
    %62 = arith.addf %60, %61 : vector<64x128xf32>
    %c0_35 = arith.constant 0 : index
    %c0_36 = arith.constant 0 : index
    %63 = vector.load %arg31[%c0_35, %c0_36] : memref<64x384xf32, #tpu.memory_space<vmem>>, vector<64x128xf32>
    tpu.vector_store %arg31[%c0_35, %c0_36], %62 {strides = array<i32>} : memref<64x384xf32, #tpu.memory_space<vmem>>, vector<64x128xf32>,
    %c0_37 = arith.constant 0 : index
    %c0_38 = arith.constant 0 : index
    %64 = vector.load %arg7[%c0_37, %c0_38] : memref<1x128xi32, #tpu.memory_space<vmem>>, vector<1x128xi32>
    %c1_i32 = arith.constant 1 : i32
    %65 = vector.broadcast %c1_i32 : i32 to vector<1x128xi32>
    %66 = arith.cmpi eq, %64, %65 : vector<1x128xi32>
    %67 = vector.broadcast %66 : vector<1x128xi1> to vector<64x128xi1>
    %68 = arith.andi %50, %67 : vector<64x128xi1>
    %cst_39 = arith.constant 1.000000e+00 : f32
    %cst_40 = arith.constant 0.000000e+00 : f32
    %69 = vector.broadcast %cst_39 : f32 to vector<64x128xf32>
    %70 = vector.broadcast %cst_40 : f32 to vector<64x128xf32>
    %71 = arith.select %68, %69, %70 : vector<64x128xi1>, vector<64x128xf32>
    %72 = arith.truncf %71 : vector<64x128xf32> to vector<64x128xbf16>
    %c0_41 = arith.constant 0 : index
    %c128 = arith.constant 128 : index
    %73 = vector.load %arg31[%c0_41, %c128] : memref<64x384xf32, #tpu.memory_space<vmem>>, vector<64x128xf32>
    %cst_42 = arith.constant dense<0.000000e+00> : vector<64x128xf32>
    %74 = tpu.matmul %72, %43, %cst_42 {dimension_numbers = #tpu.dot_dimension_numbers<[1], [0], [0], [1], [0, 0, 1, 1], [], []>} : vector<64x128xbf16>, vector<128x128xbf16>, vector<64x128xf32> -> vector<64x128xf32>
    %75 = arith.addf %73, %74 : vector<64x128xf32>
    %c0_43 = arith.constant 0 : index
    %c128_44 = arith.constant 128 : index
    %76 = vector.load %arg31[%c0_43, %c128_44] : memref<64x384xf32, #tpu.memory_space<vmem>>, vector<64x128xf32>
    tpu.vector_store %arg31[%c0_43, %c128_44], %75 {strides = array<i32>} : memref<64x384xf32, #tpu.memory_space<vmem>>, vector<64x128xf32>,
    %c0_45 = arith.constant 0 : index
    %c0_46 = arith.constant 0 : index
    %77 = vector.load %arg7[%c0_45, %c0_46] : memref<1x128xi32, #tpu.memory_space<vmem>>, vector<1x128xi32>
    %c2_i32 = arith.constant 2 : i32
    %78 = vector.broadcast %c2_i32 : i32 to vector<1x128xi32>
    %79 = arith.cmpi eq, %77, %78 : vector<1x128xi32>
    %80 = vector.broadcast %79 : vector<1x128xi1> to vector<64x128xi1>
    %81 = arith.andi %50, %80 : vector<64x128xi1>
    %cst_47 = arith.constant 1.000000e+00 : f32
    %cst_48 = arith.constant 0.000000e+00 : f32
    %82 = vector.broadcast %cst_47 : f32 to vector<64x128xf32>
    %83 = vector.broadcast %cst_48 : f32 to vector<64x128xf32>
    %84 = arith.select %81, %82, %83 : vector<64x128xi1>, vector<64x128xf32>
    %85 = arith.truncf %84 : vector<64x128xf32> to vector<64x128xbf16>
    %c0_49 = arith.constant 0 : index
    %c256 = arith.constant 256 : index
    %86 = vector.load %arg31[%c0_49, %c256] : memref<64x384xf32, #tpu.memory_space<vmem>>, vector<64x128xf32>
    %cst_50 = arith.constant dense<0.000000e+00> : vector<64x128xf32>
    %87 = tpu.matmul %85, %43, %cst_50 {dimension_numbers = #tpu.dot_dimension_numbers<[1], [0], [0], [1], [0, 0, 1, 1], [], []>} : vector<64x128xbf16>, vector<128x128xbf16>, vector<64x128xf32> -> vector<64x128xf32>
    %88 = arith.addf %86, %87 : vector<64x128xf32>
    %c0_51 = arith.constant 0 : index
    %c256_52 = arith.constant 256 : index
    %89 = vector.load %arg31[%c0_51, %c256_52] : memref<64x384xf32, #tpu.memory_space<vmem>>, vector<64x128xf32>
    tpu.vector_store %arg31[%c0_51, %c256_52], %88 {strides = array<i32>} : memref<64x384xf32, #tpu.memory_space<vmem>>, vector<64x128xf32>,
    %c2_i32_53 = arith.constant 2 : i32
    %90 = arith.cmpi eq, %arg1, %c2_i32_53 : i32
    %91 = arith.extui %90 : i1 to i32
    %c0_i32_54 = arith.constant 0 : i32
    %92 = arith.cmpi ne, %91, %c0_i32_54 : i32
    scf.if %92 {
      %c0_55 = arith.constant 0 : index
      %c0_56 = arith.constant 0 : index
      %93 = vector.load %arg31[%c0_55, %c0_56] : memref<64x384xf32, #tpu.memory_space<vmem>>, vector<64x384xf32>
      %c0_57 = arith.constant 0 : index
      %c0_58 = arith.constant 0 : index
      %94 = vector.load %arg23[%c0_57, %c0_58] : memref<1x384xf32, #tpu.memory_space<vmem>>, vector<1x384xf32>
      %95 = vector.broadcast %94 : vector<1x384xf32> to vector<64x384xf32>
      %96 = arith.mulf %93, %95 : vector<64x384xf32>
      %c0_59 = arith.constant 0 : index
      %c0_60 = arith.constant 0 : index
      %97 = vector.load %arg24[%c0_59, %c0_60] : memref<1x384xf32, #tpu.memory_space<vmem>>, vector<1x384xf32>
      %98 = vector.broadcast %97 : vector<1x384xf32> to vector<64x384xf32>
      %99 = arith.addf %96, %98 : vector<64x384xf32>
      %cst_61 = arith.constant 0.000000e+00 : f32
      %100 = vector.broadcast %cst_61 : f32 to vector<64x384xf32>
      %101 = arith.cmpf oge, %99, %100 : vector<64x384xf32>
      %cst_62 = arith.constant 1.000000e-01 : f32
      %102 = vector.broadcast %cst_62 : f32 to vector<64x384xf32>
      %103 = arith.mulf %102, %99 : vector<64x384xf32>
      %104 = arith.select %101, %99, %103 : vector<64x384xi1>, vector<64x384xf32>
      %c0_63 = arith.constant 0 : index
      %c0_64 = arith.constant 0 : index
      %105 = vector.load %arg25[%c0_63, %c0_64] : memref<384x128xbf16, #tpu.memory_space<vmem>>, vector<384x128xbf16>
      %106 = arith.truncf %104 : vector<64x384xf32> to vector<64x384xbf16>
      %cst_65 = arith.constant dense<0.000000e+00> : vector<64x128xf32>
      %107 = tpu.matmul %106, %105, %cst_65 {dimension_numbers = #tpu.dot_dimension_numbers<[1], [0], [0], [1], [0, 0, 1, 1], [], []>} : vector<64x384xbf16>, vector<384x128xbf16>, vector<64x128xf32> -> vector<64x128xf32>
      %c0_66 = arith.constant 0 : index
      %c0_67 = arith.constant 0 : index
      %108 = vector.load %arg3[%c0_66, %c0_67] : memref<64x128xf32, #tpu.memory_space<vmem>>, vector<64x128xf32>
      %c0_68 = arith.constant 0 : index
      %c0_69 = arith.constant 0 : index
      %109 = vector.load %arg8[%c0_68, %c0_69] : memref<1x128xf32, #tpu.memory_space<vmem>>, vector<1x128xf32>
      %110 = vector.broadcast %109 : vector<1x128xf32> to vector<64x128xf32>
      %111 = arith.mulf %108, %110 : vector<64x128xf32>
      %c0_70 = arith.constant 0 : index
      %c0_71 = arith.constant 0 : index
      %112 = vector.load %arg9[%c0_70, %c0_71] : memref<1x128xf32, #tpu.memory_space<vmem>>, vector<1x128xf32>
      %113 = vector.broadcast %112 : vector<1x128xf32> to vector<64x128xf32>
      %114 = arith.addf %111, %113 : vector<64x128xf32>
      %cst_72 = arith.constant 0.000000e+00 : f32
      %115 = vector.broadcast %cst_72 : f32 to vector<64x128xf32>
      %116 = arith.cmpf oge, %114, %115 : vector<64x128xf32>
      %cst_73 = arith.constant 1.000000e-01 : f32
      %117 = vector.broadcast %cst_73 : f32 to vector<64x128xf32>
      %118 = arith.mulf %117, %114 : vector<64x128xf32>
      %119 = arith.select %116, %114, %118 : vector<64x128xi1>, vector<64x128xf32>
      %c0_74 = arith.constant 0 : index
      %c0_75 = arith.constant 0 : index
      %120 = vector.load %arg10[%c0_74, %c0_75] : memref<128x128xbf16, #tpu.memory_space<vmem>>, vector<128x128xbf16>
      %121 = arith.truncf %119 : vector<64x128xf32> to vector<64x128xbf16>
      %cst_76 = arith.constant dense<0.000000e+00> : vector<64x128xf32>
      %122 = tpu.matmul %121, %120, %cst_76 {dimension_numbers = #tpu.dot_dimension_numbers<[1], [0], [0], [1], [0, 0, 1, 1], [], []>} : vector<64x128xbf16>, vector<128x128xbf16>, vector<64x128xf32> -> vector<64x128xf32>
      %c0_77 = arith.constant 0 : index
      %c0_78 = arith.constant 0 : index
      %123 = vector.load %arg26[%c0_77, %c0_78] : memref<1x128xf32, #tpu.memory_space<vmem>>, vector<1x128xf32>
      %124 = vector.broadcast %123 : vector<1x128xf32> to vector<64x128xf32>
      %125 = arith.mulf %107, %124 : vector<64x128xf32>
      %c0_79 = arith.constant 0 : index
      %c0_80 = arith.constant 0 : index
      %126 = vector.load %arg27[%c0_79, %c0_80] : memref<1x128xf32, #tpu.memory_space<vmem>>, vector<1x128xf32>
      %127 = vector.broadcast %126 : vector<1x128xf32> to vector<64x128xf32>
      %128 = arith.addf %125, %127 : vector<64x128xf32>
      %cst_81 = arith.constant 0.000000e+00 : f32
      %129 = vector.broadcast %cst_81 : f32 to vector<64x128xf32>
      %130 = arith.cmpf oge, %128, %129 : vector<64x128xf32>
      %cst_82 = arith.constant 1.000000e-01 : f32
      %131 = vector.broadcast %cst_82 : f32 to vector<64x128xf32>
      %132 = arith.mulf %131, %128 : vector<64x128xf32>
      %133 = arith.select %130, %128, %132 : vector<64x128xi1>, vector<64x128xf32>
      %c0_83 = arith.constant 0 : index
      %c0_84 = arith.constant 0 : index
      %134 = vector.load %arg28[%c0_83, %c0_84] : memref<128x128xbf16, #tpu.memory_space<vmem>>, vector<128x128xbf16>
      %135 = arith.truncf %133 : vector<64x128xf32> to vector<64x128xbf16>
      %cst_85 = arith.constant dense<0.000000e+00> : vector<64x128xf32>
      %136 = tpu.matmul %135, %134, %cst_85 {dimension_numbers = #tpu.dot_dimension_numbers<[1], [0], [0], [1], [0, 0, 1, 1], [], []>} : vector<64x128xbf16>, vector<128x128xbf16>, vector<64x128xf32> -> vector<64x128xf32>
      %137 = arith.addf %136, %122 : vector<64x128xf32>
      %c0_86 = arith.constant 0 : index
      %c0_87 = arith.constant 0 : index
      %138 = vector.load %arg29[%c0_86, %c0_87] : memref<64x128xf32, #tpu.memory_space<vmem>>, vector<64x128xf32>
      tpu.vector_store %arg29[%c0_86, %c0_87], %137 {strides = array<i32>} : memref<64x128xf32, #tpu.memory_space<vmem>>, vector<64x128xf32>,
    } else {
    }
    return
  }
  func.func @transform_0(%arg0: i32, %arg1: i32) -> (i32, i32) {
    %c0_i32 = arith.constant 0 : i32
    %c0_i32_0 = arith.constant 0 : i32
    %c0_i32_1 = arith.constant 0 : i32
    return %c0_i32, %c0_i32_0 : i32, i32
  }
  func.func @transform_1(%arg0: i32, %arg1: i32) -> (i32, i32) {
    %c0_i32 = arith.constant 0 : i32
    %c0_i32_0 = arith.constant 0 : i32
    return %arg0, %c0_i32 : i32, i32
  }
  func.func @transform_2(%arg0: i32, %arg1: i32) -> (i32, i32) {
    %c0_i32 = arith.constant 0 : i32
    %c0_i32_0 = arith.constant 0 : i32
    return %arg1, %c0_i32 : i32, i32
  }
  func.func @transform_3(%arg0: i32, %arg1: i32) -> (i32, i32) {
    %c0_i32 = arith.constant 0 : i32
    %c0_i32_0 = arith.constant 0 : i32
    return %arg1, %c0_i32 : i32, i32
  }
  func.func @transform_4(%arg0: i32, %arg1: i32) -> (i32, i32) {
    %c0_i32 = arith.constant 0 : i32
    %c0_i32_0 = arith.constant 0 : i32
    return %c0_i32, %arg1 : i32, i32
  }
  func.func @transform_5(%arg0: i32, %arg1: i32) -> (i32, i32) {
    %c0_i32 = arith.constant 0 : i32
    %c0_i32_0 = arith.constant 0 : i32
    return %c0_i32, %arg1 : i32, i32
  }
  func.func @transform_6(%arg0: i32, %arg1: i32) -> (i32, i32) {
    %c0_i32 = arith.constant 0 : i32
    %c0_i32_0 = arith.constant 0 : i32
    %c0_i32_1 = arith.constant 0 : i32
    return %c0_i32, %c0_i32_0 : i32, i32
  }
  func.func @transform_7(%arg0: i32, %arg1: i32) -> (i32, i32) {
    %c0_i32 = arith.constant 0 : i32
    %c0_i32_0 = arith.constant 0 : i32
    %c0_i32_1 = arith.constant 0 : i32
    return %c0_i32, %c0_i32_0 : i32, i32
  }
  func.func @transform_8(%arg0: i32, %arg1: i32) -> (i32, i32) {
    %c0_i32 = arith.constant 0 : i32
    %c0_i32_0 = arith.constant 0 : i32
    %c0_i32_1 = arith.constant 0 : i32
    return %c0_i32, %c0_i32_0 : i32, i32
  }
  func.func @transform_9(%arg0: i32, %arg1: i32) -> (i32, i32) {
    %c0_i32 = arith.constant 0 : i32
    %c0_i32_0 = arith.constant 0 : i32
    %c0_i32_1 = arith.constant 0 : i32
    return %c0_i32, %c0_i32_0 : i32, i32
  }
  func.func @transform_10(%arg0: i32, %arg1: i32) -> (i32, i32) {
    %c0_i32 = arith.constant 0 : i32
    %c0_i32_0 = arith.constant 0 : i32
    %c0_i32_1 = arith.constant 0 : i32
    return %c0_i32, %c0_i32_0 : i32, i32
  }
  func.func @transform_11(%arg0: i32, %arg1: i32) -> (i32, i32) {
    %c0_i32 = arith.constant 0 : i32
    %c0_i32_0 = arith.constant 0 : i32
    %c0_i32_1 = arith.constant 0 : i32
    return %c0_i32, %c0_i32_0 : i32, i32
  }
  func.func @transform_12(%arg0: i32, %arg1: i32) -> (i32, i32) {
    %c0_i32 = arith.constant 0 : i32
    %c0_i32_0 = arith.constant 0 : i32
    %c0_i32_1 = arith.constant 0 : i32
    return %c0_i32, %c0_i32_0 : i32, i32
  }
  func.func @transform_13(%arg0: i32, %arg1: i32) -> (i32, i32) {
    %c0_i32 = arith.constant 0 : i32
    %c0_i32_0 = arith.constant 0 : i32
    %c0_i32_1 = arith.constant 0 : i32
    return %c0_i32, %c0_i32_0 : i32, i32
  }
  func.func @transform_14(%arg0: i32, %arg1: i32) -> (i32, i32) {
    %c0_i32 = arith.constant 0 : i32
    %c0_i32_0 = arith.constant 0 : i32
    %c0_i32_1 = arith.constant 0 : i32
    return %c0_i32, %c0_i32_0 : i32, i32
  }
  func.func @transform_15(%arg0: i32, %arg1: i32) -> (i32, i32) {
    %c0_i32 = arith.constant 0 : i32
    %c0_i32_0 = arith.constant 0 : i32
    %c0_i32_1 = arith.constant 0 : i32
    return %c0_i32, %c0_i32_0 : i32, i32
  }
  func.func @transform_16(%arg0: i32, %arg1: i32) -> (i32, i32) {
    %c0_i32 = arith.constant 0 : i32
    %c0_i32_0 = arith.constant 0 : i32
    %c0_i32_1 = arith.constant 0 : i32
    return %c0_i32, %c0_i32_0 : i32, i32
  }
  func.func @transform_17(%arg0: i32, %arg1: i32) -> (i32, i32) {
    %c0_i32 = arith.constant 0 : i32
    %c0_i32_0 = arith.constant 0 : i32
    %c0_i32_1 = arith.constant 0 : i32
    return %c0_i32, %c0_i32_0 : i32, i32
  }
  func.func @transform_18(%arg0: i32, %arg1: i32) -> (i32, i32) {
    %c0_i32 = arith.constant 0 : i32
    %c0_i32_0 = arith.constant 0 : i32
    %c0_i32_1 = arith.constant 0 : i32
    return %c0_i32, %c0_i32_0 : i32, i32
  }
  func.func @transform_19(%arg0: i32, %arg1: i32) -> (i32, i32) {
    %c0_i32 = arith.constant 0 : i32
    %c0_i32_0 = arith.constant 0 : i32
    %c0_i32_1 = arith.constant 0 : i32
    return %c0_i32, %c0_i32_0 : i32, i32
  }
  func.func @transform_20(%arg0: i32, %arg1: i32) -> (i32, i32) {
    %c0_i32 = arith.constant 0 : i32
    %c0_i32_0 = arith.constant 0 : i32
    %c0_i32_1 = arith.constant 0 : i32
    return %c0_i32, %c0_i32_0 : i32, i32
  }
  func.func @transform_21(%arg0: i32, %arg1: i32) -> (i32, i32) {
    %c0_i32 = arith.constant 0 : i32
    %c0_i32_0 = arith.constant 0 : i32
    %c0_i32_1 = arith.constant 0 : i32
    return %c0_i32, %c0_i32_0 : i32, i32
  }
  func.func @transform_22(%arg0: i32, %arg1: i32) -> (i32, i32) {
    %c0_i32 = arith.constant 0 : i32
    %c0_i32_0 = arith.constant 0 : i32
    %c0_i32_1 = arith.constant 0 : i32
    return %c0_i32, %c0_i32_0 : i32, i32
  }
  func.func @transform_23(%arg0: i32, %arg1: i32) -> (i32, i32) {
    %c0_i32 = arith.constant 0 : i32
    %c0_i32_0 = arith.constant 0 : i32
    %c0_i32_1 = arith.constant 0 : i32
    return %c0_i32, %c0_i32_0 : i32, i32
  }
  func.func @transform_24(%arg0: i32, %arg1: i32) -> (i32, i32) {
    %c0_i32 = arith.constant 0 : i32
    %c0_i32_0 = arith.constant 0 : i32
    %c0_i32_1 = arith.constant 0 : i32
    return %c0_i32, %c0_i32_0 : i32, i32
  }
  func.func @transform_25(%arg0: i32, %arg1: i32) -> (i32, i32) {
    %c0_i32 = arith.constant 0 : i32
    %c0_i32_0 = arith.constant 0 : i32
    %c0_i32_1 = arith.constant 0 : i32
    return %c0_i32, %c0_i32_0 : i32, i32
  }
  func.func @transform_26(%arg0: i32, %arg1: i32) -> (i32, i32) {
    %c0_i32 = arith.constant 0 : i32
    %c0_i32_0 = arith.constant 0 : i32
    %c0_i32_1 = arith.constant 0 : i32
    return %c0_i32, %c0_i32_0 : i32, i32
  }
  func.func @transform_27(%arg0: i32, %arg1: i32) -> (i32, i32) {
    %c0_i32 = arith.constant 0 : i32
    %c0_i32_0 = arith.constant 0 : i32
    return %arg0, %c0_i32 : i32, i32
  }
}

</mosaic_0001>

<bundles_post_ra>
// kernel: tpu_custom_call.1
= control target key start
LH: loop header
LB: loop body
LE: loop exit
PB: predicated region body
PF: predicated region fallthrough
CT: control target
= control target key end

     0   :  { %s7475_s0 = inlined_call_operand.hbm [shape: f32[256,128], index: 0, kind: input, shape index: {}]   ;;  %s7476_s1 = inlined_call_operand.hbm [shape: f32[256,128], index: 1, kind: input, shape index: {}]   ;;  %s7477_s2 = inlined_call_operand.vmem [shape: f32[384,128], index: 2, kind: input, shape index: {}]   ;;  %s7478_s3 = inlined_call_operand.vmem [shape: s32[384,1], index: 3, kind: input, shape index: {}]   ;;  %s7479_s4 = inlined_call_operand.vmem [shape: s32[1,384], index: 4, kind: input, shape index: {}]   ;;  %s7480_s5 = inlined_call_operand.hbm [shape: s32[1,384], index: 5, kind: input, shape index: {}]   ;;  %s7481_s6 = inlined_call_operand.vmem [shape: f32[1,128], index: 6, kind: input, shape index: {}]   ;;  %s7482_s7 = inlined_call_operand.hbm [shape: f32[1,128], index: 7, kind: input, shape index: {}]   ;;  %s7483_s8 = inlined_call_operand.hbm [shape: bf16[128,128], index: 8, kind: input, shape index: {}]   ;;  %s7484_s9 = inlined_call_operand.hbm [shape: f32[1,128], index: 9, kind: input, shape index: {}]   ;;  %s7485_s10 = inlined_call_operand.hbm [shape: f32[1,128], index: 10, kind: input, shape index: {}]   ;;  %s7486_s11 = inlined_call_operand.hbm [shape: bf16[128,128], index: 11, kind: input, shape index: {}]   ;;  %s7487_s12 = inlined_call_operand.hbm [shape: f32[1,128], index: 12, kind: input, shape index: {}]   ;;  %s7488_s13 = inlined_call_operand.hbm [shape: f32[1,128], index: 13, kind: input, shape index: {}]   ;;  %s7489_s14 = inlined_call_operand.hbm [shape: f32[1,128], index: 14, kind: input, shape index: {}]   ;;  %s7490_s15 = inlined_call_operand.hbm [shape: f32[1,128], index: 15, kind: input, shape index: {}]   ;;  %s7491_s16 = inlined_call_operand.hbm [shape: f32[1,128], index: 16, kind: input, shape index: {}]   ;;  %s7492_s17 = inlined_call_operand.hbm [shape: bf16[128,128], index: 17, kind: input, shape index: {}]   ;;  %s7493_s18 = inlined_call_operand.hbm [shape: f32[1,128], index: 18, kind: input, shape index: {}]   ;;  %s7494_s19 = inlined_call_operand.hbm [shape: f32[1,128], index: 19, kind: input, shape index: {}]   ;;  %s7495_s20 = inlined_call_operand.vmem [shape: f32[1,128], index: 20, kind: input, shape index: {}]   ;;  %s7496_s21 = inlined_call_operand.vmem [shape: f32[1,384], index: 21, kind: input, shape index: {}]   ;;  %s7497_s22 = inlined_call_operand.vmem [shape: f32[1,384], index: 22, kind: input, shape index: {}]   ;;  %s7498_s23 = inlined_call_operand.hbm [shape: bf16[384,128], index: 23, kind: input, shape index: {}]   ;;  %s7499_s24 = inlined_call_operand.vmem [shape: f32[1,128], index: 24, kind: input, shape index: {}]   ;;  %s7500_s25 = inlined_call_operand.vmem [shape: f32[1,128], index: 25, kind: input, shape index: {}]   ;;  %s7501_s26 = inlined_call_operand.vmem [shape: bf16[128,128], index: 26, kind: input, shape index: {}]   ;;  %s7502_s27 = inlined_call_operand.hbm [shape: f32[256,128], index: 27, kind: output, shape index: {}]  }
   0x1   :  { %7557 = sst [smem:[#allocation51_spill]] %s7475_s0 }
   0x2   :  { %7558 = sst [smem:[#allocation52_spill]] %s7476_s1 }
   0x3   :  { %7559 = sst [smem:[#allocation53_spill]] %s7477_s2 }
   0x4   :  { %7560 = sst [smem:[#allocation54_spill]] %s7478_s3 }
   0x5   :  { %7561 = sst [smem:[#allocation55_spill]] %s7479_s4 }
   0x6   :  { %7562 = sst [smem:[#allocation56_spill]] %s7480_s5 }
   0x7   :  { %7563 = sst [smem:[#allocation57_spill]] %s7481_s6 }
   0x8   :  { %7564 = sst [smem:[#allocation58_spill]] %s7482_s7 }
   0x9   :  { %7565 = sst [smem:[#allocation59_spill]] %s7483_s8 }
   0xa   :  { %7566 = sst [smem:[#allocation60_spill]] %s7484_s9 }
   0xb   :  { %7567 = sst [smem:[#allocation61_spill]] %s7485_s10 }
   0xc   :  { %7568 = sst [smem:[#allocation62_spill]] %s7486_s11 }
   0xd   :  { %7569 = sst [smem:[#allocation63_spill]] %s7487_s12 }
   0xe   :  { %7570 = sst [smem:[#allocation64_spill]] %s7488_s13 }
   0xf   :  { %7571 = sst [smem:[#allocation65_spill]] %s7489_s14 }
  0x10   :  { %7572 = sst [smem:[#allocation66_spill]] %s7490_s15 }
  0x11   :  { %7573 = sst [smem:[#allocation67_spill]] %s7491_s16 }
  0x12   :  { %7574 = sst [smem:[#allocation68_spill]] %s7492_s17 }
  0x13   :  { %7575 = sst [smem:[#allocation69_spill]] %s7493_s18 }
  0x14   :  { %7576 = sst [smem:[#allocation70_spill]] %s7494_s19 }
  0x15   :  { %7577 = sst [smem:[#allocation71_spill]] %s7495_s20 }
  0x16   :  { %7578 = sst [smem:[#allocation72_spill]] %s7496_s21 }
  0x17   :  { %7579 = sst [smem:[#allocation73_spill]] %s7497_s22 }
  0x18   :  { %7580 = sst [smem:[#allocation74_spill]] %s7498_s23 }
  0x19   :  { %7581 = sst [smem:[#allocation75_spill]] %s7499_s24 }
  0x1a   :  { %7582 = sst [smem:[#allocation76_spill]] %s7500_s25 }
  0x1b   :  { %7583 = sst [smem:[#allocation77_spill]] %s7501_s26 }
  0x1c   :  { %7584 = sst [smem:[#allocation78_spill]] %s7502_s27 }
  0x1d   :  { %32 = vsyncpa [#allocation5], 0 }
  0x1e   :  { %33 = vsyncpa [#allocation8], 0 }
  0x1f   :  { %35 = vsyncpa [#allocation8 + $0x1], 0 }
  0x20   :  { %36 = vsyncpa [#allocation11], 0 }
  0x21   :  { %37 = vsyncpa [#allocation14], 0 }
  0x22   :  { %38 = vsyncpa [#allocation17], 0 }
  0x23   :  { %39 = vsyncpa [#allocation20], 0 }
  0x24   :  { %40 = vsyncpa [#allocation23], 0 }
  0x25   :  { %41 = vsyncpa [#allocation26], 0 }
  0x26   :  { %42 = vsyncpa [#allocation29], 0 }
  0x27   :  { %43 = vsyncpa [#allocation6], 0 }
  0x28   :  { %45 = vsyncpa [#allocation6 + $0x1], 0  ;;  %s5835_s7 = smov 0   ;;  %s5837_s4 = smov 0  }
  0x29   :  { %s5839_s8 = smov 0   ;;  %s5841_s30 = smov 0  }
  0x2a   :  { %s5843_s9 = smov 0   ;;  %s5845_s5 = smov 0  }
  0x2b   :  { %s5847_s28 = smov 0   ;;  %s5849_s0 = smov 0  }
  0x2c   :  { %s5851_s10 = smov 0   ;;  %s5853_s29 = smov 0  }
  0x2d   :  { %s5855_s1 = smov 0  }
  0x2e LB: > { %7585 = sst [smem:[#allocation43_spill]] %s5626_s7  ;;  %s5668_s6 = smov [#allocation10]   ;;  %s5666_s1 = sphi %s5855_s1, %s51_s1   ;;  %s5662_s29 = sphi %s5853_s29, %s7761_s29   ;;  %s5658_s10 = sphi %s5851_s10, %s7760_s10   ;;  %s5654_s0 = sphi %s5849_s0, %s7759_s0   ;;  %s5650_s28 = sphi %s5847_s28, %s7754_s28   ;;  %s5646_s5 = sphi %s5845_s5, %s7758_s5   ;;  %s5642_s9 = sphi %s5843_s9, %s7757_s9   ;;  %s5638_s30 = sphi %s5841_s30, %s7756_s30   ;;  %s5634_s8 = sphi %s5839_s8, %s7755_s8   ;;  %s5630_s4 = sphi %s5837_s4, %s7753_s4   ;;  %s5626_s7 = sphi %s5835_s7, %s7752_s7  }
  0x2f   : > { %7586 = sst [smem:[#allocation44_spill]] %s5630_s4  ;;  %s715_s11 = sshll.u32 %s5668_s6, 4  ;;  %s716_s11 = int_to_ptr.vmem [resolvable:$true] %s715_s11 }
  0x30   : > { %7587 = sst [smem:[#allocation45_spill]] %s5634_s8  ;;  %s5891_s2 = sadd.s32 4294967295, %s5666_s1  }
  0x31   : > { %7588 = sst [smem:[#allocation46_spill]] %s5650_s28  ;;  %p4059_p0 = scmp.ge.s32.totalorder %s5666_s1, 1 }
  0x32   : > { %7589 = sst [smem:[#allocation47_spill]] %s5654_s0  ;;  %p7515_p1 = scmp.eq.s32.totalorder %s5891_s2, 0 }
  0x33   : > { %7590 = sst [smem:[#allocation48_spill]] %s5658_s10  ;;  %p686_p2 = scmp.lt.s32.totalorder %s5666_s1, 13 }
  0x34   : > { %s5669_s27 = smov [#allocation13]   ;;  %s5670_s24 = smov [#allocation16]  }
  0x35   : > { %p5896_p3 = pnand %p4059_p0, %p686_p2  ;;  %s739_s25 = sshll.u32 %s5669_s27, 4  ;;  %s5902_s25 = int_to_ptr.vmem [resolvable:$true] %s739_s25 }
  0x36   : > { %s760_s26 = sshll.u32 %s5670_s24, 4  ;;  %s7594_s20 = sld [smem:[#allocation58_spill]]  ;;  %s5910_s26 = int_to_ptr.vmem [resolvable:$true] %s760_s26 }
  0x37   : > { %s7591_s3 = scalar_select %p5896_p3, 1, 0 }
  0x38   : > { %p4769_p4 = pneg %p5896_p3 }
  0x39   : > { %7592 = sst [smem:[#allocation49_spill]] %s7591_s3 }
  0x3a   : > { %p5906_p5 = pnand %p4769_p4, %p7515_p1 }
  0x3c   : > { %s7593_s6 = scalar_select %p5906_p5, 1, 0 }
  0x3d   : > { %s5028_s0 = scalar_lea.hbm %s7594_s20, 16  ;;  %p5920_p7 = pneg %p5906_p5 }
  0x3e   : > { %p5029_p6 = scmp.ne.s32.totalorder %s7594_s20, %s5028_s0  ;;  %p5035_p10 = scmp.lt.u32.totalorder %s5028_s0, %s7594_s20 }
  0x40   : > { %p5031_p8 = pnand %p5920_p7, %p5029_p6 }
  0x42   : > { %p5032_p9 = pneg %p5031_p8 }
  0x44   : > { %p5037_p11 = pnand %p5035_p10, %p5032_p9 }
  0x46   : > { %5040 = shalt.err (!%p5037_p11)
}
  0x47   : > { %s5041_s21 = scalar_lea.vmem %s716_s11, 16  ;;  %s5048_s22 = scalar_lea.vmem %s716_s11, 32 }
  0x48   : > { %p5042_p12 = scmp.ne.s32.totalorder %s716_s11, %s5041_s21  ;;  %p5049_p2 = scmp.lt.s32.totalorder %s716_s11, %s716_s11 }
  0x49   : > { %p5050_p4 = scmp.lt.s32.totalorder %s5048_s22, %s5041_s21 }
  0x4a   : > { %p5044_p13 = pnand %p5042_p12, %p5920_p7 }
  0x4b   : > { %p5051_p1 = por %p5050_p4, %p5049_p2 }
  0x4c   : > { %p5045_p0 = pneg %p5044_p13 }
  0x4e   : > { %p5052_p3 = pnand %p5051_p1, %p5045_p0 }
  0x50   : > { %5055 = shalt.err (!%p5052_p3)
}
  0x51   : > { %4775 = dma.hbm_to_vmem [thread:$0]  (!%p5906_p5), %s7594_s20, 16, %s716_s11, [#allocation11]  }
  0x52   : > { %s7596_s24 = sld [smem:[#allocation60_spill]] }
  0x58   : > { %s5056_s4 = scalar_lea.hbm %s7596_s24, 16 }
  0x59   : > { %p5057_p6 = scmp.ne.s32.totalorder %s7596_s24, %s5056_s4  ;;  %p5063_p1 = scmp.lt.u32.totalorder %s5056_s4, %s7596_s24 }
  0x5b   : > { %p5059_p8 = pnand %p5057_p6, %p5920_p7 }
  0x5d   : > { %p5060_p9 = pneg %p5059_p8 }
  0x5f   : > { %p5065_p3 = pnand %p5063_p1, %p5060_p9 }
  0x61   : > { %5068 = shalt.err (!%p5065_p3)
}
  0x62   : > { %s5069_s11 = scalar_lea.vmem %s5902_s25, 16  ;;  %s5076_s8 = scalar_lea.vmem %s5902_s25, 32 }
  0x63   : > { %p5070_p10 = scmp.ne.s32.totalorder %s5902_s25, %s5069_s11  ;;  %p5077_p13 = scmp.lt.s32.totalorder %s5902_s25, %s5902_s25 }
  0x64   : > { %p5078_p0 = scmp.lt.s32.totalorder %s5076_s8, %s5069_s11 }
  0x65   : > { %p5072_p11 = pnand %p5070_p10, %p5920_p7 }
  0x66   : > { %p5079_p2 = por %p5078_p0, %p5077_p13 }
  0x67   : > { %p5073_p12 = pneg %p5072_p11 }
  0x69   : > { %p5080_p4 = pnand %p5079_p2, %p5073_p12 }
  0x6b   : > { %5083 = shalt.err (!%p5080_p4)
}
  0x6c   : > { %4781 = dma.hbm_to_vmem [thread:$0]  (!%p5906_p5), %s7596_s24, 16, %s5902_s25, [#allocation14]  }
  0x6d   : > { %s7597_s7 = sld [smem:[#allocation62_spill]] }
  0x73   : > { %s7598_s21 = smov %s7597_s7  ;;  %s5084_s0 = scalar_lea.hbm %s7597_s7, 1024 }
  0x74   : > { %p5085_p6 = scmp.ne.s32.totalorder %s7598_s21, %s5084_s0  ;;  %p5091_p1 = scmp.lt.u32.totalorder %s5084_s0, %s7598_s21 }
  0x76   : > { %p5087_p8 = pnand %p5085_p6, %p5920_p7 }
  0x78   : > { %p5088_p9 = pneg %p5087_p8 }
  0x7a   : > { %p5093_p3 = pnand %p5091_p1, %p5088_p9 }
  0x7c   : > { %5096 = shalt.err (!%p5093_p3)
}
  0x7d   : > { %s5097_s25 = scalar_lea.vmem %s5910_s26, 1024  ;;  %p5105_p13 = scmp.lt.s32.totalorder %s5910_s26, %s5910_s26 }
  0x7e   : > { %p5098_p10 = scmp.ne.s32.totalorder %s5910_s26, %s5097_s25  ;;  %p5106_p0 = scmp.lt.s32.totalorder %s5097_s25, %s5097_s25 }
  0x80   : > { %p5100_p11 = pnand %p5098_p10, %p5920_p7  ;;  %p5107_p2 = por %p5106_p0, %p5105_p13 }
  0x82   : > { %p5101_p12 = pneg %p5100_p11 }
  0x84   : > { %p5108_p4 = pnand %p5107_p2, %p5101_p12 }
  0x86   : > { %5111 = shalt.err (!%p5108_p4)
}
  0x87   : > { %s7525_s20 = smov 64   ;;  %s7533_s4 = smov 4  }
  0x88   : > { %4787 = dma.hbm_to_vmem [thread:$0]  (!%p5906_p5), %s7598_s21, 1024, %s5910_s26, [#allocation17], %s7525_s20, %s7525_s20, %s7533_s4  }
  0x89   : > { %s5673_s3 = smov [#allocation19]   ;;  %s5674_s0 = smov [#allocation22]  }
  0x8a   : > { %s785_s7 = sshll.u32 %s5673_s3, 4  ;;  %s807_s22 = sshll.u32 %s5674_s0, 4  ;;  %s786_s7 = int_to_ptr.vmem [resolvable:$true] %s785_s7  ;;  %s808_s22 = int_to_ptr.vmem [resolvable:$true] %s807_s22 }
  0x8b   : > { %s7599_s13 = sld [smem:[#allocation64_spill]] }
  0x91   : > { %s5112_s25 = scalar_lea.hbm %s7599_s13, 16 }
  0x92   : > { %p5113_p6 = scmp.ne.s32.totalorder %s7599_s13, %s5112_s25  ;;  %p5119_p1 = scmp.lt.u32.totalorder %s5112_s25, %s7599_s13 }
  0x94   : > { %p5115_p8 = pnand %p5113_p6, %p5920_p7 }
  0x96   : > { %p5116_p9 = pneg %p5115_p8 }
  0x98   : > { %p5121_p3 = pnand %p5119_p1, %p5116_p9 }
  0x9a   : > { %5124 = shalt.err (!%p5121_p3)
}
  0x9b   : > { %s5125_s26 = scalar_lea.vmem %s786_s7, 16  ;;  %s5132_s10 = scalar_lea.vmem %s786_s7, 32 }
  0x9c   : > { %p5126_p10 = scmp.ne.s32.totalorder %s786_s7, %s5125_s26  ;;  %p5133_p13 = scmp.lt.s32.totalorder %s786_s7, %s786_s7 }
  0x9d   : > { %p5134_p0 = scmp.lt.s32.totalorder %s5132_s10, %s5125_s26 }
  0x9e   : > { %p5128_p11 = pnand %p5126_p10, %p5920_p7 }
  0x9f   : > { %p5135_p2 = por %p5134_p0, %p5133_p13 }
  0xa0   : > { %p5129_p12 = pneg %p5128_p11 }
  0xa2   : > { %p5136_p4 = pnand %p5135_p2, %p5129_p12 }
  0xa4   : > { %5139 = shalt.err (!%p5136_p4)
}
  0xa5   : > { %4793 = dma.hbm_to_vmem [thread:$0]  (!%p5906_p5), %s7599_s13, 16, %s786_s7, [#allocation20]  }
  0xa6   : > { %s7600_s15 = sld [smem:[#allocation66_spill]] }
  0xac   : > { %s5140_s28 = scalar_lea.hbm %s7600_s15, 16 }
  0xad   : > { %p5141_p6 = scmp.ne.s32.totalorder %s7600_s15, %s5140_s28  ;;  %p5147_p1 = scmp.lt.u32.totalorder %s5140_s28, %s7600_s15 }
  0xaf   : > { %p5143_p8 = pnand %p5141_p6, %p5920_p7 }
  0xb1   : > { %p5144_p9 = pneg %p5143_p8 }
  0xb3   : > { %p5149_p3 = pnand %p5147_p1, %p5144_p9 }
  0xb5   : > { %5152 = shalt.err (!%p5149_p3)
}
  0xb6   : > { %s5153_s25 = scalar_lea.vmem %s808_s22, 16  ;;  %s5160_s7 = scalar_lea.vmem %s808_s22, 32 }
  0xb7   : > { %p5154_p10 = scmp.ne.s32.totalorder %s808_s22, %s5153_s25  ;;  %p5161_p13 = scmp.lt.s32.totalorder %s808_s22, %s808_s22 }
  0xb8   : > { %p5162_p0 = scmp.lt.s32.totalorder %s5160_s7, %s5153_s25 }
  0xb9   : > { %p5156_p11 = pnand %p5154_p10, %p5920_p7 }
  0xba   : > { %p5163_p2 = por %p5162_p0, %p5161_p13 }
  0xbb   : > { %p5157_p12 = pneg %p5156_p11 }
  0xbd   : > { %p5164_p4 = pnand %p5163_p2, %p5157_p12 }
  0xbf   : > { %5167 = shalt.err (!%p5164_p4)
}
  0xc0   : > { %4799 = dma.hbm_to_vmem [thread:$0]  (!%p5906_p5), %s7600_s15, 16, %s808_s22, [#allocation23]  }
  0xc1   : > { %s5675_s23 = smov [#allocation25]   ;;  %s5676_s16 = smov [#allocation28]  }
  0xc2   : > { %s828_s24 = sshll.u32 %s5675_s23, 4  ;;  %s853_s18 = sshll.u32 %s5676_s16, 4  ;;  %s829_s24 = int_to_ptr.vmem [resolvable:$true] %s828_s24  ;;  %s854_s18 = int_to_ptr.vmem [resolvable:$true] %s853_s18 }
  0xc3   : > { %s7601_s17 = sld [smem:[#allocation68_spill]] }
  0xc9   : > { %s5168_s0 = scalar_lea.hbm %s7601_s17, 1024 }
  0xca   : > { %p5169_p6 = scmp.ne.s32.totalorder %s7601_s17, %s5168_s0  ;;  %p5175_p1 = scmp.lt.u32.totalorder %s5168_s0, %s7601_s17 }
  0xcc   : > { %p5171_p8 = pnand %p5169_p6, %p5920_p7 }
  0xce   : > { %p5172_p9 = pneg %p5171_p8 }
  0xd0   : > { %p5177_p3 = pnand %p5175_p1, %p5172_p9 }
  0xd2   : > { %5180 = shalt.err (!%p5177_p3)
}
  0xd3   : > { %s5181_s22 = scalar_lea.vmem %s829_s24, 1024  ;;  %p5189_p13 = scmp.lt.s32.totalorder %s829_s24, %s829_s24 }
  0xd4   : > { %p5182_p10 = scmp.ne.s32.totalorder %s829_s24, %s5181_s22  ;;  %p5190_p0 = scmp.lt.s32.totalorder %s5181_s22, %s5181_s22 }
  0xd6   : > { %p5184_p11 = pnand %p5182_p10, %p5920_p7  ;;  %p5191_p2 = por %p5190_p0, %p5189_p13 }
  0xd8   : > { %p5185_p12 = pneg %p5184_p11 }
  0xda   : > { %p5192_p4 = pnand %p5191_p2, %p5185_p12 }
  0xdc   : > { %5195 = shalt.err (!%p5192_p4)
}
  0xdd   : > { %4805 = dma.hbm_to_vmem [thread:$0]  (!%p5906_p5), %s7601_s17, 1024, %s829_s24, [#allocation26], %s7525_s20, %s7525_s20, %s7533_s4  }
  0xde   : > { %s7602_s19 = sld [smem:[#allocation70_spill]] }
  0xe4   : > { %s5196_s28 = scalar_lea.hbm %s7602_s19, 16 }
  0xe5   : > { %p5197_p6 = scmp.ne.s32.totalorder %s7602_s19, %s5196_s28  ;;  %p5203_p1 = scmp.lt.u32.totalorder %s5196_s28, %s7602_s19 }
  0xe7   : > { %p5199_p8 = pnand %p5197_p6, %p5920_p7 }
  0xe9   : > { %p5200_p9 = pneg %p5199_p8 }
  0xeb   : > { %p5205_p3 = pnand %p5203_p1, %p5200_p9 }
  0xed   : > { %5208 = shalt.err (!%p5205_p3)
}
  0xee   : > { %s5209_s25 = scalar_lea.vmem %s854_s18, 16  ;;  %s5216_s24 = scalar_lea.vmem %s854_s18, 32 }
  0xef   : > { %p5210_p10 = scmp.ne.s32.totalorder %s854_s18, %s5209_s25  ;;  %p5217_p13 = scmp.lt.s32.totalorder %s854_s18, %s854_s18 }
  0xf0   : > { %p5218_p0 = scmp.lt.s32.totalorder %s5216_s24, %s5209_s25 }
  0xf1   : > { %p5212_p11 = pnand %p5210_p10, %p5920_p7 }
  0xf2   : > { %p5219_p2 = por %p5218_p0, %p5217_p13 }
  0xf3   : > { %p5213_p12 = pneg %p5212_p11 }
  0xf5   : > { %p5220_p4 = pnand %p5219_p2, %p5213_p12 }
  0xf7   : > { %5223 = shalt.err (!%p5220_p4)
}
  0xf8   : > { %4811 = dma.hbm_to_vmem [thread:$0]  (!%p5906_p5), %s7602_s19, 16, %s854_s18, [#allocation29]  }
  0xf9   : > { %s4058_s26 = sadd.s32 4294967294, %s5666_s1   ;;  %p98_p6 = scmp.ne.s32.totalorder %s5646_s5, %s5642_s9 }
  0xfa   : > { %p7528_p8 = scmp.eq.s32.totalorder %s5666_s1, 0  ;;  %p104_p9 = scmp.ne.s32.totalorder %s5642_s9, %s5638_s30 }
  0xfb   : > { %p673_p1 = scmp.eq.s32.totalorder %s5891_s2, 11  ;;  %p679_p10 = scmp.eq.s32.totalorder %s4058_s26, 11 }
  0xfc   : > { %p6072_p3 = por %p7528_p8, %p98_p6  ;;  %p7604_p11 = scmp.eq.s32.totalorder %s5891_s2, 0 }
  0xfd   : > { %p6082_p13 = por %p673_p1, %p98_p6  ;;  %p6086_p0 = por %p679_p10, %p104_p9 }
  0xfe   : > { %p6078_p12 = por %p7604_p11, %p104_p9  ;;  %p7527_p2 = scmp.lt.s32.totalorder %s5666_s1, 12 }
  0xff   : > { %s7606_s18 = scalar_select %p6082_p13, 1, 0 }
 0x100   : > { %s7605_s28 = scalar_select %p6078_p12, 1, 0 }
 0x101   : > { %s7607_s3 = scalar_select %p6086_p0, 1, 0 }
 0x102   : > { %s895_s0 = sand.u32 1, %s5666_s1   ;;  %s897_s11 = sand.u32 1, %s5646_s5  }
 0x103   : > { %7608 = sst [smem:[#allocation50_spill]] %s7607_s3  ;;  %s4076_s8 = sshll.u32 %s897_s11, 6 }
 0x104   : > { %s4237_s25 = sshll.u32 %s5662_s29, 10  ;;  %s7609_s22 = sld [smem:[#allocation52_spill]] }
 0x105   : > { %s899_s23 = scalar_lea.vmem [#allocation7], %s4076_s8  ;;  %p6105_p4 = pnand %p7527_p2, %p6072_p3 }
 0x106   : > { %s906_s10 = sshll.u32 %s899_s23, 4  ;;  %s6109_s11 = scalar_lea.sflag [#allocation8], %s895_s0  ;;  %s6099_s10 = int_to_ptr.vmem [resolvable:$true] %s906_s10 }
 0x107   : > { %p5226_p9 = pneg %p6105_p4 }
 0x10a   : > { %s6097_s26 = scalar_lea.hbm %s7609_s22, %s4237_s25  ;;  %s5229_s16 = scalar_lea.hbm %s7609_s22, 4096 }
 0x10b   : > { %s5224_s25 = scalar_lea.hbm %s6097_s26, 1024  ;;  %p5230_p3 = scmp.lt.u32.totalorder %s6097_s26, %s7609_s22 }
 0x10c   : > { %p5225_p6 = scmp.ne.s32.totalorder %s6097_s26, %s5224_s25  ;;  %p5231_p11 = scmp.lt.u32.totalorder %s5229_s16, %s5224_s25 }
 0x10d   : > { %p5233_p8 = scmp.lt.u32.totalorder %s5224_s25, %s6097_s26 }
 0x10e   : > { %p5227_p1 = pnand %p5226_p9, %p5225_p6  ;;  %p5232_p2 = por %p5231_p11, %p5230_p3 }
 0x110   : > { %p5228_p10 = pneg %p5227_p1  ;;  %p5234_p0 = por %p5233_p8, %p5232_p2 }
 0x112   : > { %p5235_p13 = pnand %p5234_p0, %p5228_p10 }
 0x114   : > { %5238 = shalt.err (!%p5235_p13)
}
 0x115   : > { %s5239_s0 = scalar_lea.vmem %s6099_s10, 1024  ;;  %s5677_s23 = smov [#allocation7]  }
 0x116   : > { %p5240_p6 = scmp.ne.s32.totalorder %s6099_s10, %s5239_s0  ;;  %s5244_s8 = sshll.u32 %s5677_s23, 4  ;;  %s5245_s8 = int_to_ptr.vmem [resolvable:$false] %s5244_s8 }
 0x117   : > { %s5246_s24 = scalar_lea.vmem %s5245_s8, 2048  ;;  %p5247_p5 = scmp.lt.s32.totalorder %s6099_s10, %s5245_s8 }
 0x118   : > { %p5242_p1 = pnand %p5240_p6, %p5226_p9  ;;  %p5248_p3 = scmp.lt.s32.totalorder %s5246_s24, %s5239_s0 }
 0x11a   : > { %p5243_p12 = pneg %p5242_p1  ;;  %p5249_p11 = por %p5248_p3, %p5247_p5 }
 0x11c   : > { %p5250_p8 = pnand %p5249_p11, %p5243_p12 }
 0x11e   : > { %5253 = shalt.err (!%p5250_p8)
}
 0x11f   : > { %s5678_s25 = smov 128   ;;  %s5679_s16 = smov 8  }
 0x120   : > { %4818 = dma.hbm_to_vmem [thread:$0]  (!%p6105_p4), %s6097_s26, 1024, %s6099_s10, %s6109_s11, %s5678_s25, %s5678_s25, %s5679_s16  }
 0x121   : > { %s5680_s7 = smov [#allocation4]   ;;  %s5681_s23 = smov [#allocation12]  }
 0x122   : > { %s698_s4 = sshll.u32 %s5680_s7, 4  ;;  %s725_s13 = sshll.u32 %s5681_s23, 4  ;;  %s699_s4 = int_to_ptr.vmem [resolvable:$true] %s698_s4  ;;  %s726_s13 = int_to_ptr.vmem [resolvable:$true] %s725_s13 }
 0x123   : > { %s7611_s0 = sld [smem:[#allocation51_spill]] }
 0x129   : > { %s7612_s24 = smov %s7611_s0  ;;  %s5254_s17 = scalar_lea.hbm %s7611_s0, 4096 }
 0x12a   : > { %p5255_p5 = scmp.ne.s32.totalorder %s7612_s24, %s5254_s17  ;;  %p5261_p0 = scmp.lt.u32.totalorder %s5254_s17, %s7612_s24 }
 0x12c   : > { %p5257_p12 = pnand %p5255_p5, %p5920_p7 }
 0x12e   : > { %p5258_p13 = pneg %p5257_p12 }
 0x130   : > { %p5263_p2 = pnand %p5261_p0, %p5258_p13 }
 0x132   : > { %5266 = shalt.err (!%p5263_p2)
}
 0x133   : > { %s5267_s20 = scalar_lea.vmem %s699_s4, 4096  ;;  %p5275_p6 = scmp.lt.s32.totalorder %s699_s4, %s699_s4 }
 0x134   : > { %p5268_p4 = scmp.ne.s32.totalorder %s699_s4, %s5267_s20  ;;  %p5276_p1 = scmp.lt.s32.totalorder %s5267_s20, %s5267_s20 }
 0x136   : > { %p5270_p9 = pnand %p5268_p4, %p5920_p7  ;;  %p5277_p3 = por %p5276_p1, %p5275_p6 }
 0x138   : > { %p5271_p10 = pneg %p5270_p9 }
 0x13a   : > { %p5278_p11 = pnand %p5277_p3, %p5271_p10 }
 0x13c   : > { %5281 = shalt.err (!%p5278_p11)
}
 0x13d   : > { %p7613_p8 = scmp.ne.s32.totalorder %s7593_s6, 0  ;;  %s7614_s10 = sld [smem:[#allocation59_spill]] }
 0x13f   : > { %4772 = dma.hbm_to_vmem [thread:$0]  (!%p7613_p8), %s7612_s24, 4096, %s699_s4, [#allocation5], %s5678_s25, %s5678_s25, %s5679_s16  }
 0x143   : > { %s7615_s3 = smov %s7614_s10  ;;  %s5282_s22 = scalar_lea.hbm %s7614_s10, 1024 }
 0x144   : > { %p5283_p5 = scmp.ne.s32.totalorder %s7615_s3, %s5282_s22  ;;  %p5289_p0 = scmp.lt.u32.totalorder %s5282_s22, %s7615_s3 }
 0x146   : > { %p5285_p12 = pnand %p5283_p5, %p5920_p7 }
 0x148   : > { %p5286_p13 = pneg %p5285_p12 }
 0x14a   : > { %p5291_p2 = pnand %p5289_p0, %p5286_p13 }
 0x14c   : > { %5294 = shalt.err (!%p5291_p2)
}
 0x14d   : > { %s5295_s0 = scalar_lea.vmem %s726_s13, 1024  ;;  %p5303_p6 = scmp.lt.s32.totalorder %s726_s13, %s726_s13 }
 0x14e   : > { %p5296_p4 = scmp.ne.s32.totalorder %s726_s13, %s5295_s0  ;;  %p5304_p1 = scmp.lt.s32.totalorder %s5295_s0, %s5295_s0 }
 0x150   : > { %p5298_p9 = pnand %p5296_p4, %p5920_p7  ;;  %p5305_p3 = por %p5304_p1, %p5303_p6 }
 0x152   : > { %p5299_p10 = pneg %p5298_p9 }
 0x154   : > { %p5306_p11 = pnand %p5305_p3, %p5299_p10 }
 0x156   : > { %5309 = shalt.err (!%p5306_p11)
}
 0x157   : > { %s7616_s4 = smov 4   ;;  %s7617_s25 = smov 64  }
 0x158   : > { %4778 = dma.hbm_to_vmem [thread:$0]  (!%p7613_p8), %s7615_s3, 1024, %s726_s13, [#allocation11], %s7617_s25, %s7617_s25, %s7616_s4  }
 0x159   : > { %s5682_s15 = smov [#allocation15]   ;;  %s5683_s17 = smov [#allocation18]  }
 0x15a   : > { %s750_s19 = sshll.u32 %s5682_s15, 4  ;;  %s774_s21 = sshll.u32 %s5683_s17, 4  ;;  %s751_s19 = int_to_ptr.vmem [resolvable:$true] %s750_s19  ;;  %s775_s21 = int_to_ptr.vmem [resolvable:$true] %s774_s21 }
 0x15b   : > { %s7618_s26 = sld [smem:[#allocation61_spill]] }
 0x161   : > { %s5310_s7 = scalar_lea.hbm %s7618_s26, 16 }
 0x162   : > { %p5311_p5 = scmp.ne.s32.totalorder %s7618_s26, %s5310_s7  ;;  %p5317_p0 = scmp.lt.u32.totalorder %s5310_s7, %s7618_s26 }
 0x164   : > { %p5313_p12 = pnand %p5311_p5, %p5920_p7 }
 0x166   : > { %p5314_p13 = pneg %p5313_p12 }
 0x168   : > { %p5319_p2 = pnand %p5317_p0, %p5314_p13 }
 0x16a   : > { %5322 = shalt.err (!%p5319_p2)
}
 0x16b   : > { %s5323_s13 = scalar_lea.vmem %s751_s19, 16  ;;  %s5330_s20 = scalar_lea.vmem %s751_s19, 32 }
 0x16c   : > { %p5324_p4 = scmp.ne.s32.totalorder %s751_s19, %s5323_s13  ;;  %p5331_p6 = scmp.lt.s32.totalorder %s751_s19, %s751_s19 }
 0x16d   : > { %p5332_p1 = scmp.lt.s32.totalorder %s5330_s20, %s5323_s13 }
 0x16e   : > { %p5326_p9 = pnand %p5324_p4, %p5920_p7 }
 0x16f   : > { %p5333_p3 = por %p5332_p1, %p5331_p6 }
 0x170   : > { %p5327_p10 = pneg %p5326_p9 }
 0x172   : > { %p5334_p11 = pnand %p5333_p3, %p5327_p10 }
 0x174   : > { %5337 = shalt.err (!%p5334_p11)
}
 0x175   : > { %4784 = dma.hbm_to_vmem [thread:$0]  (!%p7613_p8), %s7618_s26, 16, %s751_s19, [#allocation14]  }
 0x176   : > { %s7619_s12 = sld [smem:[#allocation63_spill]] }
 0x17c   : > { %s5338_s7 = scalar_lea.hbm %s7619_s12, 16 }
 0x17d   : > { %p5339_p5 = scmp.ne.s32.totalorder %s7619_s12, %s5338_s7  ;;  %p5345_p0 = scmp.lt.u32.totalorder %s5338_s7, %s7619_s12 }
 0x17f   : > { %p5341_p12 = pnand %p5339_p5, %p5920_p7 }
 0x181   : > { %p5342_p13 = pneg %p5341_p12 }
 0x183   : > { %p5347_p2 = pnand %p5345_p0, %p5342_p13 }
 0x185   : > { %5350 = shalt.err (!%p5347_p2)
}
 0x186   : > { %s5351_s13 = scalar_lea.vmem %s775_s21, 16  ;;  %s5358_s19 = scalar_lea.vmem %s775_s21, 32 }
 0x187   : > { %p5352_p4 = scmp.ne.s32.totalorder %s775_s21, %s5351_s13  ;;  %p5359_p6 = scmp.lt.s32.totalorder %s775_s21, %s775_s21 }
 0x188   : > { %p5360_p1 = scmp.lt.s32.totalorder %s5358_s19, %s5351_s13 }
 0x189   : > { %p5354_p9 = pnand %p5352_p4, %p5920_p7 }
 0x18a   : > { %p5361_p3 = por %p5360_p1, %p5359_p6 }
 0x18b   : > { %p5355_p10 = pneg %p5354_p9 }
 0x18d   : > { %p5362_p11 = pnand %p5361_p3, %p5355_p10 }
 0x18f   : > { %5365 = shalt.err (!%p5362_p11)
}
 0x190   : > { %4790 = dma.hbm_to_vmem [thread:$0]  (!%p7613_p8), %s7619_s12, 16, %s775_s21, [#allocation17]  }
 0x191   : > { %s5684_s17 = smov [#allocation21]   ;;  %s5685_s22 = smov [#allocation24]  }
 0x192   : > { %s796_s10 = sshll.u32 %s5684_s17, 4  ;;  %s818_s7 = sshll.u32 %s5685_s22, 4  ;;  %s797_s10 = int_to_ptr.vmem [resolvable:$true] %s796_s10  ;;  %s819_s7 = int_to_ptr.vmem [resolvable:$true] %s818_s7 }
 0x193   : > { %s7620_s14 = sld [smem:[#allocation65_spill]] }
 0x199   : > { %s5366_s0 = scalar_lea.hbm %s7620_s14, 16 }
 0x19a   : > { %p5367_p5 = scmp.ne.s32.totalorder %s7620_s14, %s5366_s0  ;;  %p5373_p0 = scmp.lt.u32.totalorder %s5366_s0, %s7620_s14 }
 0x19c   : > { %p5369_p12 = pnand %p5367_p5, %p5920_p7 }
 0x19e   : > { %p5370_p13 = pneg %p5369_p12 }
 0x1a0   : > { %p5375_p2 = pnand %p5373_p0, %p5370_p13 }
 0x1a2   : > { %5378 = shalt.err (!%p5375_p2)
}
 0x1a3   : > { %s5379_s21 = scalar_lea.vmem %s797_s10, 16  ;;  %s5386_s15 = scalar_lea.vmem %s797_s10, 32 }
 0x1a4   : > { %p5380_p4 = scmp.ne.s32.totalorder %s797_s10, %s5379_s21  ;;  %p5387_p6 = scmp.lt.s32.totalorder %s797_s10, %s797_s10 }
 0x1a5   : > { %p5388_p1 = scmp.lt.s32.totalorder %s5386_s15, %s5379_s21 }
 0x1a6   : > { %p5382_p9 = pnand %p5380_p4, %p5920_p7 }
 0x1a7   : > { %p5389_p3 = por %p5388_p1, %p5387_p6 }
 0x1a8   : > { %p5383_p10 = pneg %p5382_p9 }
 0x1aa   : > { %p5390_p11 = pnand %p5389_p3, %p5383_p10 }
 0x1ac   : > { %5393 = shalt.err (!%p5390_p11)
}
 0x1ad   : > { %4796 = dma.hbm_to_vmem [thread:$0]  (!%p7613_p8), %s7620_s14, 16, %s797_s10, [#allocation20]  }
 0x1ae   : > { %s7621_s0 = sld [smem:[#allocation67_spill]] }
 0x1b4   : > { %s7622_s16 = smov %s7621_s0  ;;  %s5394_s13 = scalar_lea.hbm %s7621_s0, 16 }
 0x1b5   : > { %p5395_p5 = scmp.ne.s32.totalorder %s7622_s16, %s5394_s13  ;;  %p5401_p0 = scmp.lt.u32.totalorder %s5394_s13, %s7622_s16 }
 0x1b7   : > { %p5397_p12 = pnand %p5395_p5, %p5920_p7 }
 0x1b9   : > { %p5398_p13 = pneg %p5397_p12 }
 0x1bb   : > { %p5403_p2 = pnand %p5401_p0, %p5398_p13 }
 0x1bd   : > { %5406 = shalt.err (!%p5403_p2)
}
 0x1be   : > { %s5407_s17 = scalar_lea.vmem %s819_s7, 16  ;;  %s5414_s10 = scalar_lea.vmem %s819_s7, 32 }
 0x1bf   : > { %p5408_p4 = scmp.ne.s32.totalorder %s819_s7, %s5407_s17  ;;  %p5415_p6 = scmp.lt.s32.totalorder %s819_s7, %s819_s7 }
 0x1c0   : > { %p5416_p1 = scmp.lt.s32.totalorder %s5414_s10, %s5407_s17 }
 0x1c1   : > { %p5410_p9 = pnand %p5408_p4, %p5920_p7 }
 0x1c2   : > { %p5417_p3 = por %p5416_p1, %p5415_p6 }
 0x1c3   : > { %p5411_p10 = pneg %p5410_p9 }
 0x1c5   : > { %p5418_p11 = pnand %p5417_p3, %p5411_p10 }
 0x1c7   : > { %5421 = shalt.err (!%p5418_p11)
}
 0x1c8   : > { %4802 = dma.hbm_to_vmem [thread:$0]  (!%p7613_p8), %s7622_s16, 16, %s819_s7, [#allocation23]  }
 0x1c9   : > { %s5686_s8 = smov [#allocation27]   ;;  %s5687_s13 = smov [#allocation30]  }
 0x1ca   : > { %s842_s0 = sshll.u32 %s5686_s8, 4  ;;  %s872_s19 = sshll.u32 %s5687_s13, 4  ;;  %s843_s0 = int_to_ptr.vmem [resolvable:$true] %s842_s0  ;;  %s873_s19 = int_to_ptr.vmem [resolvable:$true] %s872_s19 }
 0x1cb   : > { %s7623_s15 = sld [smem:[#allocation69_spill]] }
 0x1d1   : > { %s5422_s3 = scalar_lea.hbm %s7623_s15, 16 }
 0x1d2   : > { %p5423_p5 = scmp.ne.s32.totalorder %s7623_s15, %s5422_s3  ;;  %p5429_p0 = scmp.lt.u32.totalorder %s5422_s3, %s7623_s15 }
 0x1d4   : > { %p5425_p12 = pnand %p5423_p5, %p5920_p7 }
 0x1d6   : > { %p5426_p13 = pneg %p5425_p12 }
 0x1d8   : > { %p5431_p2 = pnand %p5429_p0, %p5426_p13 }
 0x1da   : > { %5434 = shalt.err (!%p5431_p2)
}
 0x1db   : > { %s5435_s7 = scalar_lea.vmem %s843_s0, 16  ;;  %s5442_s23 = scalar_lea.vmem %s843_s0, 32 }
 0x1dc   : > { %p5436_p4 = scmp.ne.s32.totalorder %s843_s0, %s5435_s7  ;;  %p5443_p6 = scmp.lt.s32.totalorder %s843_s0, %s843_s0 }
 0x1dd   : > { %p5444_p1 = scmp.lt.s32.totalorder %s5442_s23, %s5435_s7 }
 0x1de   : > { %p5438_p9 = pnand %p5436_p4, %p5920_p7 }
 0x1df   : > { %p5445_p3 = por %p5444_p1, %p5443_p6 }
 0x1e0   : > { %p5439_p10 = pneg %p5438_p9 }
 0x1e2   : > { %p5446_p11 = pnand %p5445_p3, %p5439_p10 }
 0x1e4   : > { %5449 = shalt.err (!%p5446_p11)
}
 0x1e5   : > { %4808 = dma.hbm_to_vmem [thread:$0]  (!%p7613_p8), %s7623_s15, 16, %s843_s0, [#allocation26]  }
 0x1e6   : > { %s7624_s20 = sld [smem:[#allocation74_spill]] }
 0x1ec   : > { %s5450_s21 = scalar_lea.hbm %s7624_s20, 3072 }
 0x1ed   : > { %p5451_p5 = scmp.ne.s32.totalorder %s7624_s20, %s5450_s21  ;;  %p5457_p0 = scmp.lt.u32.totalorder %s5450_s21, %s7624_s20 }
 0x1ef   : > { %p5453_p12 = pnand %p5451_p5, %p5920_p7 }
 0x1f1   : > { %p5454_p13 = pneg %p5453_p12 }
 0x1f3   : > { %p5459_p2 = pnand %p5457_p0, %p5454_p13 }
 0x1f5   : > { %5462 = shalt.err (!%p5459_p2)
}
 0x1f6   : > { %s5463_s23 = scalar_lea.vmem %s873_s19, 3072  ;;  %p5471_p6 = scmp.lt.s32.totalorder %s873_s19, %s873_s19 }
 0x1f7   : > { %p5464_p4 = scmp.ne.s32.totalorder %s873_s19, %s5463_s23  ;;  %p5472_p1 = scmp.lt.s32.totalorder %s5463_s23, %s5463_s23 }
 0x1f9   : > { %p5466_p9 = pnand %p5464_p4, %p5920_p7  ;;  %p5473_p3 = por %p5472_p1, %p5471_p6 }
 0x1fb   : > { %p5467_p10 = pneg %p5466_p9 }
 0x1fd   : > { %p5474_p11 = pnand %p5473_p3, %p5467_p10 }
 0x1ff   : > { %5477 = shalt.err (!%p5474_p11)
}
 0x200   : > { %s7625_s13 = sld [smem:[#allocation48_spill]]  ;;  %s7626_s12 = sld [smem:[#allocation45_spill]] }
 0x201   : > { %s7627_s3 = sld [smem:[#allocation44_spill]]  ;;  %s7628_s27 = sld [smem:[#allocation43_spill]] }
 0x202   : > { %4814 = dma.hbm_to_vmem [thread:$0]  (!%p7613_p8), %s7624_s20, 3072, %s873_s19, [#allocation29], %s7617_s25, %s7617_s25, %s7616_s4  }
 0x203   : > { %s7629_s17 = sadd.s32 1, %s5662_s29  ;;  %p7630_p13 = scmp.eq.s32.totalorder %s5666_s1, 0 }
 0x204   : > { %p7632_p4 = scmp.eq.s32.totalorder %s5891_s2, 0  ;;  %s7634_s8 = sld [smem:[#allocation56_spill]] }
 0x205   : > { %s7636_s15 = sadd.s32 1, %s5646_s5  ;;  %p7637_p6 = scmp.lt.s32.totalorder %s5666_s1, 12 }
 0x206   : > { %s60_s6 = sadd.s32 1, %s7625_s13  ;;  %s195_s21 = sadd.s32 1, %s7626_s12 }
 0x207   : > { %p61_p7 = scmp.ge.s32.totalorder %s60_s6, 3  ;;  %p202_p5 = scmp.ne.s32.totalorder %s7626_s12, %s7627_s3 }
 0x208   : > { %p208_p12 = scmp.ne.s32.totalorder %s7627_s3, %s7628_s27  ;;  %s942_s25 = sand.u32 1, %s7626_s12  }
 0x209   : > { %s7763_s6 = smov (%p61_p7, %s60_s6), 0  ;;  %s7765_s17 = smov (!%p61_p7, %s7629_s17), %s5662_s29 }
 0x20a   : > { %s192_s10 = ssub.s32 %s7625_s13, %s7763_s6  ;;  %p6302_p0 = por %p202_p5, %p7630_p13 }
 0x20b   : > { %p65_p8 = scmp.ge.s32.totalorder %s7765_s17, 4  ;;  %p193_p2 = scmp.eq.s32.totalorder %s192_s10, 0 }
 0x20c   : > { %p6308_p9 = por %p208_p12, %p7632_p4  ;;  %s4079_s7 = sshll.u32 %s7625_s13, 4 }
 0x20d   : > { %s7767_s17 = smov (%p65_p8, %s7765_s17), 0  ;;  %s7769_s12 = smov (!%p193_p2, %s7626_s12), %s195_s21 }
 0x20e   : > { %s88_s19 = ssub.s32 %s5662_s29, %s7767_s17  ;;  %s7635_s3 = smov %s7634_s8 }
 0x20f   : > { %p89_p10 = scmp.eq.s32.totalorder %s88_s19, 0  ;;  %s6324_s27 = scalar_lea.hbm %s7634_s8, %s4079_s7 }
 0x210   : > { %s943_s10 = scalar_lea.vmem [#allocation9], %s942_s25  ;;  %p6337_p1 = pnand %p7637_p6, %p6302_p0 }
 0x211   : > { %s950_s14 = sshll.u32 %s943_s10, 4  ;;  %s5478_s21 = scalar_lea.hbm %s6324_s27, 16  ;;  %s6331_s14 = int_to_ptr.vmem [resolvable:$true] %s950_s14 }
 0x212   : > { %s6329_s16 = scalar_select %p89_p10, %s5646_s5, %s7636_s15  }
 0x213   : > { %p5479_p3 = scmp.ne.s32.totalorder %s6324_s27, %s5478_s21  ;;  %p5480_p11 = pneg %p6337_p1 }
 0x214   : > { %s5483_s19 = scalar_lea.hbm %s7635_s3, 48  ;;  %p5484_p12 = scmp.lt.u32.totalorder %s6324_s27, %s7635_s3 }
 0x215   : > { %p5481_p7 = pnand %p5480_p11, %p5479_p3  ;;  %p5485_p13 = scmp.lt.u32.totalorder %s5483_s19, %s5478_s21 }
 0x216   : > { %p5487_p8 = scmp.lt.u32.totalorder %s5478_s21, %s6324_s27 }
 0x217   : > { %p5482_p5 = pneg %p5481_p7  ;;  %p5486_p0 = por %p5485_p13, %p5484_p12 }
 0x219   : > { %p5488_p2 = por %p5487_p8, %p5486_p0 }
 0x21b   : > { %p5489_p4 = pnand %p5488_p2, %p5482_p5 }
 0x21d   : > { %5492 = shalt.err (!%p5489_p4)
}
 0x21e   : > { %s5493_s23 = scalar_lea.vmem %s6331_s14, 16  ;;  %s5688_s0 = smov [#allocation9]  }
 0x21f   : > { %p5494_p10 = scmp.ne.s32.totalorder %s6331_s14, %s5493_s23  ;;  %s5498_s8 = sshll.u32 %s5688_s0, 4  ;;  %s5499_s8 = int_to_ptr.vmem [resolvable:$false] %s5498_s8 }
 0x220   : > { %s5500_s10 = scalar_lea.vmem %s5499_s8, 32  ;;  %p5501_p7 = scmp.lt.s32.totalorder %s6331_s14, %s5499_s8 }
 0x221   : > { %p5496_p6 = pnand %p5494_p10, %p5480_p11  ;;  %p5502_p12 = scmp.lt.s32.totalorder %s5500_s10, %s5493_s23 }
 0x223   : > { %p5497_p3 = pneg %p5496_p6  ;;  %p5503_p13 = por %p5502_p12, %p5501_p7 }
 0x225   : > { %p5504_p0 = pnand %p5503_p13, %p5497_p3 }
 0x227   : > { %5507 = shalt.err (!%p5504_p0)
}
 0x228   : > { %4821 = dma.hbm_to_vmem [thread:$0]  (!%p6337_p1), %s6324_s27, 16, %s6331_s14, %s6109_s11  }
 0x229   : > { %s7639_s21 = sld [smem:[#allocation49_spill]] }
 0x22f   : > { %p7640_p5 = scmp.ne.s32.totalorder %s7639_s21, 0 }
 0x230   : > { %p7641_p11 = scmp.eq.s32.totalorder (!%p7640_p5), %s5891_s2, 0 }
 0x231   : > { %959 = sbr.rel (%p7640_p5) target bundleno = 2118 (0x846), region = 128 }
 0x238   : > { %5581 = dma.done.wait (%p7641_p11), [#allocation5], 4096   ;;  %p7642_p8 = pmov %p7641_p11 }
 0x239   : > { %s965_s15 = sand.u32 1, %s5891_s2   ;;  %s7541_s25 = sand.u32 1, %s5642_s9  }
 0x23a   : > { %5583 = vsyncadd (%p7642_p8), [#allocation5], 4294963200  ;;  %s6377_s13 = sshll.u32 %s7541_s25, 6  ;;  %s966_s14 = scalar_lea.sflag [#allocation8], %s965_s15 }
 0x23b   : > { %s6380_s11 = scalar_lea.vmem [#allocation7], %s6377_s13  ;;  %p7643_p1 = scmp.ne.s32.totalorder %s7605_s28, 0 }
 0x23d   : > { %5585 = dma.done.wait (%p7643_p1), %s966_s14, 1024  }
 0x23e   : > { %5587 = vsyncadd (%p7643_p1), %s966_s14, 4294966272  ;;  %s7644_s27 = sld [smem:[#allocation44_spill]] }
 0x244   : > { %s976_s19 = sand.u32 1, %s7644_s27  }
 0x245   : > { %s6387_s22 = scalar_lea.vmem [#allocation9], %s976_s19 }
 0x246   : > { %5589 = dma.done.wait (%p6308_p9), %s966_s14, 16  }
 0x247   : > { %5591 = vsyncadd (%p6308_p9), %s966_s14, 4294967280  ;;  %p7645_p2 = pmov %p7642_p8 }
 0x249   : > { %5593 = dma.done.wait (%p7645_p2), [#allocation11], 1040   ;;  %p7646_p4 = pmov %p7645_p2 }
 0x24a   : > { %p7647_p10 = pmov %p7645_p2 }
 0x24b   : > { %5595 = vsyncadd (%p7646_p4), [#allocation11], 4294966256 }
 0x24c   : > { %5597 = dma.done.wait (%p7647_p10), [#allocation14], 32   ;;  %p7648_p6 = pmov %p7645_p2 }
 0x24d   : > { %p7649_p3 = pmov %p7645_p2 }
 0x24e   : > { %5599 = vsyncadd (%p7648_p6), [#allocation14], 4294967264 }
 0x24f   : > { %5601 = dma.done.wait (%p7649_p3), [#allocation17], 1040   ;;  %p7650_p7 = pmov %p7645_p2 }
 0x250   : > { %p7651_p9 = pmov %p7645_p2 }
 0x251   : > { %5603 = vsyncadd (%p7650_p7), [#allocation17], 4294966256 }
 0x252   : > { %5605 = dma.done.wait (%p7651_p9), [#allocation20], 32   ;;  %p7652_p12 = pmov %p7645_p2 }
 0x253   : > { %p7653_p13 = pmov %p7645_p2 }
 0x254   : > { %5607 = vsyncadd (%p7652_p12), [#allocation20], 4294967264 }
 0x255   : > { %5609 = dma.done.wait (%p7653_p13), [#allocation23], 32   ;;  %p7654_p0 = pmov %p7645_p2 }
 0x257   : > { %5611 = vsyncadd (%p7654_p0), [#allocation23], 4294967264  ;;  %p7655_p5 = pmov %p7654_p0 }
 0x258   : > { %p7656_p11 = pmov %p7654_p0 }
 0x259   : > { %5613 = dma.done.wait (%p7655_p5), [#allocation26], 1040  }
 0x25a   : > { %5615 = vsyncadd (%p7656_p11), [#allocation26], 4294966256  ;;  %p7657_p8 = pmov %p7654_p0 }
 0x25b   : > { %p7658_p1 = pmov %p7654_p0 }
 0x25c   : > { %5617 = dma.done.wait (%p7657_p8), [#allocation29], 3088  }
 0x25d   : > { %5619 = vsyncadd (%p7658_p1), [#allocation29], 4294964208  ;;  %s7659_s28 = sld [smem:[#allocation46_spill]]  ;;  %s7660_s10 = sld [smem:[#allocation53_spill]] }
 0x25e   : > { %s7661_s14 = sld [smem:[#allocation54_spill]]  ;;  %s7662_s3 = sld [smem:[#allocation55_spill]] }
 0x25f   : > { %s6441_s24 = scalar_lea.vmem [#allocation31], %s6377_s13 }
 0x263   : > { %s4098_s4 = sshll.u32 %s7659_s28, 4  ;;  %p1134_p4 = scmp.lt.s32.totalorder %s7659_s28, 2 }
 0x264   : > { %p1123_p2 = scmp.lt.s32.totalorder %s4098_s4, 47  ;;  %p4102_p10 = scmp.ne.s32.totalorder %s7659_s28, 0 }
 0x265   : > { %s6424_s7 = scalar_select %p1134_p4, %s7659_s28, 2 }
 0x266   : > { %s7771_s4 = smov (!%p1123_p2, %s4098_s4), 47  ;;  %1142 = sbr.rel (%p4102_p10) target bundleno = 919 (0x397), region = 200 }
 0x267   : > { %s4099_s23 = sshll.u32 %s7771_s4, 3  ;;  %s1136_s20 = scalar_lea.vmem %s7662_s3, %s6424_s7  ;;  %v4970_v0 = vld [vmem:[#allocation16] sm:$0xff] (!%p4102_p10)   ;;  %v4971_v1 = vld [vmem:[#allocation16 + $0x8] sm:$0xff] (!%p4102_p10)   ;;  %v4972_v2 = vld [vmem:[#allocation16 + $0x10] sm:$0xff] (!%p4102_p10)  }
 0x268   : > { %s6429_s21 = scalar_lea.vmem %s7660_s10, %s4099_s23  ;;  %s6434_s27 = scalar_lea.vmem %s7661_s14, %s4099_s23  ;;  %4455 = vmatprep.subr.bf16.mxu0 (!%p4102_p10), %v4970_v0  ;;  %4679 = vmatprep.subr.bf16.mxu1 (!%p4102_p10), %v4970_v0  ;;  %v4973_v3 = vld [vmem:[#allocation16 + $0x18] sm:$0xff] (!%p4102_p10)   ;;  %v1144_v5 = vld [vmem:[#allocation4 + $0x8] sm:$0xff] (!%p4102_p10)  ;;  %v1145_v14 = vld [vmem:[#allocation4 + $0x10] sm:$0xff] (!%p4102_p10) }
 0x269   : > { %4456 = vmatpush3.bf16.msra.mxu0 (!%p4102_p10), %v4970_v0  ;;  %4687 = vmatpush3.bf16.msra.mxu1 (!%p4102_p10), %v4970_v0  ;;  %v1143_v4 = vld [vmem:[#allocation4] sm:$0xff] (!%p4102_p10)  ;;  %v1160_v11 = vld [vmem:[#allocation4 + $0x88] sm:$0xff] (!%p4102_p10)  ;;  %v1146_v15 = vld [vmem:[#allocation4 + $0x18] sm:$0xff] (!%p4102_p10) }
 0x26a   : > { %4457 = vmatprep.subr.bf16.mxu0 (!%p4102_p10), %v4971_v1  ;;  %4680 = vmatprep.subr.bf16.mxu1 (!%p4102_p10), %v4971_v1  ;;  %v6444_v6 = vld [vmem:[#allocation13] ss:$0 sm:$0xff] (!%p4102_p10)  ;;  %v6448_v9 = vld [vmem:[#allocation15] ss:$0 sm:$0xff] (!%p4102_p10)  ;;  %v4974_v19 = vld [vmem:[#allocation16 + $0x20] sm:$0xff] (!%p4102_p10)  }
 0x26b   : > { %v1182_v7 = vmul.f32 (!%p4102_p10), %v6444_v6, %v1143_v4  ;;  %v1183_v8 = vmul.f32 (!%p4102_p10), %v6444_v6, %v1144_v5  ;;  %v1159_v10 = vld [vmem:[#allocation4 + $0x80] sm:$0xff] (!%p4102_p10)  ;;  %v1199_v13 = vmul.f32 (!%p4102_p10), %v6444_v6, %v1160_v11  ;;  %v1184_v18 = vmul.f32 (!%p4102_p10), %v6444_v6, %v1145_v14  ;;  %v1161_v25 = vld [vmem:[#allocation4 + $0x90] sm:$0xff] (!%p4102_p10)  ;;  %v1162_v31 = vld [vmem:[#allocation4 + $0x98] sm:$0xff] (!%p4102_p10) }
 0x26c   : > { %v1198_v12 = vmul.f32 (!%p4102_p10), %v6444_v6, %v1159_v10  ;;  %v1185_v22 = vmul.f32 (!%p4102_p10), %v6444_v6, %v1146_v15  ;;  %v1147_v32 = vld [vmem:[#allocation4 + $0x20] sm:$0xff] (!%p4102_p10)  ;;  %v1148_v33 = vld [vmem:[#allocation4 + $0x28] sm:$0xff] (!%p4102_p10)  ;;  %v4975_v34 = vld [vmem:[#allocation16 + $0x28] sm:$0xff] (!%p4102_p10)   ;;  %v1200_v42 = vmul.f32 (!%p4102_p10), %v6444_v6, %v1161_v25  ;;  %v1201_v43 = vmul.f32 (!%p4102_p10), %v6444_v6, %v1162_v31 }
 0x26d   : > { %4458 = vmatpush3.bf16.msra.mxu0 %v4971_v1  ;;  %4688 = vmatpush3.bf16.msra.mxu1 %v4971_v1  ;;  %v1221_v16 = vadd.f32 %v6448_v9, %v1182_v7  ;;  %v1222_v17 = vadd.f32 %v6448_v9, %v1183_v8  ;;  %v1238_v21 = vadd.f32 %v6448_v9, %v1199_v13  ;;  %v1163_v38 = vld [vmem:[#allocation4 + $0xa0] sm:$0xff]  ;;  %v1164_v46 = vld [vmem:[#allocation4 + $0xa8] sm:$0xff]  ;;  %v4976_v50 = vld [vmem:[#allocation16 + $0x30] sm:$0xff]  }
 0x26e   : > { %4459 = vmatprep.subr.bf16.mxu0 %v4972_v2  ;;  %4681 = vmatprep.subr.bf16.mxu1 %v4972_v2  ;;  %v1237_v20 = vadd.f32 %v6448_v9, %v1198_v12  ;;  %v1223_v30 = vadd.f32 %v6448_v9, %v1184_v18  ;;  %v1224_v40 = vadd.f32 %v6448_v9, %v1185_v22  ;;  %v1149_v60 = vld [vmem:[#allocation4 + $0x30] sm:$0xff]  ;;  %v4977_v63 = vld [vmem:[#allocation16 + $0x38] sm:$0xff]   ;;  %v1166_v14 = vld [vmem:[#allocation4 + $0xb8] sm:$0xff] }
 0x26f   : > { %vm1253_vm0 = vcmp.ge.f32.partialorder %v1221_v16, 0.0  ;;  %vm1254_vm1 = vcmp.ge.f32.partialorder %v1222_v17, 0.0  ;;  %v1285_v23 = vmul.f32 0.1, %v1221_v16  ;;  %v1286_v24 = vmul.f32 0.1, %v1222_v17 }
 0x270   : > { %vm1269_vm2 = vcmp.ge.f32.partialorder %v1237_v20, 0.0  ;;  %vm1270_vm3 = vcmp.ge.f32.partialorder %v1238_v21, 0.0  ;;  %v1301_v26 = vmul.f32 0.1, %v1237_v20  ;;  %v1302_v27 = vmul.f32 0.1, %v1238_v21 }
 0x271   : > { %4460 = vmatpush3.bf16.msra.mxu0 %v4972_v2  ;;  %4689 = vmatpush3.bf16.msra.mxu1 %v4972_v2  ;;  %v1317_v28 = vsel %vm1253_vm0, %v1221_v16, %v1285_v23  ;;  %v1318_v29 = vsel %vm1254_vm1, %v1222_v17, %v1286_v24  ;;  %vm1255_vm4 = vcmp.ge.f32.partialorder %v1223_v30, 0.0  ;;  %v1287_v41 = vmul.f32 0.1, %v1223_v30  ;;  %v1165_v10 = vld [vmem:[#allocation4 + $0xb0] sm:$0xff]  ;;  %v1151_v15 = vld [vmem:[#allocation4 + $0x40] sm:$0xff] }
 0x272   : > { %4461 = vmatprep.subr.bf16.mxu0 %v4973_v3  ;;  %4682 = vmatprep.subr.bf16.mxu1 %v4973_v3  ;;  %v1365_v35 = vpack.c.bf16 %v1318_v29, %v1317_v28  ;;  %v1333_v36 = vsel %vm1269_vm2, %v1237_v20, %v1301_v26  ;;  %v1334_v37 = vsel %vm1270_vm3, %v1238_v21, %v1302_v27  ;;  %vm1256_vm5 = vcmp.ge.f32.partialorder %v1224_v40, 0.0 }
 0x273   : > { %v1373_v39 = vpack.c.bf16 %v1334_v37, %v1333_v36  ;;  %v1186_v44 = vmul.f32 %v6444_v6, %v1147_v32  ;;  %v1187_v45 = vmul.f32 %v6444_v6, %v1148_v33  ;;  %v1288_v47 = vmul.f32 0.1, %v1224_v40  ;;  %v1167_v36 = vld [vmem:[#allocation4 + $0xc0] sm:$0xff]  ;;  %v1168_v37 = vld [vmem:[#allocation4 + $0xc8] sm:$0xff] }
 0x274   : > { %4471 = vmatprep.mubr.bf16.mxu0 %v1365_v35  ;;  %v6466_v48 = vsel %vm1255_vm4, %v1223_v30, %v1287_v41  ;;  %v1202_v49 = vmul.f32 %v6444_v6, %v1163_v38  ;;  %v1239_v51 = vadd.f32 %v6448_v9, %v1200_v42  ;;  %v1240_v52 = vadd.f32 %v6448_v9, %v1201_v43  ;;  %v1154_v41 = vld [vmem:[#allocation4 + $0x58] sm:$0xff] }
 0x275   : > { %4462 = vmatpush3.bf16.msra.mxu0 %v4973_v3  ;;  %4690 = vmatpush3.bf16.msra.mxu1 %v4973_v3  ;;  %v1225_v53 = vadd.f32 %v6448_v9, %v1186_v44  ;;  %v6472_v54 = vsel %vm1256_vm5, %v1224_v40, %v1288_v47  ;;  %v1226_v55 = vadd.f32 %v6448_v9, %v1187_v45  ;;  %v1150_v3 = vld [vmem:[#allocation4 + $0x38] sm:$0xff]  ;;  %v1153_v40 = vld [vmem:[#allocation4 + $0x50] sm:$0xff] }
 0x276   : > { %4463 = vmatprep.subr.bf16.mxu0 %v4974_v19  ;;  %4683 = vmatprep.subr.bf16.mxu1 %v4974_v19  ;;  %v1203_v56 = vmul.f32 %v6444_v6, %v1164_v46  ;;  %v1241_v57 = vadd.f32 %v6448_v9, %v1202_v49  ;;  %v1366_v58 = vpack.c.bf16 %v6472_v54, %v6466_v48  ;;  %vm1271_vm6 = vcmp.ge.f32.partialorder %v1239_v51, 0.0  ;;  %v1169_v45 = vld [vmem:[#allocation4 + $0xd0] sm:$0xff] }
 0x277   : > { %4487 = vmatprep.mubr.bf16.mxu1 %v1373_v39  ;;  %vm1272_vm7 = vcmp.ge.f32.partialorder %v1240_v52, 0.0  ;;  %v1303_v59 = vmul.f32 0.1, %v1239_v51  ;;  %v1304_v61 = vmul.f32 0.1, %v1240_v52  ;;  %vm1257_vm8 = vcmp.ge.f32.partialorder %v1225_v53, 0.0 }
 0x278   : > { %vm1258_vm9 = vcmp.ge.f32.partialorder %v1226_v55, 0.0  ;;  %v1289_v62 = vmul.f32 0.1, %v1225_v53  ;;  %v1290_v1 = vmul.f32 0.1, %v1226_v55  ;;  %v1242_v2 = vadd.f32 %v6448_v9, %v1203_v56 }
 0x279   : > { %4464 = vmatpush3.bf16.msra.mxu0 %v4974_v19  ;;  %4691 = vmatpush3.bf16.msra.mxu1 %v4974_v19  ;;  %v1335_v0 = vsel %vm1271_vm6, %v1239_v51, %v1303_v59  ;;  %vm1273_vm10 = vcmp.ge.f32.partialorder %v1241_v57, 0.0  ;;  %v1336_v4 = vsel %vm1272_vm7, %v1240_v52, %v1304_v61  ;;  %v1305_v7 = vmul.f32 0.1, %v1241_v57  ;;  %v1152_v19 = vld [vmem:[#allocation4 + $0x48] sm:$0xff]  ;;  %v1170_v51 = vld [vmem:[#allocation4 + $0xd8] sm:$0xff] }
 0x27a   : > { %4465 = vmatprep.subr.bf16.mxu0 %v4975_v34  ;;  %4684 = vmatprep.subr.bf16.mxu1 %v4975_v34  ;;  %v1321_v5 = vsel %vm1257_vm8, %v1225_v53, %v1289_v62  ;;  %v1188_v8 = vmul.f32 %v6444_v6, %v1149_v60  ;;  %v1374_v11 = vpack.c.bf16 %v1336_v4, %v1335_v0  ;;  %vm1274_vm11 = vcmp.ge.f32.partialorder %v1242_v2, 0.0 }
 0x27b   : > { %v1322_v12 = vsel %vm1258_vm9, %v1226_v55, %v1290_v1  ;;  %v1306_v13 = vmul.f32 0.1, %v1242_v2  ;;  %v1337_v17 = vsel %vm1273_vm10, %v1241_v57, %v1305_v7  ;;  %v1189_v18 = vmul.f32 %v6444_v6, %v1150_v3 }
 0x27c   : > { %v1367_v16 = vpack.c.bf16 %v1322_v12, %v1321_v5  ;;  %v1227_v21 = vadd.f32 %v6448_v9, %v1188_v8  ;;  %v1204_v22 = vmul.f32 %v6444_v6, %v1165_v10  ;;  %v1205_v25 = vmul.f32 %v6444_v6, %v1166_v14  ;;  %v1155_v8 = vld [vmem:[#allocation4 + $0x60] sm:$0xff]  ;;  %v1156_v10 = vld [vmem:[#allocation4 + $0x68] sm:$0xff] }
 0x27d   : > { %4466 = vmatpush3.bf16.msra.mxu0 %v4975_v34  ;;  %4692 = vmatpush3.bf16.msra.mxu1 %v4975_v34  ;;  %v1338_v20 = vsel %vm1274_vm11, %v1242_v2, %v1306_v13  ;;  %v1228_v24 = vadd.f32 %v6448_v9, %v1189_v18  ;;  %v1190_v26 = vmul.f32 %v6444_v6, %v1151_v15  ;;  %v1172_v15 = vld [vmem:[#allocation4 + $0xe8] sm:$0xff] }
 0x27e   : > { %4467 = vmatprep.subr.bf16.mxu0 %v4976_v50  ;;  %4685 = vmatprep.subr.bf16.mxu1 %v4976_v50  ;;  %v1375_v23 = vpack.c.bf16 %v1338_v20, %v1337_v17  ;;  %vm1259_vm12 = vcmp.ge.f32.partialorder %v1227_v21, 0.0  ;;  %v1291_v27 = vmul.f32 0.1, %v1227_v21  ;;  %v1243_v28 = vadd.f32 %v6448_v9, %v1204_v22  ;;  %v1158_v17 = vld [vmem:[#allocation4 + $0x78] sm:$0xff] }
 0x27f   : > { %v1191_v29 = vmul.f32 %v6444_v6, %v1152_v19  ;;  %vm1260_vm13 = vcmp.ge.f32.partialorder %v1228_v24, 0.0  ;;  %v1292_v30 = vmul.f32 0.1, %v1228_v24  ;;  %v1244_v31 = vadd.f32 %v6448_v9, %v1205_v25 }
 0x280   : > { %v1229_v32 = vadd.f32 %v6448_v9, %v1190_v26  ;;  %v1323_v33 = vsel %vm1259_vm12, %v1227_v21, %v1291_v27  ;;  %vm1275_vm14 = vcmp.ge.f32.partialorder %v1243_v28, 0.0  ;;  %v1307_v34 = vmul.f32 0.1, %v1243_v28 }
 0x281   : > { %4468 = vmatpush3.bf16.msra.mxu0 %v4976_v50  ;;  %4693 = vmatpush3.bf16.msra.mxu1 %v4976_v50  ;;  %v1230_v35 = vadd.f32 %v6448_v9, %v1191_v29  ;;  %v1324_v38 = vsel %vm1260_vm13, %v1228_v24, %v1292_v30  ;;  %vm1276_vm15 = vcmp.ge.f32.partialorder %v1244_v31, 0.0  ;;  %v1308_v39 = vmul.f32 0.1, %v1244_v31 }
 0x282   : > { %4469 = vmatprep.subr.bf16.mxu0 %v4977_v63  ;;  %4686 = vmatprep.subr.bf16.mxu1 %v4977_v63  ;;  %vm1261_vm0 = vcmp.ge.f32.partialorder %v1229_v32, 0.0  ;;  %v1368_v42 = vpack.c.bf16 %v1324_v38, %v1323_v33  ;;  %v1339_v43 = vsel %vm1275_vm14, %v1243_v28, %v1307_v34  ;;  %v1293_v44 = vmul.f32 0.1, %v1229_v32 }
 0x283   : > { %vm1262_vm1 = vcmp.ge.f32.partialorder %v1230_v35, 0.0  ;;  %v1340_v46 = vsel %vm1276_vm15, %v1244_v31, %v1308_v39  ;;  %v1294_v47 = vmul.f32 0.1, %v1230_v35  ;;  %v1206_v49 = vmul.f32 %v6444_v6, %v1167_v36  ;;  %v1173_v36 = vld [vmem:[#allocation4 + $0xf0] sm:$0xff] }
 0x284   : > { %v1207_v50 = vmul.f32 %v6444_v6, %v1168_v37  ;;  %v1376_v52 = vpack.c.bf16 %v1340_v46, %v1339_v43  ;;  %v1325_v53 = vsel %vm1261_vm0, %v1229_v32, %v1293_v44  ;;  %v1192_v48 = vmul.f32 %v6444_v6, %v1153_v40  ;;  %v1174_v37 = vld [vmem:[#allocation4 + $0xf8] sm:$0xff] }
 0x285   : > { %4470 = vmatpush3.bf16.msra.mxu0 %v4977_v63  ;;  %4694 = vmatpush3.bf16.msra.mxu1 %v4977_v63  ;;  %v1193_v54 = vmul.f32 %v6444_v6, %v1154_v41  ;;  %v1326_v55 = vsel %vm1262_vm1, %v1230_v35, %v1294_v47  ;;  %v1245_v56 = vadd.f32 %v6448_v9, %v1206_v49 }
 0x286   : > { %v1246_v57 = vadd.f32 %v6448_v9, %v1207_v50  ;;  %v1369_v59 = vpack.c.bf16 %v1326_v55, %v1325_v53  ;;  %v1231_v60 = vadd.f32 %v6448_v9, %v1192_v48  ;;  %v1209_v62 = vmul.f32 %v6444_v6, %v1170_v51 }
 0x287   : > { %v1232_v61 = vadd.f32 %v6448_v9, %v1193_v54  ;;  %vm1277_vm2 = vcmp.ge.f32.partialorder %v1245_v56, 0.0  ;;  %v1309_v63 = vmul.f32 0.1, %v1245_v56  ;;  %v1194_v21 = vmul.f32 %v6444_v6, %v1155_v8 }
 0x288   : > { %4472 = vmatmul.mubr.bf16.vlgmr.msra.gmra.mrb[0].mxu0 %v1366_v58  ;;  %4488 = vmatmul.mubr.bf16.vlgmr.msra.gmra.mrb[0].mxu1 %v1374_v11  ;;  %v1208_v58 = vmul.f32 %v6444_v6, %v1169_v45  ;;  %vm1278_vm3 = vcmp.ge.f32.partialorder %v1246_v57, 0.0  ;;  %v1310_v0 = vmul.f32 0.1, %v1246_v57  ;;  %vm1263_vm4 = vcmp.ge.f32.partialorder %v1231_v60, 0.0  ;;  %v1171_v11 = vld [vmem:[#allocation4 + $0xe0] sm:$0xff] }
 0x289   : > { %4475 = vmatprep.mubr.bf16.mxu0 %v1367_v16  ;;  %4491 = vmatprep.mubr.bf16.mxu1 %v1375_v23  ;;  %vm1264_vm5 = vcmp.ge.f32.partialorder %v1232_v61, 0.0  ;;  %v1295_v1 = vmul.f32 0.1, %v1231_v60  ;;  %v1296_v2 = vmul.f32 0.1, %v1232_v61  ;;  %v1341_v3 = vsel %vm1277_vm2, %v1245_v56, %v1309_v63  ;;  %v1157_v16 = vld [vmem:[#allocation4 + $0x70] sm:$0xff] }
 0x28a   : > { %v1342_v4 = vsel %vm1278_vm3, %v1246_v57, %v1310_v0  ;;  %v1247_v5 = vadd.f32 %v6448_v9, %v1208_v58  ;;  %v1248_v7 = vadd.f32 %v6448_v9, %v1209_v62  ;;  %v1195_v22 = vmul.f32 %v6444_v6, %v1156_v10  ;;  %v6529_v63 = vld [vmem:[#allocation19] ss:$0 sm:$0xff] }
 0x28b   : > { %v1377_v12 = vpack.c.bf16 %v1342_v4, %v1341_v3  ;;  %v1327_v13 = vsel %vm1263_vm4, %v1231_v60, %v1295_v1  ;;  %v1328_v14 = vsel %vm1264_vm5, %v1232_v61, %v1296_v2  ;;  %v1210_v23 = vmul.f32 %v6444_v6, %v1171_v11 }
 0x28c   : > { %v1370_v18 = vpack.c.bf16 %v1328_v14, %v1327_v13  ;;  %vm1279_vm6 = vcmp.ge.f32.partialorder %v1247_v5, 0.0  ;;  %vm1280_vm7 = vcmp.ge.f32.partialorder %v1248_v7, 0.0  ;;  %v1311_v19 = vmul.f32 0.1, %v1247_v5 }
 0x28d   : > { %v1312_v20 = vmul.f32 0.1, %v1248_v7  ;;  %v1211_v25 = vmul.f32 %v6444_v6, %v1172_v15  ;;  %v1196_v26 = vmul.f32 %v6444_v6, %v1157_v16  ;;  %v1197_v27 = vmul.f32 %v6444_v6, %v1158_v17 }
 0x28e   : > { %v1343_v24 = vsel %vm1279_vm6, %v1247_v5, %v1311_v19  ;;  %v1233_v29 = vadd.f32 %v6448_v9, %v1194_v21  ;;  %v1234_v30 = vadd.f32 %v6448_v9, %v1195_v22  ;;  %v1249_v31 = vadd.f32 %v6448_v9, %v1210_v23  ;;  %v6533_v5 = vld [vmem:[#allocation21] ss:$0 sm:$0xff] }
 0x28f   : > { %v1344_v28 = vsel %vm1280_vm7, %v1248_v7, %v1312_v20  ;;  %v1250_v33 = vadd.f32 %v6448_v9, %v1211_v25  ;;  %v1235_v34 = vadd.f32 %v6448_v9, %v1196_v26  ;;  %v1236_v35 = vadd.f32 %v6448_v9, %v1197_v27 }
 0x290   : > { %4476 = vmatmul.mubr.bf16.gmra.mrb[4].mxu0 %v1368_v42  ;;  %4492 = vmatmul.mubr.bf16.gmra.mrb[4].mxu1 %v1376_v52  ;;  %v1378_v32 = vpack.c.bf16 %v1344_v28, %v1343_v24  ;;  %vm1265_vm8 = vcmp.ge.f32.partialorder %v1233_v29, 0.0  ;;  %vm1266_vm9 = vcmp.ge.f32.partialorder %v1234_v30, 0.0  ;;  %v1297_v38 = vmul.f32 0.1, %v1233_v29 }
 0x291   : > { %4479 = vmatprep.mubr.bf16.mxu0 %v1369_v59  ;;  %4495 = vmatprep.mubr.bf16.mxu1 %v1377_v12  ;;  %v1298_v39 = vmul.f32 0.1, %v1234_v30  ;;  %vm1281_vm10 = vcmp.ge.f32.partialorder %v1249_v31, 0.0  ;;  %vm1282_vm11 = vcmp.ge.f32.partialorder %v1250_v33, 0.0  ;;  %v1313_v40 = vmul.f32 0.1, %v1249_v31 }
 0x292   : > { %v1314_v41 = vmul.f32 0.1, %v1250_v33  ;;  %v1329_v42 = vsel %vm1265_vm8, %v1233_v29, %v1297_v38  ;;  %vm1267_vm12 = vcmp.ge.f32.partialorder %v1235_v34, 0.0  ;;  %vm1268_vm13 = vcmp.ge.f32.partialorder %v1236_v35, 0.0 }
 0x293   : > { %v1330_v43 = vsel %vm1266_vm9, %v1234_v30, %v1298_v39  ;;  %v1345_v45 = vsel %vm1281_vm10, %v1249_v31, %v1313_v40  ;;  %v1299_v47 = vmul.f32 0.1, %v1235_v34  ;;  %v1300_v50 = vmul.f32 0.1, %v1236_v35 }
 0x294   : > { %v1371_v44 = vpack.c.bf16 %v1330_v43, %v1329_v42  ;;  %v1346_v46 = vsel %vm1282_vm11, %v1250_v33, %v1314_v41  ;;  %v1212_v51 = vmul.f32 %v6444_v6, %v1173_v36  ;;  %v1213_v52 = vmul.f32 %v6444_v6, %v1174_v37  ;;  %v6527_v6 = vld [vmem:[#allocation18] ss:$0 sm:$0xff] }
 0x295   : > { %v1379_v49 = vpack.c.bf16 %v1346_v46, %v1345_v45  ;;  %v1331_v53 = vsel %vm1267_vm12, %v1235_v34, %v1299_v47  ;;  %v1332_v48 = vsel %vm1268_vm13, %v1236_v35, %v1300_v50  ;;  %v5689_v62 = vmov 0.0  }
 0x296   : > { %v1251_v54 = vadd.f32 %v6448_v9, %v1212_v51  ;;  %v1252_v55 = vadd.f32 %v6448_v9, %v1213_v52  ;;  %v1372_v56 = vpack.c.bf16 %v1332_v48, %v1331_v53  ;;  %1803 = vst [vmem:[#allocation3] sm:$0xff] %v5689_v62  ;;  %1804 = vst [vmem:[#allocation3 + $0x8] sm:$0xff] %v5689_v62 }
 0x297   : > { %1805 = vst [vmem:[#allocation3 + $0x10] sm:$0xff] %v5689_v62  ;;  %1806 = vst [vmem:[#allocation3 + $0x18] sm:$0xff] %v5689_v62 }
 0x298   : > { %4480 = vmatmul.mubr.bf16.gmra.mrb[8].mxu0 %v1370_v18  ;;  %4496 = vmatmul.mubr.bf16.gmra.mrb[8].mxu1 %v1378_v32  ;;  %vm1283_vm14 = vcmp.ge.f32.partialorder %v1251_v54, 0.0  ;;  %vm1284_vm15 = vcmp.ge.f32.partialorder %v1252_v55, 0.0  ;;  %v1315_v57 = vmul.f32 0.1, %v1251_v54  ;;  %v1316_v58 = vmul.f32 0.1, %v1252_v55 }
 0x299   : > { %4483 = vmatprep.mubr.bf16.mxu0 %v1371_v44  ;;  %4499 = vmatprep.mubr.bf16.mxu1 %v1379_v49  ;;  %1807 = vst [vmem:[#allocation3 + $0x20] sm:$0xff] %v5689_v62  ;;  %1808 = vst [vmem:[#allocation3 + $0x28] sm:$0xff] %v5689_v62 }
 0x29a   : > { %v1347_v59 = vsel %vm1283_vm14, %v1251_v54, %v1315_v57  ;;  %v1348_v60 = vsel %vm1284_vm15, %v1252_v55, %v1316_v58  ;;  %1809 = vst [vmem:[#allocation3 + $0x30] sm:$0xff] %v5689_v62  ;;  %1810 = vst [vmem:[#allocation3 + $0x38] sm:$0xff] %v5689_v62 }
 0x29b   : > { %v1380_v61 = vpack.c.bf16 %v1348_v60, %v1347_v59  ;;  %1811 = vst [vmem:[#allocation3 + $0x40] sm:$0xff] %v5689_v62  ;;  %1812 = vst [vmem:[#allocation3 + $0x48] sm:$0xff] %v5689_v62 }
 0x29c   : > { %1813 = vst [vmem:[#allocation3 + $0x50] sm:$0xff] %v5689_v62  ;;  %1814 = vst [vmem:[#allocation3 + $0x58] sm:$0xff] %v5689_v62 }
 0x29d   : > { %1815 = vst [vmem:[#allocation3 + $0x60] sm:$0xff] %v5689_v62  ;;  %1816 = vst [vmem:[#allocation3 + $0x68] sm:$0xff] %v5689_v62 }
 0x29e   : > { %1817 = vst [vmem:[#allocation3 + $0x70] sm:$0xff] %v5689_v62  ;;  %1818 = vst [vmem:[#allocation3 + $0x78] sm:$0xff] %v5689_v62 }
 0x29f   : > { %1819 = vst [vmem:[#allocation3 + $0x80] sm:$0xff] %v5689_v62  ;;  %1820 = vst [vmem:[#allocation3 + $0x88] sm:$0xff] %v5689_v62 }
 0x2a0   : > { %4484 = vmatmul.mubr.bf16.gmra.mrb[12].mxu0 %v1372_v56  ;;  %4500 = vmatmul.mubr.bf16.gmra.mrb[12].mxu1 %v1380_v61  ;;  %1821 = vst [vmem:[#allocation3 + $0x90] sm:$0xff] %v5689_v62  ;;  %1822 = vst [vmem:[#allocation3 + $0x98] sm:$0xff] %v5689_v62 }
 0x2a1   : > { %1823 = vst [vmem:[#allocation3 + $0xa0] sm:$0xff] %v5689_v62  ;;  %1824 = vst [vmem:[#allocation3 + $0xa8] sm:$0xff] %v5689_v62 }
 0x2a2   : > { %1825 = vst [vmem:[#allocation3 + $0xb0] sm:$0xff] %v5689_v62  ;;  %1826 = vst [vmem:[#allocation3 + $0xb8] sm:$0xff] %v5689_v62 }
 0x35b   : > { %v4473_v9 = vpop.f32.mrb[0].mxu0  ;;  %v4489_v0 = vpop.f32.mrb[0].mxu1 }
 0x35c   : > { %v1479_v1 = vadd.f32 %v4473_v9, %v6527_v6  ;;  %v1543_v2 = vadd.f32 %v4489_v0, %v6527_v6  ;;  %v1470_v3 = vpop.f32.mrb[1].mxu0  ;;  %v1534_v4 = vpop.f32.mrb[1].mxu1 }
 0x35d   : > { %v1471_v7 = vadd.f32 %v6527_v6, %v1470_v3  ;;  %v1535_v8 = vadd.f32 %v6527_v6, %v1534_v4  ;;  %v4474_v10 = vpop.f32.mrb[2].mxu0  ;;  %v4490_v11 = vpop.f32.mrb[2].mxu1 }
 0x35e   : > { %v1606_v12 = vmul.f32 %v6529_v63, %v1479_v1  ;;  %v1622_v13 = vmul.f32 %v6529_v63, %v1543_v2  ;;  %v1482_v14 = vadd.f32 %v4474_v10, %v6527_v6  ;;  %v1546_v15 = vadd.f32 %v4490_v11, %v6527_v6  ;;  %v1473_v16 = vpop.f32.mrb[3].mxu0  ;;  %v1537_v17 = vpop.f32.mrb[3].mxu1 }
 0x35f   : > { %v1604_v18 = vmul.f32 %v6529_v63, %v1471_v7  ;;  %v1620_v19 = vmul.f32 %v6529_v63, %v1535_v8  ;;  %v1474_v20 = vadd.f32 %v6527_v6, %v1473_v16  ;;  %v1538_v21 = vadd.f32 %v6527_v6, %v1537_v17 }
 0x360   : > { %v1645_v22 = vadd.f32 %v6533_v5, %v1606_v12  ;;  %v1661_v23 = vadd.f32 %v6533_v5, %v1622_v13  ;;  %v1607_v24 = vmul.f32 %v6529_v63, %v1482_v14  ;;  %v1623_v25 = vmul.f32 %v6529_v63, %v1546_v15 }
 0x361   : > { %v1643_v26 = vadd.f32 %v6533_v5, %v1604_v18  ;;  %v1659_v27 = vadd.f32 %v6533_v5, %v1620_v19  ;;  %v1605_v28 = vmul.f32 %v6529_v63, %v1474_v20  ;;  %v1621_v29 = vmul.f32 %v6529_v63, %v1538_v21 }
 0x362   : > { %vm1677_vm0 = vcmp.ge.f32.partialorder %v1645_v22, 0.0  ;;  %v1709_v30 = vmul.f32 0.1, %v1645_v22  ;;  %vm1693_vm1 = vcmp.ge.f32.partialorder %v1661_v23, 0.0  ;;  %v1725_v31 = vmul.f32 0.1, %v1661_v23 }
 0x363   : > { %vm1675_vm2 = vcmp.ge.f32.partialorder %v1643_v26, 0.0  ;;  %v1707_v32 = vmul.f32 0.1, %v1643_v26  ;;  %vm1691_vm3 = vcmp.ge.f32.partialorder %v1659_v27, 0.0  ;;  %v1723_v33 = vmul.f32 0.1, %v1659_v27 }
 0x364   : > { %v1741_v34 = vsel %vm1677_vm0, %v1645_v22, %v1709_v30  ;;  %v1757_v35 = vsel %vm1693_vm1, %v1661_v23, %v1725_v31  ;;  %v1646_v36 = vadd.f32 %v6533_v5, %v1607_v24  ;;  %v1662_v37 = vadd.f32 %v6533_v5, %v1623_v25  ;;  %v4477_v38 = vpop.f32.mrb[4].mxu0  ;;  %v4493_v39 = vpop.f32.mrb[4].mxu1 }
 0x365   : > { %v1739_v40 = vsel %vm1675_vm2, %v1643_v26, %v1707_v32  ;;  %v1755_v41 = vsel %vm1691_vm3, %v1659_v27, %v1723_v33  ;;  %v1644_v42 = vadd.f32 %v6533_v5, %v1605_v28  ;;  %v1660_v43 = vadd.f32 %v6533_v5, %v1621_v29  ;;  %v1486_v44 = vpop.f32.mrb[5].mxu0  ;;  %v1550_v45 = vpop.f32.mrb[5].mxu1 }
 0x366   : > { %vm1678_vm4 = vcmp.ge.f32.partialorder %v1646_v36, 0.0  ;;  %v1710_v46 = vmul.f32 0.1, %v1646_v36  ;;  %vm1694_vm5 = vcmp.ge.f32.partialorder %v1662_v37, 0.0  ;;  %v1726_v47 = vmul.f32 0.1, %v1662_v37 }
 0x367   : > { %vm1676_vm6 = vcmp.ge.f32.partialorder %v1644_v42, 0.0  ;;  %v1708_v49 = vmul.f32 0.1, %v1644_v42  ;;  %vm1692_vm7 = vcmp.ge.f32.partialorder %v1660_v43, 0.0  ;;  %v1724_v50 = vmul.f32 0.1, %v1660_v43 }
 0x368   : > { %v1742_v51 = vsel %vm1678_vm4, %v1646_v36, %v1710_v46  ;;  %v1758_v52 = vsel %vm1694_vm5, %v1662_v37, %v1726_v47  ;;  %v1495_v53 = vadd.f32 %v4477_v38, %v6527_v6  ;;  %v1559_v48 = vadd.f32 %v4493_v39, %v6527_v6  ;;  %v4478_v54 = vpop.f32.mrb[6].mxu0  ;;  %v4494_v55 = vpop.f32.mrb[6].mxu1 }
 0x369   : > { %v1772_v56 = vpack.c.bf16 %v1742_v51, %v1741_v34  ;;  %v1780_v57 = vpack.c.bf16 %v1758_v52, %v1757_v35  ;;  %v1740_v58 = vsel %vm1676_vm6, %v1644_v42, %v1708_v49  ;;  %v1756_v59 = vsel %vm1692_vm7, %v1660_v43, %v1724_v50  ;;  %v1489_v60 = vpop.f32.mrb[7].mxu0  ;;  %v1553_v61 = vpop.f32.mrb[7].mxu1 }
 0x36a   : > { %v1771_v62 = vpack.c.bf16 %v1740_v58, %v1739_v40  ;;  %v1779_v9 = vpack.c.bf16 %v1756_v59, %v1755_v41  ;;  %v1610_v0 = vmul.f32 %v6529_v63, %v1495_v53  ;;  %v1626_v1 = vmul.f32 %v6529_v63, %v1559_v48 }
 0x36b   : > { %1788 = vst [vmem:[#allocation2 + $0x8] sm:$0xff] %v1772_v56  ;;  %1796 = vst [vmem:[#allocation2 + $0x48] sm:$0xff] %v1780_v57  ;;  %v1487_v2 = vadd.f32 %v6527_v6, %v1486_v44  ;;  %v1551_v3 = vadd.f32 %v6527_v6, %v1550_v45  ;;  %v1498_v4 = vadd.f32 %v4478_v54, %v6527_v6  ;;  %v4481_v8 = vpop.f32.mrb[8].mxu0  ;;  %v4497_v10 = vpop.f32.mrb[8].mxu1 }
 0x36c   : > { %v1562_v7 = vadd.f32 %v4494_v55, %v6527_v6  ;;  %1787 = vst [vmem:[#allocation2] sm:$0xff] %v1771_v62  ;;  %1795 = vst [vmem:[#allocation2 + $0x40] sm:$0xff] %v1779_v9  ;;  %v1649_v11 = vadd.f32 %v6533_v5, %v1610_v0  ;;  %v1665_v12 = vadd.f32 %v6533_v5, %v1626_v1  ;;  %v1502_v15 = vpop.f32.mrb[9].mxu0  ;;  %v1566_v16 = vpop.f32.mrb[9].mxu1 }
 0x36d   : > { %v1490_v13 = vadd.f32 %v6527_v6, %v1489_v60  ;;  %v1554_v14 = vadd.f32 %v6527_v6, %v1553_v61  ;;  %v1608_v17 = vmul.f32 %v6529_v63, %v1487_v2  ;;  %v1624_v18 = vmul.f32 %v6529_v63, %v1551_v3  ;;  %v4482_v21 = vpop.f32.mrb[10].mxu0  ;;  %v6573_v22 = vpop.f32.mrb[10].mxu1 }
 0x36e   : > { %v1611_v19 = vmul.f32 %v6529_v63, %v1498_v4  ;;  %v1627_v20 = vmul.f32 %v6529_v63, %v1562_v7  ;;  %vm1681_vm8 = vcmp.ge.f32.partialorder %v1649_v11, 0.0  ;;  %v1713_v23 = vmul.f32 0.1, %v1649_v11  ;;  %v6579_v29 = vpop.f32.mrb[11].mxu0  ;;  %v6581_v30 = vpop.f32.mrb[11].mxu1 }
 0x36f   : > { %vm1697_vm9 = vcmp.ge.f32.partialorder %v1665_v12, 0.0  ;;  %v1729_v24 = vmul.f32 0.1, %v1665_v12  ;;  %v1647_v25 = vadd.f32 %v6533_v5, %v1608_v17  ;;  %v1663_v26 = vadd.f32 %v6533_v5, %v1624_v18 }
 0x370   : > { %v1650_v27 = vadd.f32 %v6533_v5, %v1611_v19  ;;  %v1666_v28 = vadd.f32 %v6533_v5, %v1627_v20  ;;  %v1745_v31 = vsel %vm1681_vm8, %v1649_v11, %v1713_v23  ;;  %v1609_v33 = vmul.f32 %v6529_v63, %v1490_v13 }
 0x371   : > { %v1761_v32 = vsel %vm1697_vm9, %v1665_v12, %v1729_v24  ;;  %v1625_v34 = vmul.f32 %v6529_v63, %v1554_v14  ;;  %vm1679_vm10 = vcmp.ge.f32.partialorder %v1647_v25, 0.0  ;;  %v1711_v35 = vmul.f32 0.1, %v1647_v25 }
 0x372   : > { %vm1695_vm11 = vcmp.ge.f32.partialorder %v1663_v26, 0.0  ;;  %v1727_v36 = vmul.f32 0.1, %v1663_v26  ;;  %vm1682_vm12 = vcmp.ge.f32.partialorder %v1650_v27, 0.0  ;;  %v1714_v37 = vmul.f32 0.1, %v1650_v27 }
 0x373   : > { %vm1698_vm13 = vcmp.ge.f32.partialorder %v1666_v28, 0.0  ;;  %v1730_v38 = vmul.f32 0.1, %v1666_v28  ;;  %v1743_v39 = vsel %vm1679_vm10, %v1647_v25, %v1711_v35  ;;  %v1648_v41 = vadd.f32 %v6533_v5, %v1609_v33  ;;  %v4485_v43 = vpop.f32.mrb[12].mxu0  ;;  %v4501_v56 = vpop.f32.mrb[12].mxu1 }
 0x374   : > { %v1759_v40 = vsel %vm1695_vm11, %v1663_v26, %v1727_v36  ;;  %v1664_v42 = vadd.f32 %v6533_v5, %v1625_v34  ;;  %v1746_v44 = vsel %vm1682_vm12, %v1650_v27, %v1714_v37  ;;  %v1511_v46 = vadd.f32 %v4481_v8, %v6527_v6  ;;  %v1518_v49 = vpop.f32.mrb[13].mxu0  ;;  %v1582_v62 = vpop.f32.mrb[13].mxu1 }
 0x375   : > { %v1762_v45 = vsel %vm1698_vm13, %v1666_v28, %v1730_v38  ;;  %v1575_v47 = vadd.f32 %v4497_v10, %v6527_v6  ;;  %v1774_v50 = vpack.c.bf16 %v1746_v44, %v1745_v31  ;;  %vm1680_vm14 = vcmp.ge.f32.partialorder %v1648_v41, 0.0  ;;  %v6589_v53 = vpop.f32.mrb[14].mxu0  ;;  %v6600_v3 = vpop.f32.mrb[14].mxu1 }
 0x376   : > { %v1782_v51 = vpack.c.bf16 %v1762_v45, %v1761_v32  ;;  %v1712_v52 = vmul.f32 0.1, %v1648_v41  ;;  %vm1696_vm15 = vcmp.ge.f32.partialorder %v1664_v42, 0.0  ;;  %v1728_v48 = vmul.f32 0.1, %v1664_v42  ;;  %v6593_v57 = vpop.f32.mrb[15].mxu0 }
 0x377   : > { %v1614_v54 = vmul.f32 %v6529_v63, %v1511_v46  ;;  %v1630_v55 = vmul.f32 %v6529_v63, %v1575_v47  ;;  %1790 = vst [vmem:[#allocation2 + $0x18] sm:$0xff] %v1774_v50  ;;  %v1503_v59 = vadd.f32 %v6527_v6, %v1502_v15  ;;  %v1567_v60 = vadd.f32 %v6527_v6, %v1566_v16  ;;  %v6605_v11 = vpop.f32.mrb[15].mxu1 }
 0x378   : > { %1798 = vst [vmem:[#allocation2 + $0x58] sm:$0xff] %v1782_v51  ;;  %v1744_v58 = vsel %vm1680_vm14, %v1648_v41, %v1712_v52  ;;  %v1514_v61 = vadd.f32 %v4482_v21, %v6527_v6  ;;  %v1760_v0 = vsel %vm1696_vm15, %v1664_v42, %v1728_v48  ;;  %v1578_v17 = vadd.f32 %v6573_v22, %v6527_v6 }
 0x379   : > { %v1773_v9 = vpack.c.bf16 %v1744_v58, %v1743_v39  ;;  %v1653_v1 = vadd.f32 %v6533_v5, %v1614_v54  ;;  %v1669_v2 = vadd.f32 %v6533_v5, %v1630_v55  ;;  %v1781_v4 = vpack.c.bf16 %v1760_v0, %v1759_v40 }
 0x37a   : > { %v1612_v7 = vmul.f32 %v6529_v63, %v1503_v59  ;;  %v1628_v8 = vmul.f32 %v6529_v63, %v1567_v60  ;;  %v1615_v10 = vmul.f32 %v6529_v63, %v1514_v61  ;;  %v1506_v19 = vadd.f32 %v6527_v6, %v6579_v29 }
 0x37b   : > { %1789 = vst [vmem:[#allocation2 + $0x10] sm:$0xff] %v1773_v9  ;;  %vm1685_vm0 = vcmp.ge.f32.partialorder %v1653_v1, 0.0  ;;  %v1717_v12 = vmul.f32 0.1, %v1653_v1  ;;  %vm1701_vm1 = vcmp.ge.f32.partialorder %v1669_v2, 0.0  ;;  %1797 = vst [vmem:[#allocation2 + $0x50] sm:$0xff] %v1781_v4  ;;  %v1570_v20 = vadd.f32 %v6527_v6, %v6581_v30 }
 0x37c   : > { %v1733_v13 = vmul.f32 0.1, %v1669_v2  ;;  %v1651_v14 = vadd.f32 %v6533_v5, %v1612_v7  ;;  %v1667_v15 = vadd.f32 %v6533_v5, %v1628_v8  ;;  %v1654_v16 = vadd.f32 %v6533_v5, %v1615_v10 }
 0x37d   : > { %v1749_v18 = vsel %vm1685_vm0, %v1653_v1, %v1717_v12  ;;  %v1631_v25 = vmul.f32 %v6529_v63, %v1578_v17  ;;  %v1613_v26 = vmul.f32 %v6529_v63, %v1506_v19  ;;  %v1629_v22 = vmul.f32 %v6529_v63, %v1570_v20 }
 0x37e   : > { %v1765_v21 = vsel %vm1701_vm1, %v1669_v2, %v1733_v13  ;;  %vm1683_vm2 = vcmp.ge.f32.partialorder %v1651_v14, 0.0  ;;  %v1715_v23 = vmul.f32 0.1, %v1651_v14  ;;  %vm1699_vm3 = vcmp.ge.f32.partialorder %v1667_v15, 0.0 }
 0x37f   : > { %vm1686_vm4 = vcmp.ge.f32.partialorder %v1654_v16, 0.0  ;;  %v1718_v24 = vmul.f32 0.1, %v1654_v16  ;;  %v1731_v28 = vmul.f32 0.1, %v1667_v15  ;;  %v1527_v31 = vadd.f32 %v4485_v43, %v6527_v6 }
 0x380   : > { %v1747_v27 = vsel %vm1683_vm2, %v1651_v14, %v1715_v23  ;;  %v1670_v32 = vadd.f32 %v6533_v5, %v1631_v25  ;;  %v1652_v30 = vadd.f32 %v6533_v5, %v1613_v26  ;;  %v1591_v33 = vadd.f32 %v4501_v56, %v6527_v6 }
 0x381   : > { %v1750_v29 = vsel %vm1686_vm4, %v1654_v16, %v1718_v24  ;;  %v1668_v35 = vadd.f32 %v6533_v5, %v1629_v22  ;;  %v1618_v36 = vmul.f32 %v6529_v63, %v1527_v31  ;;  %v1519_v37 = vadd.f32 %v6527_v6, %v1518_v49 }
 0x382   : > { %v1776_v34 = vpack.c.bf16 %v1750_v29, %v1749_v18  ;;  %vm1702_vm5 = vcmp.ge.f32.partialorder %v1670_v32, 0.0  ;;  %v1734_v38 = vmul.f32 0.1, %v1670_v32  ;;  %vm1684_vm6 = vcmp.ge.f32.partialorder %v1652_v30, 0.0 }
 0x383   : > { %v1716_v39 = vmul.f32 0.1, %v1652_v30  ;;  %v1763_v40 = vsel %vm1699_vm3, %v1667_v15, %v1731_v28  ;;  %vm1700_vm7 = vcmp.ge.f32.partialorder %v1668_v35, 0.0  ;;  %v1732_v41 = vmul.f32 0.1, %v1668_v35 }
 0x384   : > { %1792 = vst [vmem:[#allocation2 + $0x28] sm:$0xff] %v1776_v34  ;;  %v1634_v42 = vmul.f32 %v6529_v63, %v1591_v33  ;;  %v1766_v43 = vsel %vm1702_vm5, %v1670_v32, %v1734_v38  ;;  %v1616_v45 = vmul.f32 %v6529_v63, %v1519_v37  ;;  %v1583_v46 = vadd.f32 %v6527_v6, %v1582_v62 }
 0x385   : > { %v1748_v44 = vsel %vm1684_vm6, %v1652_v30, %v1716_v39  ;;  %v1784_v47 = vpack.c.bf16 %v1766_v43, %v1765_v21  ;;  %v1764_v49 = vsel %vm1700_vm7, %v1668_v35, %v1732_v41  ;;  %v1657_v51 = vadd.f32 %v6533_v5, %v1618_v36 }
 0x386   : > { %v1775_v50 = vpack.c.bf16 %v1748_v44, %v1747_v27  ;;  %v1783_v52 = vpack.c.bf16 %v1764_v49, %v1763_v40  ;;  %v1673_v48 = vadd.f32 %v6533_v5, %v1634_v42  ;;  %v1655_v54 = vadd.f32 %v6533_v5, %v1616_v45 }
 0x387   : > { %1800 = vst [vmem:[#allocation2 + $0x68] sm:$0xff] %v1784_v47  ;;  %v1632_v55 = vmul.f32 %v6529_v63, %v1583_v46  ;;  %v1530_v56 = vadd.f32 %v6589_v53, %v6527_v6  ;;  %v1594_v58 = vadd.f32 %v6600_v3, %v6527_v6  ;;  %v1522_v59 = vadd.f32 %v6527_v6, %v6593_v57 }
 0x388   : > { %1791 = vst [vmem:[#allocation2 + $0x20] sm:$0xff] %v1775_v50  ;;  %1799 = vst [vmem:[#allocation2 + $0x60] sm:$0xff] %v1783_v52  ;;  %v1721_v60 = vmul.f32 0.1, %v1657_v51  ;;  %v1737_v61 = vmul.f32 0.1, %v1673_v48  ;;  %v1586_v53 = vadd.f32 %v6527_v6, %v6605_v11 }
 0x389   : > { %v1619_v62 = vmul.f32 %v6529_v63, %v1530_v56  ;;  %v1635_v9 = vmul.f32 %v6529_v63, %v1594_v58  ;;  %vm1689_vm8 = vcmp.ge.f32.partialorder %v1657_v51, 0.0  ;;  %vm1705_vm9 = vcmp.ge.f32.partialorder %v1673_v48, 0.0 }
 0x38a   : > { %v1617_v0 = vmul.f32 %v6529_v63, %v1522_v59  ;;  %v1719_v1 = vmul.f32 0.1, %v1655_v54  ;;  %v1671_v2 = vadd.f32 %v6533_v5, %v1632_v55  ;;  %vm1687_vm10 = vcmp.ge.f32.partialorder %v1655_v54, 0.0 }
 0x38b   : > { %v1658_v3 = vadd.f32 %v6533_v5, %v1619_v62  ;;  %v1674_v57 = vadd.f32 %v6533_v5, %v1635_v9  ;;  %v1633_v7 = vmul.f32 %v6529_v63, %v1586_v53  ;;  %v1753_v8 = vsel %vm1689_vm8, %v1657_v51, %v1721_v60 }
 0x38c   : > { %v1656_v4 = vadd.f32 %v6533_v5, %v1617_v0  ;;  %v1769_v10 = vsel %vm1705_vm9, %v1673_v48, %v1737_v61  ;;  %v1751_v11 = vsel %vm1687_vm10, %v1655_v54, %v1719_v1  ;;  %v1735_v14 = vmul.f32 0.1, %v1671_v2 }
 0x38d   : > { %vm1690_vm11 = vcmp.ge.f32.partialorder %v1658_v3, 0.0  ;;  %v1722_v12 = vmul.f32 0.1, %v1658_v3  ;;  %vm1706_vm12 = vcmp.ge.f32.partialorder %v1674_v57, 0.0  ;;  %v1738_v13 = vmul.f32 0.1, %v1674_v57 }
 0x38e   : > { %vm1688_vm13 = vcmp.ge.f32.partialorder %v1656_v4, 0.0  ;;  %v1720_v6 = vmul.f32 0.1, %v1656_v4  ;;  %v1672_v16 = vadd.f32 %v6533_v5, %v1633_v7  ;;  %vm1703_vm14 = vcmp.ge.f32.partialorder %v1671_v2, 0.0 }
 0x38f   : > { %v1754_v15 = vsel %vm1690_vm11, %v1658_v3, %v1722_v12  ;;  %v1770_v18 = vsel %vm1706_vm12, %v1674_v57, %v1738_v13  ;;  %v1767_v23 = vsel %vm1703_vm14, %v1671_v2, %v1735_v14 }
 0x390   : > { %v1778_v17 = vpack.c.bf16 %v1754_v15, %v1753_v8  ;;  %v1752_v19 = vsel %vm1688_vm13, %v1656_v4, %v1720_v6  ;;  %v1786_v20 = vpack.c.bf16 %v1770_v18, %v1769_v10  ;;  %vm1704_vm15 = vcmp.ge.f32.partialorder %v1672_v16, 0.0 }
 0x391   : > { %v1777_v21 = vpack.c.bf16 %v1752_v19, %v1751_v11  ;;  %v1736_v63 = vmul.f32 0.1, %v1672_v16 }
 0x392   : > { %1794 = vst [vmem:[#allocation2 + $0x38] sm:$0xff] %v1778_v17  ;;  %1802 = vst [vmem:[#allocation2 + $0x78] sm:$0xff] %v1786_v20 }
 0x393   : > { %1793 = vst [vmem:[#allocation2 + $0x30] sm:$0xff] %v1777_v21  ;;  %v1768_v24 = vsel %vm1704_vm15, %v1672_v16, %v1736_v63 }
 0x394   : > { %v1785_v25 = vpack.c.bf16 %v1768_v24, %v1767_v23 }
 0x396   : > { %1801 = vst [vmem:[#allocation2 + $0x70] sm:$0xff] %v1785_v25 }
 0x397 PF: > { %v2624_v5 = vld [vmem:[%s6387_s22] sm:$0x1]  ;;  %v2207_v26 = vlaneseq  ;;  %v2212_v27 = vld [vmem:[%s6434_s27 + $0x10] sm:$0xff]  ;;  %v5690_v28 = vmov 0   ;;  %v2213_v32 = vld [vmem:[%s6434_s27 + $0x18] sm:$0xff]  ;;  %s7663_s3 = sld [smem:[#allocation47_spill]] }
 0x398   : > { %vm2625_vm0 = vcmp.eq.s32.totalorder %v2624_v5, 1  ;;  %4979 = vset.pattern.permute.xlu1 %v5690_v28  ;;  %4978 = vset.pattern.permute.xlu0 %v5690_v28  ;;  %v2210_v22 = vld [vmem:[%s6434_s27] sm:$0xff]  ;;  %v2211_v30 = vld [vmem:[%s6434_s27 + $0x8] sm:$0xff]  ;;  %v4980_v37 = vld [vmem:[#allocation25] sm:$0xff]   ;;  %s7717_s7 = sld [smem:[#allocation71_spill]]  ;;  %s7738_s23 = sld [smem:[#allocation46_spill]] }
 0x399   : > { %v6657_v31 = vshrl.u32 %v2207_v26, 7  ;;  %2233 = vperm.xlu1 %4979, %v2212_v27   ;;  %2227 = vperm.xlu0 %4978, %v2210_v22   ;;  %v6660_v29 = vsel %vm2625_vm0, 1, %v5690_v28  ;;  %v2215_v35 = vld [vmem:[%s6434_s27 + $0x28] sm:$0xff]  ;;  %v2214_v36 = vld [vmem:[%s6434_s27 + $0x20] sm:$0xff]  ;;  %v2217_v40 = vld [vmem:[%s6434_s27 + $0x38] sm:$0xff] }
 0x39a   : > { %v4981_v38 = vld [vmem:[#allocation25 + $0x8] sm:$0xff]   ;;  %4503 = vmatprep.subr.bf16.mxu0 %v4980_v37  ;;  %v2363_v42 = vld [vmem:[#allocation2 + $0x48] sm:$0xff]  ;;  %v2216_v43 = vld [vmem:[%s6434_s27 + $0x30] sm:$0xff] }
 0x39b   : > { %v6665_v33 = vsub.s32 0, %v6657_v31  ;;  %v2362_v39 = vld [vmem:[#allocation2 + $0x40] sm:$0xff]  ;;  %4504 = vmatpush3.bf16.msra.mxu0 %v4980_v37  ;;  %v2355_v45 = vld [vmem:[#allocation2 + $0x8] sm:$0xff]  ;;  %v2364_v46 = vld [vmem:[#allocation2 + $0x50] sm:$0xff] }
 0x39c   : > { %v2354_v41 = vld [vmem:[#allocation2] sm:$0xff]  ;;  %4279 = vmatprep.subr.bf16.mxu1 %v2362_v39  ;;  %4505 = vmatprep.subr.bf16.mxu0 %v4981_v38  ;;  %v2219_v47 = vld [vmem:[%s6434_s27 + $0x48] sm:$0xff]  ;;  %v2221_v51 = vld [vmem:[%s6434_s27 + $0x58] sm:$0xff] }
 0x39d   : > { %v2630_v34 = vrot.slane %v6660_v29, %v6665_v33  ;;  %2236 = vperm.xlu1 %4979, %v2213_v32   ;;  %2230 = vperm.xlu0 %4978, %v2211_v30   ;;  %v4982_v44 = vld [vmem:[#allocation25 + $0x10] sm:$0xff]   ;;  %v4983_v49 = vld [vmem:[#allocation25 + $0x18] sm:$0xff]   ;;  %v2365_v54 = vld [vmem:[#allocation2 + $0x58] sm:$0xff]  ;;  %s4161_s25 = sshll.u32 %s7663_s3, 6 }
 0x39e   : > { %4280 = vmatpush3.bf16.msra.mxu1 %v2354_v41  ;;  %v2218_v50 = vld [vmem:[%s6434_s27 + $0x40] sm:$0xff]  ;;  %v2356_v52 = vld [vmem:[#allocation2 + $0x10] sm:$0xff]  ;;  %v1828_v58 = vld [vmem:[%s6429_s21 + $0x8] sm:$0xff]  ;;  %p4187_p6 = scmp.ne.s32.totalorder %s7738_s23, 2 }
 0x39f   : > { %4281 = vmatprep.subr.bf16.mxu1 %v2363_v42  ;;  %4506 = vmatpush3.bf16.msra.mxu0 %v4981_v38  ;;  %v2220_v48 = vld [vmem:[%s6434_s27 + $0x50] sm:$0xff]  ;;  %v1827_v56 = vld [vmem:[%s6429_s21] sm:$0xff]  ;;  %v6679_v59 = vld [vmem:[#allocation22] ss:$0 sm:$0xff]  ;;  %s7739_s10 = sld [smem:[#allocation72_spill]] (!%p4187_p6)  ;;  %s7740_s2 = sld [smem:[#allocation73_spill]] (!%p4187_p6) }
 0x3a0   : > { %4507 = vmatprep.subr.bf16.mxu0 %v4982_v44  ;;  %v4984_v55 = vld [vmem:[#allocation25 + $0x20] sm:$0xff]   ;;  %v6681_v60 = vld [vmem:[#allocation24] ss:$0 sm:$0xff]  ;;  %v1850_v9 = vmul.f32 %v6679_v59, %v1827_v56  ;;  %v1851_v0 = vmul.f32 %v6679_v59, %v1828_v58  ;;  %v2366_v1 = vld [vmem:[#allocation2 + $0x60] sm:$0xff]  ;;  %s7741_s19 = sld [smem:[#allocation57_spill]] (!%p4187_p6)  ;;  %s7742_s13 = sld [smem:[#allocation77_spill]] (!%p4187_p6) }
 0x3a1   : > { %2242 = vperm.xlu1 %4979, %v2215_v35   ;;  %2239 = vperm.xlu0 %4978, %v2214_v36   ;;  %v1829_v61 = vld [vmem:[%s6429_s21 + $0x10] sm:$0xff]  ;;  %v2357_v62 = vld [vmem:[#allocation2 + $0x18] sm:$0xff]  ;;  %v1831_v3 = vld [vmem:[%s6429_s21 + $0x20] sm:$0xff]  ;;  %s7743_s3 = sld [smem:[#allocation75_spill]] (!%p4187_p6)  ;;  %s7744_s4 = sld [smem:[#allocation76_spill]] (!%p4187_p6) }
 0x3a2   : > { %4282 = vmatpush3.bf16.msra.mxu1 %v2355_v45  ;;  %v1830_v53 = vld [vmem:[%s6429_s21 + $0x18] sm:$0xff]  ;;  %v1852_v2 = vmul.f32 %v6679_v59, %v1829_v61  ;;  %v1832_v57 = vld [vmem:[%s6429_s21 + $0x28] sm:$0xff]  ;;  %v2222_v7 = vld [vmem:[%s6434_s27 + $0x60] sm:$0xff]  ;;  %v1873_v8 = vadd.f32 %v6681_v60, %v1850_v9  ;;  %v1874_v10 = vadd.f32 %v6681_v60, %v1851_v0  ;;  %v1854_v13 = vmul.f32 %v6679_v59, %v1831_v3 }
 0x3a3   : > { %4283 = vmatprep.subr.bf16.mxu1 %v2364_v46  ;;  %4508 = vmatpush3.bf16.msra.mxu0 %v4982_v44  ;;  %v2223_v4 = vld [vmem:[%s6434_s27 + $0x68] sm:$0xff]  ;;  %v1853_v12 = vmul.f32 %v6679_v59, %v1830_v53  ;;  %v4985_v6 = vld [vmem:[#allocation25 + $0x28] sm:$0xff]   ;;  %v1855_v14 = vmul.f32 %v6679_v59, %v1832_v57  ;;  %v2224_v20 = vld [vmem:[%s6434_s27 + $0x70] sm:$0xff] }
 0x3a4   : > { %4509 = vmatprep.subr.bf16.mxu0 %v4983_v49  ;;  %v2358_v11 = vld [vmem:[#allocation2 + $0x20] sm:$0xff]  ;;  %vm1889_vm1 = vcmp.ge.f32.partialorder %v1873_v8, 0.0  ;;  %vm1890_vm2 = vcmp.ge.f32.partialorder %v1874_v10, 0.0  ;;  %v1905_v15 = vmul.f32 0.1, %v1873_v8  ;;  %v2367_v17 = vld [vmem:[#allocation2 + $0x68] sm:$0xff]  ;;  %v1875_v18 = vadd.f32 %v6681_v60, %v1852_v2 }
 0x3a5   : > { %2248 = vperm.xlu1 %4979, %v2217_v40   ;;  %2245 = vperm.xlu0 %4978, %v2216_v43   ;;  %v1906_v16 = vmul.f32 0.1, %v1874_v10  ;;  %v2225_v19 = vld [vmem:[%s6434_s27 + $0x78] sm:$0xff]  ;;  %v1876_v23 = vadd.f32 %v6681_v60, %v1853_v12  ;;  %v1877_v24 = vadd.f32 %v6681_v60, %v1854_v13  ;;  %v1833_v25 = vld [vmem:[%s6429_s21 + $0x30] sm:$0xff]  ;;  %v4986_v5 = vld [vmem:[#allocation25 + $0x30] sm:$0xff]   ;;  %v1878_v22 = vadd.f32 %v6681_v60, %v1855_v14 }
 0x3a6   : > { %4284 = vmatpush3.bf16.msra.mxu1 %v2356_v52  ;;  %v1921_v21 = vsel %vm1889_vm1, %v1873_v8, %v1905_v15  ;;  %v1834_v32 = vld [vmem:[%s6429_s21 + $0x38] sm:$0xff]  ;;  %v2359_v30 = vld [vmem:[#allocation2 + $0x28] sm:$0xff]  ;;  %v1835_v35 = vld [vmem:[%s6429_s21 + $0x40] sm:$0xff]  ;;  %vm1891_vm3 = vcmp.ge.f32.partialorder %v1875_v18, 0.0  ;;  %v1907_v38 = vmul.f32 0.1, %v1875_v18  ;;  %v1856_v39 = vmul.f32 %v6679_v59, %v1833_v25 }
 0x3a7   : > { %4285 = vmatprep.subr.bf16.mxu1 %v2365_v54  ;;  %4510 = vmatpush3.bf16.msra.mxu0 %v4983_v49  ;;  %v1922_v63 = vsel %vm1890_vm2, %v1874_v10, %v1906_v16  ;;  %v1836_v36 = vld [vmem:[%s6429_s21 + $0x48] sm:$0xff]  ;;  %v2368_v37 = vld [vmem:[#allocation2 + $0x70] sm:$0xff]  ;;  %vm1892_vm4 = vcmp.ge.f32.partialorder %v1876_v23, 0.0  ;;  %v1908_v40 = vmul.f32 0.1, %v1876_v23  ;;  %v1857_v42 = vmul.f32 %v6679_v59, %v1834_v32  ;;  %v2369_v49 = vld [vmem:[#allocation2 + $0x78] sm:$0xff] }
 0x3a8   : > { %4511 = vmatprep.subr.bf16.mxu0 %v4984_v55  ;;  %v1953_v27 = vpack.c.bf16 %v1922_v63, %v1921_v21  ;;  %v1909_v41 = vmul.f32 0.1, %v1877_v24  ;;  %v4987_v43 = vld [vmem:[#allocation25 + $0x38] sm:$0xff]   ;;  %vm1893_vm5 = vcmp.ge.f32.partialorder %v1877_v24, 0.0  ;;  %v1910_v44 = vmul.f32 0.1, %v1878_v22 }
 0x3a9   : > { %2254 = vperm.xlu1 %4979, %v2219_v47   ;;  %2251 = vperm.xlu0 %4978, %v2218_v50   ;;  %v1858_v45 = vmul.f32 %v6679_v59, %v1835_v35  ;;  %v1859_v46 = vmul.f32 %v6679_v59, %v1836_v36  ;;  %v2360_v47 = vld [vmem:[#allocation2 + $0x30] sm:$0xff]  ;;  %vm1894_vm6 = vcmp.ge.f32.partialorder %v1878_v22, 0.0  ;;  %v1923_v50 = vsel %vm1891_vm3, %v1875_v18, %v1907_v38  ;;  %v2361_v9 = vld [vmem:[#allocation2 + $0x38] sm:$0xff]  ;;  %v1839_v8 = vld [vmem:[%s6429_s21 + $0x60] sm:$0xff] }
 0x3aa   : > { %4286 = vmatpush3.bf16.msra.mxu1 %v2357_v62  ;;  %4519 = vmatprep.mubr.bf16.mxu0 %v1953_v27  ;;  %v1925_v52 = vsel %vm1893_vm5, %v1877_v24, %v1909_v41  ;;  %v1880_v54 = vadd.f32 %v6681_v60, %v1857_v42  ;;  %v1926_v56 = vsel %vm1894_vm6, %v1878_v22, %v1910_v44  ;;  %v1838_v62 = vld [vmem:[%s6429_s21 + $0x58] sm:$0xff]  ;;  %v1840_v10 = vld [vmem:[%s6429_s21 + $0x68] sm:$0xff] }
 0x3ab   : > { %4287 = vmatprep.subr.bf16.mxu1 %v2366_v1  ;;  %4512 = vmatpush3.bf16.msra.mxu0 %v4984_v55  ;;  %v1837_v55 = vld [vmem:[%s6429_s21 + $0x50] sm:$0xff]  ;;  %v1881_v58 = vadd.f32 %v6681_v60, %v1858_v45  ;;  %v1882_v61 = vadd.f32 %v6681_v60, %v1859_v46  ;;  %v1955_v1 = vpack.c.bf16 %v1926_v56, %v1925_v52  ;;  %v1842_v21 = vld [vmem:[%s6429_s21 + $0x78] sm:$0xff]  ;;  %v6736_v46 = vand.u32 127, %v2207_v26 }
 0x3ac   : > { %4513 = vmatprep.subr.bf16.mxu0 %v4985_v6  ;;  %v1860_v53 = vmul.f32 %v6679_v59, %v1837_v55  ;;  %v1912_v3 = vmul.f32 0.1, %v1880_v54  ;;  %v1861_v57 = vmul.f32 %v6679_v59, %v1838_v62  ;;  %vm1896_vm8 = vcmp.ge.f32.partialorder %v1880_v54, 0.0  ;;  %v2772_v29 = vld [vmem:[#allocation3 + $0x58] sm:$0xff] }
 0x3ad   : > { %2260 = vperm.xlu1 %4979, %v2221_v51   ;;  %2257 = vperm.xlu0 %4978, %v2220_v48   ;;  %v1924_v51 = vsel %vm1892_vm4, %v1876_v23, %v1908_v40  ;;  %v1879_v48 = vadd.f32 %v6681_v60, %v1856_v39  ;;  %vm1897_vm9 = vcmp.ge.f32.partialorder %v1881_v58, 0.0  ;;  %vm1898_vm10 = vcmp.ge.f32.partialorder %v1882_v61, 0.0 }
 0x3ae   : > { %4288 = vmatpush3.bf16.msra.mxu1 %v2358_v11  ;;  %v1954_v0 = vpack.c.bf16 %v1924_v51, %v1923_v50  ;;  %v1883_v12 = vadd.f32 %v6681_v60, %v1860_v53  ;;  %v1862_v13 = vmul.f32 %v6679_v59, %v1839_v8  ;;  %v1928_v14 = vsel %vm1896_vm8, %v1880_v54, %v1912_v3 }
 0x3af   : > { %4289 = vmatprep.subr.bf16.mxu1 %v2367_v17  ;;  %4514 = vmatpush3.bf16.msra.mxu0 %v4985_v6  ;;  %v1911_v2 = vmul.f32 0.1, %v1879_v48  ;;  %vm1895_vm7 = vcmp.ge.f32.partialorder %v1879_v48, 0.0  ;;  %v1863_v6 = vmul.f32 %v6679_v59, %v1840_v10  ;;  %v1884_v15 = vadd.f32 %v6681_v60, %v1861_v57 }
 0x3b0   : > { %4515 = vmatprep.subr.bf16.mxu0 %v4986_v5  ;;  %v1885_v18 = vadd.f32 %v6681_v60, %v1862_v13  ;;  %v1915_v23 = vmul.f32 0.1, %v1883_v12  ;;  %v1865_v27 = vmul.f32 %v6679_v59, %v1842_v21  ;;  %vm1899_vm11 = vcmp.ge.f32.partialorder %v1883_v12, 0.0 }
 0x3b1   : > { %2266 = vperm.xlu1 %4979, %v2223_v4   ;;  %2263 = vperm.xlu0 %4978, %v2222_v7   ;;  %v1913_v4 = vmul.f32 0.1, %v1881_v58  ;;  %v1914_v7 = vmul.f32 0.1, %v1882_v61  ;;  %v1927_v11 = vsel %vm1895_vm7, %v1879_v48, %v1911_v2  ;;  %v1916_v25 = vmul.f32 0.1, %v1884_v15 }
 0x3b2   : > { %4290 = vmatpush3.bf16.msra.mxu1 %v2359_v30  ;;  %v1956_v63 = vpack.c.bf16 %v1928_v14, %v1927_v11  ;;  %vm1900_vm12 = vcmp.ge.f32.partialorder %v1884_v15, 0.0  ;;  %v1917_v22 = vmul.f32 0.1, %v1885_v18  ;;  %vm1901_vm13 = vcmp.ge.f32.partialorder %v1885_v18, 0.0 }
 0x3b3   : > { %4291 = vmatprep.subr.bf16.mxu1 %v2368_v37  ;;  %4516 = vmatpush3.bf16.msra.mxu0 %v4986_v5  ;;  %v1929_v16 = vsel %vm1897_vm9, %v1881_v58, %v1913_v4  ;;  %v1930_v17 = vsel %vm1898_vm10, %v1882_v61, %v1914_v7  ;;  %v1931_v30 = vsel %vm1899_vm11, %v1883_v12, %v1915_v23  ;;  %v5691_v26 = vmov 1.0|1.0  }
 0x3b4   : > { %4517 = vmatprep.subr.bf16.mxu0 %v4987_v43  ;;  %v1957_v24 = vpack.c.bf16 %v1930_v17, %v1929_v16  ;;  %v1932_v35 = vsel %vm1900_vm12, %v1884_v15, %v1916_v25  ;;  %v1888_v37 = vadd.f32 %v6681_v60, %v1865_v27  ;;  %v1933_v38 = vsel %vm1901_vm13, %v1885_v18, %v1917_v22  ;;  %v2507_v15 = vld [vmem:[%s6387_s22] sm:$0x1] }
 0x3b5   : > { %2272 = vperm.xlu1 %4979, %v2225_v19   ;;  %2269 = vperm.xlu0 %4978, %v2224_v20   ;;  %v1886_v19 = vadd.f32 %v6681_v60, %v1863_v6  ;;  %v1841_v20 = vld [vmem:[%s6429_s21 + $0x70] sm:$0xff]  ;;  %v1958_v40 = vpack.c.bf16 %v1932_v35, %v1931_v30  ;;  %v2485_v23 = vstv %s4161_s25  ;;  %v6836_v27 = vld [vmem:[%s1136_s20] ss:$0 sm:$0xff]  ;;  %v2478_v22 = vadd.s32 16, %v6657_v31 }
 0x3b6   : > { %4292 = vmatpush3.bf16.msra.mxu1 %v2360_v47  ;;  %v1864_v5 = vmul.f32 %v6679_v59, %v1841_v20  ;;  %v1920_v59 = vmul.f32 0.1, %v1888_v37  ;;  %vm1904_vm0 = vcmp.ge.f32.partialorder %v1888_v37, 0.0  ;;  %v2486_v25 = vadd.s32 %v2485_v23, %v6657_v31 }
 0x3b7   : > { %4293 = vmatprep.subr.bf16.mxu1 %v2369_v49  ;;  %4518 = vmatpush3.bf16.msra.mxu0 %v4987_v43  ;;  %v1918_v32 = vmul.f32 0.1, %v1886_v19  ;;  %vm1902_vm14 = vcmp.ge.f32.partialorder %v1886_v19, 0.0  ;;  %v2488_v30 = vadd.s32 %v2485_v23, %v2478_v22 }
 0x3b8   : > { %v1887_v36 = vadd.f32 %v6681_v60, %v1864_v5  ;;  %v1936_v44 = vsel %vm1904_vm0, %v1888_v37, %v1920_v59  ;;  %v6739_v60 = vadd.s32 128, %v6736_v46  ;;  %v2771_v37 = vld [vmem:[#allocation3 + $0x40] sm:$0xff] }
 0x3b9   : > { %v1934_v39 = vsel %vm1902_vm14, %v1886_v19, %v1918_v32  ;;  %v2479_v32 = vadd.s32 24, %v6657_v31 }
 0x3ba   : > { %4294 = vmatpush3.bf16.msra.mxu1 %v2361_v9  ;;  %4520 = vmatmul.mubr.bf16.vlgmr.msra.gmra.mrb[0].mxu0 %v1954_v0  ;;  %v1959_v41 = vpack.c.bf16 %v1934_v39, %v1933_v38  ;;  %v1919_v42 = vmul.f32 0.1, %v1887_v36  ;;  %vm1903_vm15 = vcmp.ge.f32.partialorder %v1887_v36, 0.0  ;;  %v2741_v38 = vld [vmem:[%s6387_s22] sm:$0x1]  ;;  %v2480_v39 = vadd.s32 32, %v6657_v31 }
 0x3bb   : > { %4523 = vmatprep.mubr.bf16.mxu0 %v1955_v1  ;;  %v2489_v35 = vadd.s32 %v2485_v23, %v2479_v32 }
 0x3bc   : > { %v1935_v43 = vsel %vm1903_vm15, %v1887_v36, %v1919_v42  ;;  %v2483_v42 = vadd.s32 56, %v6657_v31  ;;  %v2490_v59 = vadd.s32 %v2485_v23, %v2480_v39  ;;  %v2537_v36 = vld [vmem:[#allocation3 + $0x30] sm:$0xff] }
 0x3bd   : > { %v1960_v45 = vpack.c.bf16 %v1936_v44, %v1935_v43 }
 0x3c2   : > { %4524 = vmatmul.mubr.bf16.gmra.mrb[4].mxu0 %v1956_v63  ;;  %v2477_v63 = vadd.s32 8, %v6657_v31 }
 0x3c3   : > { %4527 = vmatprep.mubr.bf16.mxu0 %v1957_v24 }
 0x3c4   : > { %v2487_v5 = vadd.s32 %v2485_v23, %v2477_v63  ;;  %v7084_v63 = vld [vmem:[%s7717_s7] ss:$0 sm:$0xff] }
 0x3ca   : > { %4528 = vmatmul.mubr.bf16.gmra.mrb[8].mxu0 %v1958_v40  ;;  %v2481_v40 = vadd.s32 40, %v6657_v31 }
 0x3cb   : > { %4531 = vmatprep.mubr.bf16.mxu0 %v1959_v41  ;;  %v2482_v41 = vadd.s32 48, %v6657_v31 }
 0x3cc   : > { %v2491_v43 = vadd.s32 %v2485_v23, %v2481_v40 }
 0x3d2   : > { %4532 = vmatmul.mubr.bf16.gmra.mrb[12].mxu0 %v1960_v45  ;;  %v2492_v45 = vadd.s32 %v2485_v23, %v2482_v41 }
 0x418   : > { %v2234_v47 = vpop.permute.xlu1 %2233  ;;  %v2228_v50 = vpop.permute.xlu0 %2227 }
 0x419   : > { %vm2279_vm1 = vcmp.eq.s32.totalorder %v2234_v47, %v6739_v60  ;;  %vm2274_vm5 = vcmp.eq.s32.totalorder %v2228_v50, %v6736_v46  ;;  %vm2275_vm8 = vcmp.eq.s32.totalorder %v2228_v50, %v6739_v60  ;;  %vm2278_vm10 = vcmp.eq.s32.totalorder %v2234_v47, %v6736_v46  ;;  %v2535_v47 = vld [vmem:[#allocation3] sm:$0xff]  ;;  %v2769_v50 = vld [vmem:[#allocation3 + $0x10] sm:$0xff] }
 0x41c   : > { %v2237_v49 = vpop.permute.xlu1 %2236  ;;  %v2231_v51 = vpop.permute.xlu0 %2230 }
 0x41d   : > { %vm2281_vm2 = vcmp.eq.s32.totalorder %v2237_v49, %v6739_v60  ;;  %vm2276_vm3 = vcmp.eq.s32.totalorder %v2231_v51, %v6736_v46  ;;  %vm2277_vm4 = vcmp.eq.s32.totalorder %v2231_v51, %v6739_v60  ;;  %vm2280_vm11 = vcmp.eq.s32.totalorder %v2237_v49, %v6736_v46 }
 0x41e   : > { %vm4133_vm6 = vmpackc.low %vm2281_vm2, %vm2279_vm1  ;;  %v7677_v49 = vmov 0 }
 0x41f   : > { %vm4131_vm7 = vmpackc.low %vm2276_vm3, %vm2274_vm5 }
 0x420   : > { %vm4129_vm9 = vmpackc.low %vm2277_vm4, %vm2275_vm8  ;;  %v2243_v52 = vpop.permute.xlu1 %2242  ;;  %v2240_v48 = vpop.permute.xlu0 %2239 }
 0x421   : > { %4130 = vmatprep.mubr.msk.bf16.mxu1 %vm4129_vm9, %v5691_v26  ;;  %vm2285_vm12 = vcmp.eq.s32.totalorder %v2243_v52, %v6739_v60  ;;  %vm2283_vm13 = vcmp.eq.s32.totalorder %v2240_v48, %v6739_v60  ;;  %vm4135_vm14 = vmpackc.low %vm2280_vm11, %vm2278_vm10  ;;  %vm2284_vm0 = vcmp.eq.s32.totalorder %v2243_v52, %v6736_v46  ;;  %vm2282_vm1 = vcmp.eq.s32.totalorder %v2240_v48, %v6736_v46 }
 0x422   : > { %4132 = vmatmul.mubr.msk.bf16.vlgmr.msra.gmra.mrb[0].mxu1 %vm4131_vm7, %v5691_v26  ;;  %vm4137_vm15 = vmpackc.low %vm2285_vm12, %vm2283_vm13 }
 0x423   : > { %4134 = vmatprep.mubr.msk.bf16.mxu1 %vm4133_vm6, %v5691_v26  ;;  %vm4139_vm4 = vmpackc.low %vm2284_vm0, %vm2282_vm1 }
 0x424   : > { %v2249_v54 = vpop.permute.xlu1 %2248  ;;  %v2246_v55 = vpop.permute.xlu0 %2245 }
 0x425   : > { %vm2289_vm2 = vcmp.eq.s32.totalorder %v2249_v54, %v6739_v60  ;;  %vm2287_vm3 = vcmp.eq.s32.totalorder %v2246_v55, %v6739_v60  ;;  %vm2288_vm6 = vcmp.eq.s32.totalorder %v2249_v54, %v6736_v46  ;;  %vm2286_vm7 = vcmp.eq.s32.totalorder %v2246_v55, %v6736_v46 }
 0x426   : > { %vm4141_vm5 = vmpackc.low %vm2289_vm2, %vm2287_vm3  ;;  %v7689_v54 = vmov 0  ;;  %v7691_v55 = vmov 0 }
 0x427   : > { %vm4143_vm10 = vmpackc.low %vm2288_vm6, %vm2286_vm7 }
 0x428   : > { %v2255_v56 = vpop.permute.xlu1 %2254  ;;  %v2252_v58 = vpop.permute.xlu0 %2251 }
 0x429   : > { %vm2293_vm8 = vcmp.eq.s32.totalorder %v2255_v56, %v6739_v60  ;;  %vm2291_vm9 = vcmp.eq.s32.totalorder %v2252_v58, %v6739_v60  ;;  %vm2292_vm12 = vcmp.eq.s32.totalorder %v2255_v56, %v6736_v46  ;;  %vm2290_vm13 = vcmp.eq.s32.totalorder %v2252_v58, %v6736_v46 }
 0x42a   : > { %4136 = vmatmul.mubr.msk.bf16.gmra.mrb[4].mxu1 %vm4135_vm14, %v5691_v26  ;;  %vm4145_vm11 = vmpackc.low %vm2293_vm8, %vm2291_vm9  ;;  %v7694_v56 = vmov 0 }
 0x42b   : > { %4138 = vmatprep.mubr.msk.bf16.mxu1 %vm4137_vm15, %v5691_v26  ;;  %vm4147_vm0 = vmpackc.low %vm2292_vm12, %vm2290_vm13 }
 0x42c   : > { %v2261_v61 = vpop.permute.xlu1 %2260  ;;  %v2258_v62 = vpop.permute.xlu0 %2257 }
 0x42d   : > { %vm2297_vm14 = vcmp.eq.s32.totalorder %v2261_v61, %v6739_v60  ;;  %vm2295_vm15 = vcmp.eq.s32.totalorder %v2258_v62, %v6739_v60  ;;  %vm2296_vm2 = vcmp.eq.s32.totalorder %v2261_v61, %v6736_v46  ;;  %vm2294_vm3 = vcmp.eq.s32.totalorder %v2258_v62, %v6736_v46  ;;  %v7020_v62 = vld [vmem:[#allocation27] ss:$0 sm:$0xff]  ;;  %v2770_v61 = vld [vmem:[#allocation3 + $0x28] sm:$0xff] }
 0x42e   : > { %vm4149_vm1 = vmpackc.low %vm2297_vm14, %vm2295_vm15 }
 0x42f   : > { %vm4151_vm6 = vmpackc.low %vm2296_vm2, %vm2294_vm3  ;;  %vm2499_vm3 = vcmp.eq.s32.totalorder %v6836_v27, %v2486_v25 }
 0x430   : > { %v2267_v9 = vpop.permute.xlu1 %2266  ;;  %v2264_v0 = vpop.permute.xlu0 %2263 }
 0x431   : > { %vm2300_vm8 = vcmp.eq.s32.totalorder %v2267_v9, %v6736_v46  ;;  %vm2298_vm9 = vcmp.eq.s32.totalorder %v2264_v0, %v6736_v46 }
 0x432   : > { %4140 = vmatmul.mubr.msk.bf16.gmra.mrb[8].mxu1 %vm4139_vm4, %v5691_v26  ;;  %vm2301_vm4 = vcmp.eq.s32.totalorder %v2267_v9, %v6739_v60  ;;  %vm4155_vm12 = vmpackc.low %vm2300_vm8, %vm2298_vm9  ;;  %vm2501_vm8 = vcmp.eq.s32.totalorder %v6836_v27, %v2488_v30  ;;  %vm7549_vm9 = vcmp.eq.s32.totalorder %v6836_v27, %v2489_v35  ;;  %v7703_v9 = vmov 0 }
 0x433   : > { %4142 = vmatprep.mubr.msk.bf16.mxu1 %vm4141_vm5, %v5691_v26  ;;  %vm2299_vm5 = vcmp.eq.s32.totalorder %v2264_v0, %v6739_v60 }
 0x434   : > { %vm4153_vm7 = vmpackc.low %vm2301_vm4, %vm2299_vm5  ;;  %v2273_v53 = vpop.permute.xlu1 %2272  ;;  %v2270_v1 = vpop.permute.xlu0 %2269  ;;  %vm2500_vm4 = vcmp.eq.s32.totalorder %v6836_v27, %v2487_v5 }
 0x435   : > { %vm2304_vm14 = vcmp.eq.s32.totalorder %v2273_v53, %v6736_v46  ;;  %vm2302_vm15 = vcmp.eq.s32.totalorder %v2270_v1, %v6736_v46  ;;  %v2493_v46 = vadd.s32 %v2485_v23, %v2483_v42 }
 0x43a   : > { %4144 = vmatmul.mubr.msk.bf16.gmra.mrb[12].mxu1 %vm4143_vm10, %v5691_v26  ;;  %vm2305_vm10 = vcmp.eq.s32.totalorder %v2273_v53, %v6739_v60 }
 0x43b   : > { %4146 = vmatprep.mubr.msk.bf16.mxu1 %vm4145_vm11, %v5691_v26  ;;  %vm2303_vm11 = vcmp.eq.s32.totalorder %v2270_v1, %v6739_v60  ;;  %v7675_v60 = vmov 0  ;;  %v7048_v1 = vld [vmem:[#allocation28] ss:$0 sm:$0xff] }
 0x43c   : > { %vm4157_vm13 = vmpackc.low %vm2305_vm10, %vm2303_vm11 }
 0x442   : > { %4148 = vmatmul.mubr.msk.bf16.gmra.mrb[16].mxu1 %vm4147_vm0, %v5691_v26  ;;  %vm4159_vm0 = vmpackc.low %vm2304_vm14, %vm2302_vm15  ;;  %vm7548_vm14 = vcmp.eq.s32.totalorder %v6836_v27, %v2490_v59  ;;  %vm7545_vm15 = vcmp.eq.s32.totalorder %v6836_v27, %v2491_v43 }
 0x443   : > { %4150 = vmatprep.mubr.msk.bf16.mxu1 %vm4149_vm1, %v5691_v26  ;;  %vm2508_vm1 = vcmp.eq.s32.totalorder %v2507_v15, 0 }
 0x444   : > { %v2509_v19 = vsel %vm2508_vm1, 1, %v5690_v28  ;;  %vm7546_vm1 = vcmp.eq.s32.totalorder %v6836_v27, %v2492_v45 }
 0x445   : > { %v2513_v21 = vrot.slane %v2509_v19, %v6665_v33 }
 0x447   : > { %vm6826_vm2 = vcmp.eq.s32.totalorder %v2513_v21, 1 }
 0x448   : > { %vm2515_vm5 = vmand %vm2499_vm3, %vm6826_vm2 }
 0x449   : > { %vm6857_vm10 = vmand %vm2501_vm8, %vm6826_vm2 }
 0x44a   : > { %4152 = vmatmul.mubr.msk.bf16.gmra.mrb[20].mxu1 %vm4151_vm6, %v5691_v26  ;;  %vm2516_vm6 = vmand %vm2500_vm4, %vm6826_vm2 }
 0x44b   : > { %4154 = vmatprep.mubr.msk.bf16.mxu1 %vm4153_vm7, %v5691_v26  ;;  %vm4163_vm7 = vmpackc.low %vm2516_vm6, %vm2515_vm5  ;;  %vm7547_vm5 = vcmp.eq.s32.totalorder %v6836_v27, %v2493_v46 }
 0x44c   : > { %4551 = vmatprep.mubr.msk.bf16.mxu0 %vm4163_vm7, %v5691_v26  ;;  %vm6865_vm11 = vmand %vm7549_vm9, %vm6826_vm2 }
 0x44d   : > { %vm6896_vm6 = vmand %vm7545_vm15, %vm6826_vm2 }
 0x452   : > { %4156 = vmatmul.mubr.msk.bf16.gmra.mrb[24].mxu1 %vm4155_vm12, %v5691_v26  ;;  %vm6916_vm12 = vmand %vm7547_vm5, %vm6826_vm2 }
 0x453   : > { %4158 = vmatprep.mubr.msk.bf16.mxu1 %vm4157_vm13, %v5691_v26  ;;  %vm2742_vm13 = vcmp.eq.s32.totalorder %v2741_v38, 2  ;;  %v7678_v49 = vsel %vm6916_vm12, 4294967295, %v7677_v49 }
 0x454   : > { %v2743_v44 = vsel %vm2742_vm13, 1, %v5690_v28  ;;  %vm6908_vm13 = vmand %vm7546_vm1, %vm6826_vm2 }
 0x455   : > { %v2747_v28 = vrot.slane %v2743_v44, %v6665_v33  ;;  %v7676_v60 = vsel %vm6908_vm13, 4294967295, %v7675_v60 }
 0x457   : > { %vm6920_vm15 = vcmp.eq.s32.totalorder %v2747_v28, 1 }
 0x458   : > { %vm2749_vm1 = vmand %vm2499_vm3, %vm6920_vm15 }
 0x459   : > { %vm6948_vm7 = vmand %vm2501_vm8, %vm6920_vm15 }
 0x45a   : > { %4160 = vmatmul.mubr.msk.bf16.gmra.mrb[28].mxu1 %vm4159_vm0, %v5691_v26  ;;  %vm6885_vm0 = vmand %vm7548_vm14, %vm6826_vm2  ;;  %vm6939_vm14 = vcmp.eq.s32.totalorder %v2630_v34, 1  ;;  %v7687_v34 = vmov 0 }
 0x45b   : > { %vm2750_vm2 = vmand %vm2500_vm4, %vm6920_vm15 }
 0x45c   : > { %vm4179_vm5 = vmpackc.low %vm2750_vm2, %vm2749_vm1 }
 0x45d   : > { %4599 = vmatprep.mubr.msk.bf16.mxu1 %vm4179_vm5, %v5691_v26  ;;  %vm6956_vm1 = vmand %vm7549_vm9, %vm6920_vm15 }
 0x45e   : > { %vm6968_vm2 = vmand %vm2499_vm3, %vm6939_vm14 }
 0x45f   : > { %v7688_v34 = vsel %vm6968_vm2, 4294967295, %v7687_v34  ;;  %vm6976_vm9 = vmand %vm2500_vm4, %vm6939_vm14  ;;  %vm7693_vm4 = vcmp.eq.s32.totalorder %v6836_v27, %v2489_v35 }
 0x460   : > { %v7690_v54 = vsel %vm6976_vm9, 4294967295, %v7689_v54  ;;  %vm6988_vm3 = vmand %vm2501_vm8, %vm6939_vm14  ;;  %vm7696_vm8 = vcmp.eq.s32.totalorder %v6836_v27, %v2490_v59 }
 0x461   : > { %v7692_v55 = vsel %vm6988_vm3, 4294967295, %v7691_v55  ;;  %vm6996_vm13 = vmand %vm7693_vm4, %vm6939_vm14  ;;  %vm7699_vm4 = vcmp.eq.s32.totalorder %v6836_v27, %v2491_v43 }
 0x462   : > { %v7695_v56 = vsel %vm6996_vm13, 4294967295, %v7694_v56  ;;  %vm7008_vm2 = vmand %vm7696_vm8, %vm6920_vm15  ;;  %vm7702_vm8 = vcmp.eq.s32.totalorder %v6836_v27, %v2492_v45 }
 0x463   : > { %vm7016_vm9 = vmand %vm7699_vm4, %vm6920_vm15  ;;  %vm7705_vm4 = vcmp.eq.s32.totalorder %v6836_v27, %v2493_v46 }
 0x464   : > { %vm7030_vm3 = vmand %vm7702_vm8, %vm6920_vm15  ;;  %vm7708_vm8 = vcmp.eq.s32.totalorder %v6836_v27, %v2490_v59 }
 0x465   : > { %v7704_v9 = vsel %vm7030_vm3, 4294967295, %v7703_v9  ;;  %vm7038_vm13 = vmand %vm7705_vm4, %vm6920_vm15  ;;  %vm7711_vm15 = vcmp.eq.s32.totalorder %v6836_v27, %v2491_v43 }
 0x466   : > { %vm7054_vm12 = vmand %vm7708_vm8, %vm6939_vm14  ;;  %vm7714_vm8 = vcmp.eq.s32.totalorder %v6836_v27, %v2492_v45 }
 0x467   : > { %vm7064_vm4 = vmand %vm7711_vm15, %vm6939_vm14  ;;  %vm7718_vm15 = vcmp.eq.s32.totalorder %v6836_v27, %v2493_v46 }
 0x468   : > { %vm7077_vm3 = vmand %vm7714_vm8, %vm6939_vm14 }
 0x469   : > { %vm7090_vm5 = vmand %vm7718_vm15, %vm6939_vm14 }
 0x48d   : > { %v6789_v2 = vpop.f32.mrb[0].mxu0 }
 0x48e   : > { %v6791_v3 = vpop.f32.mrb[1].mxu0  ;;  %v2059_v25 = vadd.f32 %v6789_v2, %v7020_v62 }
 0x48f   : > { %v6793_v57 = vpop.f32.mrb[2].mxu0  ;;  %v2051_v53 = vadd.f32 %v7020_v62, %v6791_v3 }
 0x490   : > { %v6795_v4 = vpop.f32.mrb[3].mxu0  ;;  %v2062_v22 = vadd.f32 %v6793_v57, %v7020_v62  ;;  %v2122_v32 = vmul.f32 %v7048_v1, %v2059_v25 }
 0x491   : > { %v2054_v19 = vadd.f32 %v7020_v62, %v6795_v4  ;;  %v2120_v21 = vmul.f32 %v7048_v1, %v2051_v53 }
 0x492   : > { %v2123_v35 = vmul.f32 %v7048_v1, %v2062_v22  ;;  %v2145_v40 = vadd.f32 %v7084_v63, %v2122_v32 }
 0x493   : > { %v2121_v24 = vmul.f32 %v7048_v1, %v2054_v19  ;;  %v2143_v5 = vadd.f32 %v7084_v63, %v2120_v21 }
 0x494   : > { %v2146_v43 = vadd.f32 %v7084_v63, %v2123_v35  ;;  %v2177_v52 = vmul.f32 0.1, %v2145_v40 }
 0x495   : > { %v6797_v7 = vpop.f32.mrb[4].mxu0  ;;  %v2144_v27 = vadd.f32 %v7084_v63, %v2121_v24  ;;  %v2175_v30 = vmul.f32 0.1, %v2143_v5  ;;  %vm2159_vm14 = vcmp.ge.f32.partialorder %v2143_v5, 0.0 }
 0x496   : > { %v6799_v8 = vpop.f32.mrb[5].mxu0  ;;  %v2178_v21 = vmul.f32 0.1, %v2146_v43  ;;  %vm2162_vm8 = vcmp.ge.f32.partialorder %v2146_v43, 0.0 }
 0x497   : > { %v6801_v10 = vpop.f32.mrb[6].mxu0  ;;  %v2176_v38 = vmul.f32 0.1, %v2144_v27  ;;  %vm2160_vm15 = vcmp.ge.f32.partialorder %v2144_v27, 0.0  ;;  %v2191_v41 = vsel %vm2159_vm14, %v2143_v5, %v2175_v30  ;;  %v2067_v42 = vadd.f32 %v7020_v62, %v6799_v8 }
 0x498   : > { %v6803_v12 = vpop.f32.mrb[7].mxu0  ;;  %vm2161_vm14 = vcmp.ge.f32.partialorder %v2145_v40, 0.0  ;;  %v2075_v5 = vadd.f32 %v6797_v7, %v7020_v62  ;;  %v2078_v35 = vadd.f32 %v6801_v10, %v7020_v62 }
 0x499   : > { %v2192_v44 = vsel %vm2160_vm15, %v2144_v27, %v2176_v38  ;;  %v2070_v46 = vadd.f32 %v7020_v62, %v6803_v12  ;;  %v2124_v53 = vmul.f32 %v7048_v1, %v2067_v42  ;;  %v2193_v22 = vsel %vm2161_vm14, %v2145_v40, %v2177_v52 }
 0x49a   : > { %v2194_v38 = vsel %vm2162_vm8, %v2146_v43, %v2178_v21 }
 0x49b   : > { %v2125_v24 = vmul.f32 %v7048_v1, %v2070_v46  ;;  %v2147_v12 = vadd.f32 %v7084_v63, %v2124_v53 }
 0x49d   : > { %v6805_v13 = vpop.f32.mrb[8].mxu0  ;;  %v2148_v7 = vadd.f32 %v7084_v63, %v2125_v24  ;;  %v2179_v42 = vmul.f32 0.1, %v2147_v12  ;;  %vm2163_vm15 = vcmp.ge.f32.partialorder %v2147_v12, 0.0 }
 0x49e   : > { %v6807_v6 = vpop.f32.mrb[9].mxu0 }
 0x49f   : > { %v6809_v11 = vpop.f32.mrb[10].mxu0  ;;  %vm2164_vm8 = vcmp.ge.f32.partialorder %v2148_v7, 0.0  ;;  %v2195_v46 = vsel %vm2163_vm15, %v2147_v12, %v2179_v42 }
 0x4a0   : > { %v6811_v14 = vpop.f32.mrb[11].mxu0  ;;  %v2094_v42 = vadd.f32 %v6809_v11, %v7020_v62 }
 0x4a5   : > { %v6814_v16 = vpop.f32.mrb[12].mxu0 }
 0x4a6   : > { %v6816_v17 = vpop.f32.mrb[13].mxu0 }
 0x4a7   : > { %v6818_v18 = vpop.f32.mrb[14].mxu0 }
 0x4a8   : > { %v6821_v20 = vpop.f32.mrb[15].mxu0 }
 0x4f5   : > { %v4295_v39 = vpop.f32.mrb[0].mxu1 }
 0x4f6   : > { %v4296_v2 = vpop.f32.mrb[1].mxu1 }
 0x4f7   : > { %v4297_v59 = vadd.f32 %v4296_v2, %v4295_v39  ;;  %v4298_v57 = vpop.f32.mrb[2].mxu1  ;;  %v2126_v2 = vmul.f32 %v7048_v1, %v2075_v5 }
 0x4f8   : > { %v4299_v45 = vpop.f32.mrb[3].mxu1 }
 0x4f9   : > { %v2405_v28 = vadd.f32 %v4297_v59, %v2191_v41  ;;  %v4300_v51 = vadd.f32 %v4299_v45, %v4298_v57  ;;  %v2127_v57 = vmul.f32 %v7048_v1, %v2078_v35  ;;  %v2149_v43 = vadd.f32 %v7084_v63, %v2126_v2 }
 0x4fb   : > { %v2408_v19 = vadd.f32 %v4300_v51, %v2192_v44  ;;  %v2180_v44 = vmul.f32 0.1, %v2148_v7  ;;  %v2083_v51 = vadd.f32 %v7020_v62, %v6807_v6  ;;  %v2181_v6 = vmul.f32 0.1, %v2149_v43 }
 0x4fc   : > { %vm2165_vm14 = vcmp.ge.f32.partialorder %v2149_v43, 0.0 }
 0x4fd   : > { %v7115_v8 = vpack.c.bf16 %v2408_v19, %v2405_v28  ;;  %v4301_v25 = vpop.f32.mrb[4].mxu1  ;;  %v2150_v19 = vadd.f32 %v7084_v63, %v2127_v57  ;;  %v2196_v21 = vsel %vm2164_vm8, %v2148_v7, %v2180_v44  ;;  %v2197_v7 = vsel %vm2165_vm14, %v2149_v43, %v2181_v6 }
 0x4fe   : > { %v4302_v27 = vpop.f32.mrb[5].mxu1 }
 0x4ff   : > { %v4303_v32 = vadd.f32 %v4302_v27, %v4301_v25  ;;  %v4304_v30 = vpop.f32.mrb[6].mxu1  ;;  %4535 = vmatprep.subr.bf16.mxu0 %v7115_v8  ;;  %4583 = vmatprep.subr.bf16.mxu1 %v7115_v8  ;;  %v2086_v25 = vadd.f32 %v7020_v62, %v6811_v14  ;;  %v2128_v27 = vmul.f32 %v7048_v1, %v2083_v51  ;;  %vm2166_vm15 = vcmp.ge.f32.partialorder %v2150_v19, 0.0 }
 0x500   : > { %v4305_v39 = vpop.f32.mrb[7].mxu1  ;;  %4536 = vmatpush3.bf16.msra.mxu0 %v7115_v8  ;;  %4584 = vmatpush3.bf16.msra.mxu1 %v7115_v8  ;;  %v2131_v51 = vmul.f32 %v7048_v1, %v2094_v42 }
 0x501   : > { %v2413_v40 = vadd.f32 %v4303_v32, %v2193_v22  ;;  %v4306_v41 = vadd.f32 %v4305_v39, %v4304_v30  ;;  %v2182_v32 = vmul.f32 0.1, %v2150_v19  ;;  %v2129_v30 = vmul.f32 %v7048_v1, %v2086_v25 }
 0x502   : > { %v2091_v39 = vadd.f32 %v6805_v13, %v7020_v62  ;;  %v2151_v14 = vadd.f32 %v7084_v63, %v2128_v27  ;;  %v2099_v25 = vadd.f32 %v7020_v62, %v6816_v17  ;;  %v2154_v6 = vadd.f32 %v7084_v63, %v2131_v51 }
 0x503   : > { %v2416_v59 = vadd.f32 %v4306_v41, %v2194_v38  ;;  %v2152_v13 = vadd.f32 %v7084_v63, %v2129_v30 }
 0x504   : > { %v2130_v43 = vmul.f32 %v7048_v1, %v2091_v39  ;;  %vm2167_vm8 = vcmp.ge.f32.partialorder %v2151_v14, 0.0  ;;  %v2132_v17 = vmul.f32 %v7048_v1, %v2099_v25 }
 0x505   : > { %v7129_v45 = vpack.c.bf16 %v2416_v59, %v2413_v40  ;;  %v4307_v10 = vpop.f32.mrb[8].mxu1  ;;  %v2198_v59 = vsel %vm2166_vm15, %v2150_v19, %v2182_v32  ;;  %vm2168_vm14 = vcmp.ge.f32.partialorder %v2152_v13, 0.0  ;;  %v2102_v32 = vadd.f32 %v7020_v62, %v6821_v20 }
 0x506   : > { %v4308_v28 = vpop.f32.mrb[9].mxu1  ;;  %v2153_v19 = vadd.f32 %v7084_v63, %v2130_v43  ;;  %v2155_v42 = vadd.f32 %v7084_v63, %v2132_v17 }
 0x507   : > { %v4309_v52 = vadd.f32 %v4308_v28, %v4307_v10  ;;  %v4310_v53 = vpop.f32.mrb[10].mxu1  ;;  %4537 = vmatprep.subr.bf16.mxu0 %v7129_v45  ;;  %4585 = vmatprep.subr.bf16.mxu1 %v7129_v45 }
 0x508   : > { %v4311_v24 = vpop.f32.mrb[11].mxu1  ;;  %4538 = vmatpush3.bf16.msra.mxu0 %v7129_v45  ;;  %4586 = vmatpush3.bf16.msra.mxu1 %v7129_v45  ;;  %v2185_v39 = vmul.f32 0.1, %v2153_v19  ;;  %vm2169_vm15 = vcmp.ge.f32.partialorder %v2153_v19, 0.0 }
 0x509   : > { %v2421_v5 = vadd.f32 %v4309_v52, %v2195_v46  ;;  %v4312_v22 = vadd.f32 %v4311_v24, %v4310_v53  ;;  %v2183_v46 = vmul.f32 0.1, %v2151_v14  ;;  %v2184_v52 = vmul.f32 0.1, %v2152_v13 }
 0x50b   : > { %v2424_v12 = vadd.f32 %v4312_v22, %v2196_v21  ;;  %v2199_v21 = vsel %vm2167_vm8, %v2151_v14, %v2183_v46  ;;  %v2200_v27 = vsel %vm2168_vm14, %v2152_v13, %v2184_v52  ;;  %v2186_v14 = vmul.f32 0.1, %v2154_v6 }
 0x50c   : > { %vm2170_vm8 = vcmp.ge.f32.partialorder %v2154_v6, 0.0  ;;  %v2110_v52 = vadd.f32 %v6818_v18, %v7020_v62  ;;  %vm2171_vm14 = vcmp.ge.f32.partialorder %v2155_v42, 0.0 }
 0x50d   : > { %v7143_v35 = vpack.c.bf16 %v2424_v12, %v2421_v5  ;;  %v4313_v38 = vpop.f32.mrb[12].mxu1  ;;  %v2202_v43 = vsel %vm2170_vm8, %v2154_v6, %v2186_v14 }
 0x50e   : > { %v4314_v40 = vpop.f32.mrb[13].mxu1 }
 0x50f   : > { %v4315_v41 = vadd.f32 %v4314_v40, %v4313_v38  ;;  %v4316_v2 = vpop.f32.mrb[14].mxu1  ;;  %4539 = vmatprep.subr.bf16.mxu0 %v7143_v35  ;;  %4587 = vmatprep.subr.bf16.mxu1 %v7143_v35  ;;  %v2133_v40 = vmul.f32 %v7048_v1, %v2102_v32 }
 0x510   : > { %v4317_v57 = vpop.f32.mrb[15].mxu1  ;;  %4540 = vmatpush3.bf16.msra.mxu0 %v7143_v35  ;;  %4588 = vmatpush3.bf16.msra.mxu1 %v7143_v35 }
 0x511   : > { %v2429_v44 = vadd.f32 %v4315_v41, %v2197_v7  ;;  %v4318_v10 = vadd.f32 %v4317_v57, %v4316_v2 }
 0x513   : > { %v2432_v28 = vadd.f32 %v4318_v10, %v2198_v59  ;;  %v2201_v59 = vsel %vm2169_vm15, %v2153_v19, %v2185_v39  ;;  %v2156_v10 = vadd.f32 %v7084_v63, %v2133_v40 }
 0x515   : > { %v7157_v53 = vpack.c.bf16 %v2432_v28, %v2429_v44  ;;  %v4319_v11 = vpop.f32.mrb[16].mxu1  ;;  %v2107_v44 = vadd.f32 %v6814_v16, %v7020_v62  ;;  %vm2172_vm15 = vcmp.ge.f32.partialorder %v2156_v10, 0.0 }
 0x516   : > { %v4320_v24 = vpop.f32.mrb[17].mxu1 }
 0x517   : > { %v4321_v5 = vadd.f32 %v4320_v24, %v4319_v11  ;;  %v4322_v22 = vpop.f32.mrb[18].mxu1  ;;  %4541 = vmatprep.subr.bf16.mxu0 %v7157_v53  ;;  %4589 = vmatprep.subr.bf16.mxu1 %v7157_v53  ;;  %v2187_v11 = vmul.f32 0.1, %v2155_v42  ;;  %v2188_v24 = vmul.f32 0.1, %v2156_v10 }
 0x518   : > { %v4323_v12 = vpop.f32.mrb[19].mxu1  ;;  %4542 = vmatpush3.bf16.msra.mxu0 %v7157_v53  ;;  %4590 = vmatpush3.bf16.msra.mxu1 %v7157_v53 }
 0x519   : > { %v2437_v30 = vadd.f32 %v4321_v5, %v2199_v21  ;;  %v4324_v38 = vadd.f32 %v4323_v12, %v4322_v22  ;;  %v2134_v21 = vmul.f32 %v7048_v1, %v2107_v44  ;;  %v2135_v5 = vmul.f32 %v7048_v1, %v2110_v52  ;;  %v2542_v52 = vld [vmem:[#allocation3 + $0xa8] sm:$0xff] }
 0x51a   : > { %v2203_v22 = vsel %vm2171_vm14, %v2155_v42, %v2187_v11  ;;  %v2204_v18 = vsel %vm2172_vm15, %v2156_v10, %v2188_v24  ;;  %vm7721_vm15 = vmpackc.low %vm6865_vm11, %vm6857_vm10  ;;  %vm7725_vm11 = vnez %v7678_v49  ;;  %v2538_v49 = vld [vmem:[#allocation3 + $0x48] sm:$0xff] }
 0x51b   : > { %v2440_v7 = vadd.f32 %v4324_v38, %v2200_v27  ;;  %v2157_v32 = vadd.f32 %v7084_v63, %v2134_v21  ;;  %v2158_v17 = vadd.f32 %v7084_v63, %v2135_v5  ;;  %vm7724_vm10 = vmpackc.low %vm7016_vm9, %vm7008_vm2  ;;  %vm7730_vm9 = vnez %v7690_v54 }
 0x51c   : > { %vm7731_vm2 = vnez %v7688_v34 }
 0x51d   : > { %v7171_v41 = vpack.c.bf16 %v2440_v7, %v2437_v30  ;;  %v4325_v2 = vpop.f32.mrb[20].mxu1  ;;  %v2189_v7 = vmul.f32 0.1, %v2157_v32  ;;  %vm2173_vm8 = vcmp.ge.f32.partialorder %v2157_v32, 0.0  ;;  %vm2174_vm14 = vcmp.ge.f32.partialorder %v2158_v17, 0.0 }
 0x51e   : > { %v4326_v57 = vpop.f32.mrb[21].mxu1 }
 0x51f   : > { %v4327_v13 = vadd.f32 %v4326_v57, %v4325_v2  ;;  %v4328_v20 = vpop.f32.mrb[22].mxu1  ;;  %4543 = vmatprep.subr.bf16.mxu0 %v7171_v41  ;;  %4591 = vmatprep.subr.bf16.mxu1 %v7171_v41  ;;  %v2190_v2 = vmul.f32 0.1, %v2158_v17  ;;  %v2205_v57 = vsel %vm2173_vm8, %v2157_v32, %v2189_v7  ;;  %vm7722_vm8 = vmpackc.low %vm6956_vm1, %vm6948_vm7  ;;  %vm7726_vm7 = vnez %v7676_v60  ;;  %v2654_v7 = vld [vmem:[#allocation3 + $0x38] sm:$0xff] }
 0x520   : > { %v4329_v46 = vpop.f32.mrb[23].mxu1  ;;  %4544 = vmatpush3.bf16.msra.mxu0 %v7171_v41  ;;  %4592 = vmatpush3.bf16.msra.mxu1 %v7171_v41 }
 0x521   : > { %v2445_v28 = vadd.f32 %v4327_v13, %v2201_v59  ;;  %v4330_v51 = vadd.f32 %v4329_v46, %v4328_v20  ;;  %v2206_v10 = vsel %vm2174_vm14, %v2158_v17, %v2190_v2  ;;  %vm7723_vm14 = vmpackc.low %vm6896_vm6, %vm6885_vm0  ;;  %vm7728_vm6 = vnez %v7704_v9  ;;  %v2539_v46 = vld [vmem:[#allocation3 + $0x60] sm:$0xff] }
 0x522   : > { %vm7727_vm0 = vmpackc.low %vm7725_vm11, %vm7726_vm7 }
 0x523   : > { %v2448_v19 = vadd.f32 %v4330_v51, %v2202_v43  ;;  %vm7729_vm1 = vmpackc.low %vm7038_vm13, %vm7728_vm6  ;;  %vm7733_vm13 = vnez %v7695_v56 }
 0x524   : > { %vm7737_vm11 = vmpackc.low %vm7090_vm5, %vm7077_vm3 }
 0x525   : > { %v2472_v16 = vpack.c.bf16 %v2448_v19, %v2445_v28  ;;  %v4331_v25 = vpop.f32.mrb[24].mxu1  ;;  %v2773_v28 = vld [vmem:[#allocation3 + $0x70] sm:$0xff]  ;;  %v2776_v19 = vld [vmem:[#allocation3 + $0xb8] sm:$0xff] }
 0x526   : > { %v4332_v6 = vpop.f32.mrb[25].mxu1 }
 0x527   : > { %v4333_v27 = vadd.f32 %v4332_v6, %v4331_v25  ;;  %v4334_v12 = vpop.f32.mrb[26].mxu1  ;;  %4545 = vmatprep.subr.bf16.mxu0 %v2472_v16  ;;  %4593 = vmatprep.subr.bf16.mxu1 %v2472_v16 }
 0x528   : > { %v4335_v62 = vpop.f32.mrb[27].mxu1  ;;  %4546 = vmatpush3.bf16.msra.mxu0 %v2472_v16  ;;  %4594 = vmatpush3.bf16.msra.mxu1 %v2472_v16 }
 0x529   : > { %v2453_v30 = vadd.f32 %v4333_v27, %v2203_v22  ;;  %v4336_v38 = vadd.f32 %v4335_v62, %v4334_v12  ;;  %v2774_v22 = vld [vmem:[#allocation3 + $0x88] sm:$0xff] }
 0x52b   : > { %v2456_v39 = vadd.f32 %v4336_v38, %v2204_v18 }
 0x52d   : > { %v2473_v40 = vpack.c.bf16 %v2456_v39, %v2453_v30  ;;  %v4337_v1 = vpop.f32.mrb[28].mxu1 }
 0x52e   : > { %v4338_v14 = vpop.f32.mrb[29].mxu1 }
 0x52f   : > { %v4339_v42 = vadd.f32 %v4338_v14, %v4337_v1  ;;  %v4340_v59 = vpop.f32.mrb[30].mxu1  ;;  %4547 = vmatprep.subr.bf16.mxu0 %v2473_v40  ;;  %4595 = vmatprep.subr.bf16.mxu1 %v2473_v40  ;;  %v2655_v14 = vld [vmem:[#allocation3 + $0x50] sm:$0xff] }
 0x530   : > { %v4341_v13 = vpop.f32.mrb[31].mxu1  ;;  %4548 = vmatpush3.bf16.msra.mxu0 %v2473_v40  ;;  %4596 = vmatpush3.bf16.msra.mxu1 %v2473_v40 }
 0x531   : > { %v2461_v20 = vadd.f32 %v4339_v42, %v2205_v57  ;;  %v4342_v44 = vadd.f32 %v4341_v13, %v4340_v59  ;;  %v2653_v59 = vld [vmem:[#allocation3 + $0x20] sm:$0xff] }
 0x533   : > { %v2464_v63 = vadd.f32 %v4342_v44, %v2206_v10 }
 0x535   : > { %v2474_v43 = vpack.c.bf16 %v2464_v63, %v2461_v20  ;;  %v2658_v63 = vld [vmem:[#allocation3 + $0x98] sm:$0xff] }
 0x537   : > { %4549 = vmatprep.subr.bf16.mxu0 %v2474_v43  ;;  %4597 = vmatprep.subr.bf16.mxu1 %v2474_v43 }
 0x538   : > { %4550 = vmatpush3.bf16.msra.mxu0 %v2474_v43  ;;  %4598 = vmatpush3.bf16.msra.mxu1 %v2474_v43 }
 0x539   : > { %4559 = vmatprep.subr.bf16.mxu0 %v7115_v8 }
 0x53b   : > { %4552 = vmatmul.mubr.msk.bf16.vlgmr.msra.gmra.mrb[16].mxu0 %vm7721_vm15, %v5691_v26  ;;  %4600 = vmatmul.mubr.msk.bf16.vlgmr.msra.gmra.mrb[32].mxu1 %vm7722_vm8, %v5691_v26  ;;  %vm7732_vm15 = vmpackc.low %vm7730_vm9, %vm7731_vm2  ;;  %vm7734_vm8 = vnez %v7692_v55  ;;  %v2536_v55 = vld [vmem:[#allocation3 + $0x18] sm:$0xff] }
 0x53c   : > { %4560 = vmatpush3.bf16.msra.mxu0 %v7115_v8  ;;  %4555 = vmatprep.mubr.msk.bf16.mxu0 %vm7723_vm14, %v5691_v26  ;;  %vm7735_vm14 = vmpackc.low %vm7733_vm13, %vm7734_vm8 }
 0x53d   : > { %4561 = vmatprep.subr.bf16.mxu0 %v7129_v45  ;;  %4603 = vmatprep.mubr.msk.bf16.mxu1 %vm7724_vm10, %v5691_v26  ;;  %vm7736_vm10 = vmpackc.low %vm7064_vm4, %vm7054_vm12 }
 0x540   : > { %4562 = vmatpush3.bf16.msra.mxu0 %v7129_v45 }
 0x541   : > { %4563 = vmatprep.subr.bf16.mxu0 %v7143_v35 }
 0x543   : > { %4556 = vmatmul.mubr.msk.bf16.gmra.mrb[20].mxu0 %vm7727_vm0, %v5691_v26  ;;  %4604 = vmatmul.mubr.msk.bf16.gmra.mrb[36].mxu1 %vm7729_vm1, %v5691_v26 }
 0x544   : > { %4564 = vmatpush3.bf16.msra.mxu0 %v7143_v35  ;;  %4575 = vmatprep.mubr.msk.bf16.mxu0 %vm7732_vm15, %v5691_v26 }
 0x545   : > { %4565 = vmatprep.subr.bf16.mxu0 %v7157_v53 }
 0x548   : > { %4566 = vmatpush3.bf16.msra.mxu0 %v7157_v53  ;;  %v2541_v53 = vld [vmem:[#allocation3 + $0x90] sm:$0xff] }
 0x549   : > { %4567 = vmatprep.subr.bf16.mxu0 %v7171_v41 }
 0x54c   : > { %4568 = vmatpush3.bf16.msra.mxu0 %v7171_v41  ;;  %v2775_v41 = vld [vmem:[#allocation3 + $0xa0] sm:$0xff] }
 0x54d   : > { %4569 = vmatprep.subr.bf16.mxu0 %v2472_v16 }
 0x550   : > { %4570 = vmatpush3.bf16.msra.mxu0 %v2472_v16  ;;  %v2540_v16 = vld [vmem:[#allocation3 + $0x78] sm:$0xff] }
 0x551   : > { %4571 = vmatprep.subr.bf16.mxu0 %v2473_v40 }
 0x554   : > { %4572 = vmatpush3.bf16.msra.mxu0 %v2473_v40  ;;  %v2652_v40 = vld [vmem:[#allocation3 + $0x8] sm:$0xff] }
 0x555   : > { %4573 = vmatprep.subr.bf16.mxu0 %v2474_v43 }
 0x558   : > { %4574 = vmatpush3.bf16.msra.mxu0 %v2474_v43  ;;  %v2656_v43 = vld [vmem:[#allocation3 + $0x68] sm:$0xff] }
 0x55b   : > { %4576 = vmatmul.mubr.msk.bf16.vlgmr.msra.gmra.mrb[24].mxu0 %vm7735_vm14, %v5691_v26 }
 0x55c   : > { %4579 = vmatprep.mubr.msk.bf16.mxu0 %vm7736_vm10, %v5691_v26 }
 0x563   : > { %4580 = vmatmul.mubr.msk.bf16.gmra.mrb[28].mxu0 %vm7737_vm11, %v5691_v26 }
 0x60e   : > { %v4553_v60 = vpop.f32.mrb[16].mxu0  ;;  %v4601_v48 = vpop.f32.mrb[32].mxu1 }
 0x60f   : > { %v2610_v34 = vadd.f32 %v4553_v60, %v2537_v36  ;;  %v2577_v54 = vpop.f32.mrb[17].mxu0  ;;  %v2844_v56 = vadd.f32 %v4601_v48, %v2771_v37  ;;  %v2811_v58 = vpop.f32.mrb[33].mxu1  ;;  %v2659_v37 = vld [vmem:[#allocation3 + $0xb0] sm:$0xff]  ;;  %v2657_v60 = vld [vmem:[#allocation3 + $0x80] sm:$0xff] }
 0x610   : > { %v2608_v9 = vadd.f32 %v2577_v54, %v2535_v47  ;;  %v4554_v0 = vpop.f32.mrb[18].mxu0  ;;  %v2842_v15 = vadd.f32 %v2811_v58, %v2769_v50  ;;  %v4602_v3 = vpop.f32.mrb[34].mxu1  ;;  %v4990_v58 = vld [vmem:[#allocation30 + $0x48] sm:$0xff] (!%p4187_p6)  }
 0x611   : > { %2618 = vst [vmem:[#allocation3 + $0x30] sm:$0xff] %v2610_v34  ;;  %v2611_v26 = vadd.f32 %v4554_v0, %v2538_v49  ;;  %v2580_v4 = vpop.f32.mrb[19].mxu0  ;;  %2852 = vst [vmem:[#allocation3 + $0x40] sm:$0xff] %v2844_v56  ;;  %v2845_v23 = vadd.f32 %v4602_v3, %v2772_v29  ;;  %v2814_v8 = vpop.f32.mrb[35].mxu1  ;;  %v4989_v56 = vld [vmem:[#allocation30] sm:$0xff] (!%p4187_p6)   ;;  %v4993_v0 = vld [vmem:[#allocation30 + $0x10] sm:$0xff] (!%p4187_p6)  }
 0x612   : > { %2616 = vst [vmem:[#allocation3] sm:$0xff] %v2608_v9  ;;  %v2609_v45 = vadd.f32 %v2580_v4, %v2536_v55  ;;  %2850 = vst [vmem:[#allocation3 + $0x10] sm:$0xff] %v2842_v15  ;;  %v2843_v35 = vadd.f32 %v2814_v8, %v2770_v61  ;;  %v4988_v55 = vld [vmem:[#allocation30 + $0x40] sm:$0xff] (!%p4187_p6)   ;;  %v4991_v61 = vld [vmem:[#allocation30 + $0x8] sm:$0xff] (!%p4187_p6)   ;;  %v2894_v4 = vsub.s32 (!%p4187_p6), 1, %v6657_v31 }
 0x613   : > { %2619 = vst [vmem:[#allocation3 + $0x48] sm:$0xff] %v2611_v26  ;;  %2853 = vst [vmem:[#allocation3 + $0x58] sm:$0xff] %v2845_v23  ;;  %4379 = vmatprep.subr.bf16.mxu1 (!%p4187_p6), %v4988_v55  ;;  %v4992_v9 = vld [vmem:[#allocation30 + $0x50] sm:$0xff] (!%p4187_p6)   ;;  %v4994_v15 = vld [vmem:[#allocation30 + $0x58] sm:$0xff] (!%p4187_p6)  }
 0x614   : > { %2617 = vst [vmem:[#allocation3 + $0x18] sm:$0xff] %v2609_v45  ;;  %2851 = vst [vmem:[#allocation3 + $0x28] sm:$0xff] %v2843_v35  ;;  %4380 = vmatpush3.bf16.msra.mxu1 (!%p4187_p6), %v4989_v56  ;;  %v4995_v3 = vld [vmem:[#allocation30 + $0x18] sm:$0xff] (!%p4187_p6)   ;;  %v4996_v26 = vld [vmem:[#allocation30 + $0x60] sm:$0xff] (!%p4187_p6)  }
 0x615   : > { %4381 = vmatprep.subr.bf16.mxu1 (!%p4187_p6), %v4990_v58  ;;  %v4997_v23 = vld [vmem:[#allocation30 + $0x20] sm:$0xff] (!%p4187_p6)   ;;  %v4998_v8 = vld [vmem:[#allocation30 + $0x68] sm:$0xff] (!%p4187_p6)  }
 0x616   : > { %v4557_v51 = vpop.f32.mrb[20].mxu0  ;;  %v4605_v11 = vpop.f32.mrb[36].mxu1 }
 0x617   : > { %v2614_v21 = vadd.f32 %v4557_v51, %v2541_v53  ;;  %v2593_v24 = vpop.f32.mrb[21].mxu0  ;;  %v2848_v25 = vadd.f32 %v4605_v11, %v2775_v41  ;;  %v2827_v5 = vpop.f32.mrb[37].mxu1  ;;  %v7262_v53 = vld [vmem:[%s7739_s10] sm:$0x7] (!%p4187_p6) }
 0x618   : > { %v2612_v6 = vadd.f32 %v2593_v24, %v2539_v46  ;;  %v4558_v27 = vpop.f32.mrb[22].mxu0  ;;  %v2846_v12 = vadd.f32 %v2827_v5, %v2773_v28  ;;  %v4606_v32 = vpop.f32.mrb[38].mxu1  ;;  %4382 = vmatpush3.bf16.msra.mxu1 (!%p4187_p6), %v4991_v61  ;;  %v7265_v41 = vrot.slane (!%p4187_p6), %v7262_v53, %v2894_v4  ;;  %v7270_v46 = vld [vmem:[%s7740_s2] sm:$0x7] (!%p4187_p6)  ;;  %v5000_v24 = vld [vmem:[#allocation30 + $0x70] sm:$0xff] (!%p4187_p6)  }
 0x619   : > { %2622 = vst [vmem:[#allocation3 + $0x90] sm:$0xff] %v2614_v21  ;;  %v2615_v18 = vadd.f32 %v4558_v27, %v2542_v52  ;;  %v2596_v62 = vpop.f32.mrb[23].mxu0  ;;  %2856 = vst [vmem:[#allocation3 + $0xa0] sm:$0xff] %v2848_v25  ;;  %v2849_v30 = vadd.f32 %v4606_v32, %v2776_v19  ;;  %v2830_v38 = vpop.f32.mrb[39].mxu1  ;;  %4383 = vmatprep.subr.bf16.mxu1 (!%p4187_p6), %v4992_v9  ;;  %v2862_v28 = vld [vmem:[#allocation3] sm:$0xff] (!%p4187_p6)  ;;  %v7274_v52 = vrot.slane (!%p4187_p6), %v7262_v53, %v6665_v33 }
 0x61a   : > { %2620 = vst [vmem:[#allocation3 + $0x60] sm:$0xff] %v2612_v6  ;;  %v2613_v17 = vadd.f32 %v2596_v62, %v2540_v16  ;;  %2854 = vst [vmem:[#allocation3 + $0x70] sm:$0xff] %v2846_v12  ;;  %v2847_v39 = vadd.f32 %v2830_v38, %v2774_v22  ;;  %v4999_v11 = vld [vmem:[#allocation30 + $0x28] sm:$0xff] (!%p4187_p6)   ;;  %v7277_v19 = vrot.slane (!%p4187_p6), %v7270_v46, %v2894_v4  ;;  %v2868_v12 = vld [vmem:[#allocation3 + $0x30] sm:$0xff] (!%p4187_p6)  ;;  %v2898_v32 = vsub.s32 (!%p4187_p6), 2, %v6657_v31 }
 0x61b   : > { %2623 = vst [vmem:[#allocation3 + $0xa8] sm:$0xff] %v2615_v18  ;;  %2857 = vst [vmem:[#allocation3 + $0xb8] sm:$0xff] %v2849_v30  ;;  %v2865_v51 = vld [vmem:[#allocation3 + $0x18] sm:$0xff] (!%p4187_p6)  ;;  %v7281_v21 = vrot.slane (!%p4187_p6), %v7270_v46, %v6665_v33  ;;  %v2903_v5 = vmul.f32 (!%p4187_p6), %v7274_v52, %v2862_v28  ;;  %v5001_v18 = vld [vmem:[#allocation30 + $0x30] sm:$0xff] (!%p4187_p6)  }
 0x61c   : > { %2621 = vst [vmem:[#allocation3 + $0x78] sm:$0xff] %v2613_v17  ;;  %2855 = vst [vmem:[#allocation3 + $0x88] sm:$0xff] %v2847_v39  ;;  %4384 = vmatpush3.bf16.msra.mxu1 (!%p4187_p6), %v4993_v0  ;;  %v2906_v22 = vmul.f32 (!%p4187_p6), %v7274_v52, %v2865_v51  ;;  %v2871_v17 = vld [vmem:[#allocation3 + $0x48] sm:$0xff] (!%p4187_p6)  ;;  %v5005_v51 = vld [vmem:[#allocation30 + $0x88] sm:$0xff] (!%p4187_p6)  }
 0x61d   : > { %4385 = vmatprep.subr.bf16.mxu1 (!%p4187_p6), %v4994_v15  ;;  %v2944_v30 = vadd.f32 (!%p4187_p6), %v7281_v21, %v2903_v5  ;;  %v5002_v39 = vld [vmem:[#allocation30 + $0x78] sm:$0xff] (!%p4187_p6)  }
 0x61e   : > { %v2947_v38 = vadd.f32 (!%p4187_p6), %v7281_v21, %v2906_v22 }
 0x61f   : > { %vm2968_vm3 = vcmp.ge.f32.partialorder (!%p4187_p6), %v2944_v30, 0.0 }
 0x620   : > { %4386 = vmatpush3.bf16.msra.mxu1 (!%p4187_p6), %v4995_v3  ;;  %vm2971_vm4 = vcmp.ge.f32.partialorder (!%p4187_p6), %v2947_v38, 0.0 }
 0x621   : > { %4387 = vmatprep.subr.bf16.mxu1 (!%p4187_p6), %v4996_v26 }
 0x623   : > { %v2877_v58 = vld [vmem:[#allocation3 + $0x78] sm:$0xff] (!%p4187_p6) }
 0x624   : > { %4388 = vmatpush3.bf16.msra.mxu1 (!%p4187_p6), %v4997_v23  ;;  %v2918_v28 = vmul.f32 (!%p4187_p6), %v7274_v52, %v2877_v58  ;;  %v5009_v58 = vld [vmem:[#allocation30 + $0xa8] sm:$0xff] (!%p4187_p6)  }
 0x625   : > { %4389 = vmatprep.subr.bf16.mxu1 (!%p4187_p6), %v4998_v8 }
 0x628   : > { %4390 = vmatpush3.bf16.msra.mxu1 (!%p4187_p6), %v4999_v11 }
 0x629   : > { %4391 = vmatprep.subr.bf16.mxu1 (!%p4187_p6), %v5000_v24 }
 0x62c   : > { %4392 = vmatpush3.bf16.msra.mxu1 (!%p4187_p6), %v5001_v18  ;;  %v2880_v18 = vld [vmem:[#allocation3 + $0x90] sm:$0xff] (!%p4187_p6) }
 0x62d   : > { %4393 = vmatprep.subr.bf16.mxu1 (!%p4187_p6), %v5002_v39 }
 0x62e   : > { %v4577_v1 = vpop.f32.mrb[24].mxu0 }
 0x62f   : > { %v2727_v2 = vadd.f32 %v4577_v1, %v2654_v7  ;;  %v2694_v42 = vpop.f32.mrb[25].mxu0  ;;  %v2909_v1 = vmul.f32 (!%p4187_p6), %v7274_v52, %v2868_v12 }
 0x630   : > { %v2725_v57 = vadd.f32 %v2694_v42, %v2652_v40  ;;  %v4578_v13 = vpop.f32.mrb[26].mxu0 }
 0x631   : > { %2735 = vst [vmem:[#allocation3 + $0x38] sm:$0xff] %v2727_v2  ;;  %v2728_v20 = vadd.f32 %v4578_v13, %v2655_v14  ;;  %v2697_v44 = vpop.f32.mrb[27].mxu0  ;;  %v2912_v14 = vmul.f32 (!%p4187_p6), %v7274_v52, %v2871_v17  ;;  %v5003_v13 = vld [vmem:[#allocation30 + $0x38] sm:$0xff] (!%p4187_p6)  }
 0x632   : > { %2733 = vst [vmem:[#allocation3 + $0x8] sm:$0xff] %v2725_v57  ;;  %v2726_v10 = vadd.f32 %v2697_v44, %v2653_v59  ;;  %v2992_v59 = vmul.f32 (!%p4187_p6), 0.1, %v2944_v30  ;;  %v2995_v57 = vmul.f32 (!%p4187_p6), 0.1, %v2947_v38  ;;  %4394 = vmatpush3.bf16.msra.mxu1 (!%p4187_p6), %v5003_v13  ;;  %v2870_v13 = vld [vmem:[#allocation3 + $0x40] sm:$0xff] (!%p4187_p6) }
 0x633   : > { %2736 = vst [vmem:[#allocation3 + $0x50] sm:$0xff] %v2728_v20  ;;  %v2953_v55 = vadd.f32 (!%p4187_p6), %v7281_v21, %v2912_v14 }
 0x634   : > { %2734 = vst [vmem:[#allocation3 + $0x20] sm:$0xff] %v2726_v10 }
 0x635   : > { %vm2977_vm1 = vcmp.ge.f32.partialorder (!%p4187_p6), %v2953_v55, 0.0  ;;  %v3001_v26 = vmul.f32 (!%p4187_p6), 0.1, %v2953_v55 }
 0x636   : > { %v4581_v36 = vpop.f32.mrb[28].mxu0  ;;  %2861 = sbr.rel (%p4187_p6) target bundleno = 2089 (0x829), region = 204 }
 0x637   : > { %v2731_v47 = vadd.f32 %v4581_v36, %v2658_v63  ;;  %v2710_v50 = vpop.f32.mrb[29].mxu0  ;;  %v3025_v22 = vsel (!%p4187_p6), %vm2977_vm1, %v2953_v55, %v3001_v26 }
 0x638   : > { %v2729_v49 = vadd.f32 %v2710_v50, %v2656_v43  ;;  %v4582_v48 = vpop.f32.mrb[30].mxu0  ;;  %v2869_v6 = vld [vmem:[#allocation3 + $0x38] sm:$0xff] (!%p4187_p6)  ;;  %v2950_v50 = vadd.f32 (!%p4187_p6), %v7281_v21, %v2909_v1  ;;  %v2867_v1 = vld [vmem:[#allocation3 + $0x28] sm:$0xff] (!%p4187_p6) }
 0x639   : > { %2739 = vst [vmem:[#allocation3 + $0x98] sm:$0xff] %v2731_v47  ;;  %v2732_v29 = vadd.f32 %v4582_v48, %v2659_v37  ;;  %v2713_v34 = vpop.f32.mrb[31].mxu0  ;;  %v2863_v45 = vld [vmem:[#allocation3 + $0x8] sm:$0xff] (!%p4187_p6)  ;;  %v2910_v7 = vmul.f32 (!%p4187_p6), %v7265_v41, %v2869_v6  ;;  %v3016_v37 = vsel (!%p4187_p6), %vm2968_vm3, %v2944_v30, %v2992_v59  ;;  %v3019_v47 = vsel (!%p4187_p6), %vm2971_vm4, %v2947_v38, %v2995_v57 }
 0x63a   : > { %2737 = vst [vmem:[#allocation3 + $0x68] sm:$0xff] %v2729_v49  ;;  %v2730_v54 = vadd.f32 %v2713_v34, %v2657_v60  ;;  %v2904_v16 = vmul.f32 (!%p4187_p6), %v7265_v41, %v2863_v45  ;;  %v2872_v27 = vld [vmem:[#allocation3 + $0x50] sm:$0xff] (!%p4187_p6)  ;;  %v2874_v49 = vld [vmem:[#allocation3 + $0x60] sm:$0xff] (!%p4187_p6)  ;;  %v2998_v56 = vmul.f32 (!%p4187_p6), 0.1, %v2950_v50  ;;  %vm2974_vm6 = vcmp.ge.f32.partialorder (!%p4187_p6), %v2950_v50, 0.0 }
 0x63b   : > { %2740 = vst [vmem:[#allocation3 + $0xb0] sm:$0xff] %v2732_v29  ;;  %v2866_v35 = vld [vmem:[#allocation3 + $0x20] sm:$0xff] (!%p4187_p6)  ;;  %v2913_v40 = vmul.f32 (!%p4187_p6), %v7265_v41, %v2872_v27  ;;  %v2951_v10 = vadd.f32 (!%p4187_p6), %v7277_v19, %v2910_v7  ;;  %v3088_v29 = vpack.c.bf16 (!%p4187_p6), %v3019_v47, %v3016_v37  ;;  %v5004_v34 = vld [vmem:[#allocation30 + $0x80] sm:$0xff] (!%p4187_p6)   ;;  %v2915_v15 = vmul.f32 (!%p4187_p6), %v7274_v52, %v2874_v49 }
 0x63c   : > { %2738 = vst [vmem:[#allocation3 + $0x80] sm:$0xff] %v2730_v54  ;;  %v2907_v25 = vmul.f32 (!%p4187_p6), %v7265_v41, %v2866_v35  ;;  %v2945_v33 = vadd.f32 (!%p4187_p6), %v7277_v19, %v2904_v16  ;;  %4607 = vmatprep.subr.bf16.mxu1 (!%p4187_p6), %v5004_v34  ;;  %v3022_v5 = vsel (!%p4187_p6), %vm2974_vm6, %v2950_v50, %v2998_v56  ;;  %v5006_v30 = vld [vmem:[#allocation30 + $0x90] sm:$0xff] (!%p4187_p6)   ;;  %v2873_v50 = vld [vmem:[#allocation3 + $0x58] sm:$0xff] (!%p4187_p6) }
 0x63d   : > { %v2954_v63 = vadd.f32 %v7277_v19, %v2913_v40  ;;  %vm2975_vm7 = vcmp.ge.f32.partialorder %v2951_v10, 0.0  ;;  %v2999_v48 = vmul.f32 0.1, %v2951_v10  ;;  %v2956_v11 = vadd.f32 %v7281_v21, %v2915_v15  ;;  %v2864_v40 = vld [vmem:[#allocation3 + $0x10] sm:$0xff] }
 0x63e   : > { %v2948_v62 = vadd.f32 %v7277_v19, %v2907_v25  ;;  %vm2969_vm12 = vcmp.ge.f32.partialorder %v2945_v33, 0.0  ;;  %v2993_v2 = vmul.f32 0.1, %v2945_v33  ;;  %v2959_v27 = vadd.f32 %v7281_v21, %v2918_v28 }
 0x63f   : > { %vm2978_vm0 = vcmp.ge.f32.partialorder %v2954_v63, 0.0  ;;  %v3002_v54 = vmul.f32 0.1, %v2954_v63  ;;  %v3023_v61 = vsel %vm2975_vm7, %v2951_v10, %v2999_v48  ;;  %v3004_v39 = vmul.f32 0.1, %v2956_v11  ;;  %v2876_v48 = vld [vmem:[#allocation3 + $0x70] sm:$0xff] }
 0x640   : > { %vm2972_vm5 = vcmp.ge.f32.partialorder %v2948_v62, 0.0  ;;  %v2996_v42 = vmul.f32 0.1, %v2948_v62  ;;  %v3017_v20 = vsel %vm2969_vm12, %v2945_v33, %v2993_v2  ;;  %v2881_v4 = vld [vmem:[#allocation3 + $0x98] sm:$0xff]  ;;  %v2883_v33 = vld [vmem:[#allocation3 + $0xa8] sm:$0xff]  ;;  %v3091_v14 = vpack.c.bf16 %v3025_v22, %v3022_v5  ;;  %v2882_v5 = vld [vmem:[#allocation3 + $0xa0] sm:$0xff] }
 0x641   : > { %v2875_v43 = vld [vmem:[#allocation3 + $0x68] sm:$0xff]  ;;  %v3026_v3 = vsel %vm2978_vm0, %v2954_v63, %v3002_v54  ;;  %v2922_v24 = vmul.f32 %v7265_v41, %v2881_v4  ;;  %vm2980_vm15 = vcmp.ge.f32.partialorder %v2956_v11, 0.0  ;;  %vm2983_vm13 = vcmp.ge.f32.partialorder %v2959_v27, 0.0  ;;  %v2885_v22 = vld [vmem:[#allocation3 + $0xb8] sm:$0xff] }
 0x642   : > { %v3020_v44 = vsel %vm2972_vm5, %v2948_v62, %v2996_v42  ;;  %v2916_v9 = vmul.f32 %v7265_v41, %v2875_v43  ;;  %v2884_v23 = vld [vmem:[#allocation3 + $0xb0] sm:$0xff]  ;;  %v3092_v8 = vpack.c.bf16 %v3026_v3, %v3023_v61  ;;  %v7321_v62 = vrot.slane %v7270_v46, %v2898_v32  ;;  %v5012_v42 = vld [vmem:[#allocation12] sm:$0xff]  }
 0x643   : > { %v3089_v36 = vpack.c.bf16 %v3020_v44, %v3017_v20  ;;  %v2878_v60 = vld [vmem:[#allocation3 + $0x80] sm:$0xff]  ;;  %v2925_v16 = vmul.f32 %v7265_v41, %v2884_v23  ;;  %v2963_v12 = vadd.f32 %v7277_v19, %v2922_v24  ;;  %v5007_v2 = vld [vmem:[#allocation30 + $0x98] sm:$0xff]   ;;  %v2921_v46 = vmul.f32 %v7274_v52, %v2880_v18  ;;  %4631 = vmatprep.subr.bf16.mxu0 %v5012_v42 }
 0x644   : > { %v2919_v0 = vmul.f32 %v7265_v41, %v2878_v60  ;;  %v2957_v45 = vadd.f32 %v7277_v19, %v2916_v9  ;;  %v7316_v41 = vrot.slane %v7262_v53, %v2898_v32  ;;  %v3007_v53 = vmul.f32 0.1, %v2959_v27  ;;  %v5013_v43 = vld [vmem:[#allocation12 + $0x8] sm:$0xff]   ;;  %4632 = vmatpush3.bf16.msra.mxu0 %v5012_v42  ;;  %v5014_v60 = vld [vmem:[#allocation12 + $0x10] sm:$0xff]   ;;  %v5015_v9 = vld [vmem:[#allocation12 + $0x18] sm:$0xff]  }
 0x645   : > { %3276 = vmatprep.mubr.bf16.mxu1 %v3089_v36  ;;  %v2966_v7 = vadd.f32 %v7277_v19, %v2925_v16  ;;  %vm2987_vm8 = vcmp.ge.f32.partialorder %v2963_v12, 0.0  ;;  %v3011_v31 = vmul.f32 0.1, %v2963_v12  ;;  %v2924_v32 = vmul.f32 %v7274_v52, %v2883_v33  ;;  %v5008_v36 = vld [vmem:[#allocation30 + $0xa0] sm:$0xff]   ;;  %4633 = vmatprep.subr.bf16.mxu0 %v5013_v43 }
 0x646   : > { %v2960_v35 = vadd.f32 %v7277_v19, %v2919_v0  ;;  %vm2981_vm9 = vcmp.ge.f32.partialorder %v2957_v45, 0.0  ;;  %v3005_v25 = vmul.f32 0.1, %v2957_v45  ;;  %3277 = vmatmul.mubr.bf16.vlgmr.msra.gmra.mrb[0].mxu1 %v3088_v29  ;;  %v2905_v57 = vmul.f32 %v7316_v41, %v2864_v40  ;;  %v2879_v29 = vld [vmem:[#allocation3 + $0x88] sm:$0xff] }
 0x647   : > { %4608 = vmatpush3.bf16.msra.mxu1 %v5004_v34  ;;  %3284 = vmatprep.mubr.bf16.mxu1 %v3092_v8  ;;  %v2908_v19 = vmul.f32 %v7316_v41, %v2867_v1  ;;  %v3014_v20 = vmul.f32 0.1, %v2966_v7  ;;  %v2962_v44 = vadd.f32 %v7281_v21, %v2921_v46  ;;  %v2965_v10 = vadd.f32 %v7281_v21, %v2924_v32 }
 0x648   : > { %vm2984_vm2 = vcmp.ge.f32.partialorder %v2960_v35, 0.0  ;;  %v3008_v6 = vmul.f32 0.1, %v2960_v35  ;;  %4609 = vmatprep.subr.bf16.mxu1 %v5005_v51  ;;  %v3029_v38 = vsel %vm2981_vm9, %v2957_v45, %v3005_v25  ;;  %v3028_v63 = vsel %vm2980_vm15, %v2956_v11, %v3004_v39  ;;  %4634 = vmatpush3.bf16.msra.mxu0 %v5013_v43  ;;  %v5010_v11 = vld [vmem:[#allocation30 + $0xb0] sm:$0xff]  }
 0x649   : > { %vm2990_vm14 = vcmp.ge.f32.partialorder %v2966_v7, 0.0  ;;  %v3031_v52 = vsel %vm2983_vm13, %v2959_v27, %v3007_v53  ;;  %v2946_v37 = vadd.f32 %v7321_v62, %v2905_v57  ;;  %v2949_v47 = vadd.f32 %v7321_v62, %v2908_v19  ;;  %4635 = vmatprep.subr.bf16.mxu0 %v5014_v60  ;;  %v5017_v57 = vld [vmem:[#allocation12 + $0x28] sm:$0xff]   ;;  %v5018_v19 = vld [vmem:[#allocation12 + $0x30] sm:$0xff]  }
 0x64a   : > { %v3032_v17 = vsel %vm2984_vm2, %v2960_v35, %v3008_v6  ;;  %vm2986_vm10 = vcmp.ge.f32.partialorder %v2962_v44, 0.0  ;;  %vm2989_vm11 = vcmp.ge.f32.partialorder %v2965_v10, 0.0  ;;  %v3010_v21 = vmul.f32 0.1, %v2962_v44 }
 0x64b   : > { %4610 = vmatpush3.bf16.msra.mxu1 %v5005_v51  ;;  %v3095_v59 = vpack.c.bf16 %v3032_v17, %v3029_v38  ;;  %v3013_v49 = vmul.f32 0.1, %v2965_v10  ;;  %v3035_v34 = vsel %vm2987_vm8, %v2963_v12, %v3011_v31  ;;  %v3038_v54 = vsel %vm2990_vm14, %v2966_v7, %v3014_v20  ;;  %v3375_v20 = vld [vmem:[%s6380_s11 + $0x8] sm:$0xff] }
 0x64c   : > { %4611 = vmatprep.subr.bf16.mxu1 %v5006_v30  ;;  %v2911_v55 = vmul.f32 %v7316_v41, %v2870_v13  ;;  %v3094_v56 = vpack.c.bf16 %v3031_v52, %v3028_v63  ;;  %vm2970_vm12 = vcmp.ge.f32.partialorder %v2946_v37, 0.0  ;;  %vm2973_vm5 = vcmp.ge.f32.partialorder %v2949_v47, 0.0  ;;  %4636 = vmatpush3.bf16.msra.mxu0 %v5014_v60  ;;  %v3374_v13 = vld [vmem:[%s6380_s11] sm:$0xff]  ;;  %v3377_v63 = vld [vmem:[%s6380_s11 + $0x18] sm:$0xff] }
 0x64d   : > { %v2994_v61 = vmul.f32 0.1, %v2946_v37  ;;  %v3098_v0 = vpack.c.bf16 %v3038_v54, %v3035_v34  ;;  %v2997_v15 = vmul.f32 0.1, %v2949_v47  ;;  %v2914_v3 = vmul.f32 %v7316_v41, %v2873_v50  ;;  %4637 = vmatprep.subr.bf16.mxu0 %v5015_v9  ;;  %v5019_v50 = vld [vmem:[#allocation12 + $0x38] sm:$0xff]  }
 0x64e   : > { %3285 = vmatmul.mubr.bf16.gmra.mrb[4].mxu1 %v3091_v14  ;;  %v2952_v26 = vadd.f32 %v7321_v62, %v2911_v55  ;;  %v2917_v4 = vmul.f32 %v7316_v41, %v2876_v48  ;;  %v2920_v23 = vmul.f32 %v7316_v41, %v2879_v29  ;;  %v3034_v8 = vsel %vm2986_vm10, %v2962_v44, %v3010_v21  ;;  %v4212_v44 = vld [vmem:[%s7741_s19] ss:$0 sm:$0xff] }
 0x64f   : > { %4612 = vmatpush3.bf16.msra.mxu1 %v5006_v30  ;;  %3292 = vmatprep.mubr.bf16.mxu1 %v3095_v59  ;;  %v3037_v45 = vsel %vm2989_vm11, %v2965_v10, %v3013_v49  ;;  %v3018_v35 = vsel %vm2970_vm12, %v2946_v37, %v2994_v61  ;;  %v3021_v28 = vsel %vm2973_vm5, %v2949_v47, %v2997_v15  ;;  %v5011_v30 = vld [vmem:[#allocation30 + $0xb8] sm:$0xff]   ;;  %v5020_v61 = vld [vmem:[%s7742_s13] sm:$0xff]  }
 0x650   : > { %4613 = vmatprep.subr.bf16.mxu1 %v5007_v2  ;;  %v2955_v51 = vadd.f32 %v7321_v62, %v2914_v3  ;;  %v3000_v24 = vmul.f32 0.1, %v2952_v26  ;;  %v2958_v16 = vadd.f32 %v7321_v62, %v2917_v4  ;;  %v2961_v25 = vadd.f32 %v7321_v62, %v2920_v23  ;;  %4638 = vmatpush3.bf16.msra.mxu0 %v5015_v9  ;;  %v3376_v10 = vld [vmem:[%s6380_s11 + $0x10] sm:$0xff]  ;;  %v5023_v23 = vld [vmem:[%s7742_s13 + $0x18] sm:$0xff]  }
 0x651   : > { %v3097_v6 = vpack.c.bf16 %v3037_v45, %v3034_v8  ;;  %v3090_v27 = vpack.c.bf16 %v3021_v28, %v3018_v35  ;;  %vm2976_vm3 = vcmp.ge.f32.partialorder %v2952_v26, 0.0  ;;  %v2923_v18 = vmul.f32 %v7316_v41, %v2882_v5  ;;  %v5022_v4 = vld [vmem:[%s7742_s13 + $0x10] sm:$0xff]   ;;  %v3378_v8 = vld [vmem:[%s6380_s11 + $0x20] sm:$0xff]  ;;  %v3379_v45 = vld [vmem:[%s6380_s11 + $0x28] sm:$0xff] }
 0x652   : > { %v3003_v12 = vmul.f32 0.1, %v2955_v51  ;;  %v2926_v33 = vmul.f32 %v7316_v41, %v2885_v22  ;;  %vm2979_vm4 = vcmp.ge.f32.partialorder %v2955_v51, 0.0  ;;  %v3006_v38 = vmul.f32 0.1, %v2958_v16  ;;  %v5024_v35 = vld [vmem:[%s7742_s13 + $0x20] sm:$0xff]  }
 0x653   : > { %4614 = vmatpush3.bf16.msra.mxu1 %v5007_v2  ;;  %v3009_v17 = vmul.f32 0.1, %v2961_v25  ;;  %vm2982_vm7 = vcmp.ge.f32.partialorder %v2958_v16, 0.0  ;;  %vm2985_vm0 = vcmp.ge.f32.partialorder %v2961_v25, 0.0  ;;  %v3024_v39 = vsel %vm2976_vm3, %v2952_v26, %v3000_v24  ;;  %v5021_v26 = vld [vmem:[%s7742_s13 + $0x8] sm:$0xff]   ;;  %v3381_v24 = vld [vmem:[%s6380_s11 + $0x38] sm:$0xff] }
 0x654   : > { %4615 = vmatprep.subr.bf16.mxu1 %v5008_v36  ;;  %v3027_v7 = vsel %vm2979_vm4, %v2955_v51, %v3003_v12  ;;  %v2964_v40 = vadd.f32 %v7321_v62, %v2923_v18  ;;  %v2967_v1 = vadd.f32 %v7321_v62, %v2926_v33  ;;  %v3030_v14 = vsel %vm2982_vm7, %v2958_v16, %v3006_v38  ;;  %v5016_v62 = vld [vmem:[#allocation12 + $0x20] sm:$0xff]  }
 0x655   : > { %v3033_v53 = vsel %vm2985_vm0, %v2961_v25, %v3009_v17  ;;  %v3093_v41 = vpack.c.bf16 %v3027_v7, %v3024_v39  ;;  %4639 = vmatprep.subr.bf16.mxu0 %v5016_v62  ;;  %v3389_v43 = vmul.f32 %v4212_v44, %v3374_v13  ;;  %v3390_v52 = vmul.f32 %v4212_v44, %v3375_v20  ;;  %v5025_v12 = vld [vmem:[%s7742_s13 + $0x28] sm:$0xff]  }
 0x656   : > { %3293 = vmatmul.mubr.bf16.gmra.mrb[8].mxu1 %v3094_v56  ;;  %v3096_v2 = vpack.c.bf16 %v3033_v53, %v3030_v14  ;;  %v3012_v31 = vmul.f32 0.1, %v2964_v40  ;;  %v3015_v46 = vmul.f32 0.1, %v2967_v1  ;;  %vm2988_vm6 = vcmp.ge.f32.partialorder %v2964_v40, 0.0  ;;  %4640 = vmatpush3.bf16.msra.mxu0 %v5016_v62 }
 0x657   : > { %4616 = vmatpush3.bf16.msra.mxu1 %v5008_v36  ;;  %3300 = vmatprep.mubr.bf16.mxu1 %v3098_v0  ;;  %vm2991_vm1 = vcmp.ge.f32.partialorder %v2967_v1, 0.0  ;;  %v4213_v36 = vld [vmem:[#allocation10] ss:$0 sm:$0xff]  ;;  %v3391_v37 = vmul.f32 %v4212_v44, %v3376_v10  ;;  %v3392_v47 = vmul.f32 %v4212_v44, %v3377_v63  ;;  %v3393_v28 = vmul.f32 %v4212_v44, %v3378_v8 }
 0x658   : > { %4617 = vmatprep.subr.bf16.mxu1 %v5009_v58  ;;  %v3036_v32 = vsel %vm2988_vm6, %v2964_v40, %v3012_v31  ;;  %v3039_v42 = vsel %vm2991_vm1, %v2967_v1, %v3015_v46  ;;  %4641 = vmatprep.subr.bf16.mxu0 %v5017_v57  ;;  %v3404_v60 = vadd.f32 %v4213_v36, %v3389_v43  ;;  %v5026_v1 = vld [vmem:[%s7742_s13 + $0x30] sm:$0xff]  }
 0x659   : > { %v3099_v59 = vpack.c.bf16 %v3039_v42, %v3036_v32  ;;  %v3405_v21 = vadd.f32 %v4213_v36, %v3390_v52  ;;  %v3406_v49 = vadd.f32 %v4213_v36, %v3391_v37  ;;  %v3407_v48 = vadd.f32 %v4213_v36, %v3392_v47 }
 0x65a   : > { %4642 = vmatpush3.bf16.msra.mxu0 %v5017_v57  ;;  %vm3412_vm9 = vcmp.ge.f32.partialorder %v3404_v60, 0.0  ;;  %v3420_v29 = vmul.f32 0.1, %v3404_v60  ;;  %v3394_v51 = vmul.f32 %v4212_v44, %v3379_v45  ;;  %v3396_v25 = vmul.f32 %v4212_v44, %v3381_v24 }
 0x65b   : > { %4618 = vmatpush3.bf16.msra.mxu1 %v5009_v58  ;;  %4643 = vmatprep.subr.bf16.mxu0 %v5018_v19  ;;  %vm3413_vm2 = vcmp.ge.f32.partialorder %v3405_v21, 0.0  ;;  %v3421_v34 = vmul.f32 0.1, %v3405_v21  ;;  %vm3414_vm15 = vcmp.ge.f32.partialorder %v3406_v49, 0.0  ;;  %vm3415_vm13 = vcmp.ge.f32.partialorder %v3407_v48, 0.0 }
 0x65c   : > { %4619 = vmatprep.subr.bf16.mxu1 %v5010_v11  ;;  %v3422_v54 = vmul.f32 0.1, %v3406_v49  ;;  %v3423_v55 = vmul.f32 0.1, %v3407_v48  ;;  %v3428_v56 = vsel %vm3412_vm9, %v3404_v60, %v3420_v29  ;;  %v3408_v5 = vadd.f32 %v4213_v36, %v3393_v28 }
 0x65d   : > { %v3429_v58 = vsel %vm3413_vm2, %v3405_v21, %v3421_v34  ;;  %v3409_v22 = vadd.f32 %v4213_v36, %v3394_v51  ;;  %v4222_v34 = vld [vmem:[%s7743_s3] ss:$0 sm:$0xff] }
 0x65e   : > { %3301 = vmatmul.mubr.bf16.gmra.mrb[12].mxu1 %v3097_v6  ;;  %4644 = vmatpush3.bf16.msra.mxu0 %v5018_v19  ;;  %v3452_v9 = vpack.c.bf16 %v3429_v58, %v3428_v56  ;;  %v3430_v0 = vsel %vm3414_vm15, %v3406_v49, %v3422_v54  ;;  %v3431_v15 = vsel %vm3415_vm13, %v3407_v48, %v3423_v55  ;;  %v3424_v18 = vmul.f32 0.1, %v3408_v5  ;;  %v4223_v56 = vld [vmem:[%s7744_s4] ss:$0 sm:$0xff] }
 0x65f   : > { %4620 = vmatpush3.bf16.msra.mxu1 %v5010_v11  ;;  %4623 = vmatprep.mubr.bf16.mxu1 %v3090_v27  ;;  %v3453_v3 = vpack.c.bf16 %v3431_v15, %v3430_v0  ;;  %v3380_v11 = vld [vmem:[%s6380_s11 + $0x30] sm:$0xff]  ;;  %v3411_v27 = vadd.f32 %v4213_v36, %v3396_v25  ;;  %v3425_v33 = vmul.f32 0.1, %v3409_v22  ;;  %vm3416_vm8 = vcmp.ge.f32.partialorder %v3408_v5, 0.0 }
 0x660   : > { %4621 = vmatprep.subr.bf16.mxu1 %v5011_v30  ;;  %4645 = vmatprep.subr.bf16.mxu0 %v5019_v50  ;;  %v3395_v16 = vmul.f32 %v4212_v44, %v3380_v11  ;;  %vm3417_vm14 = vcmp.ge.f32.partialorder %v3409_v22, 0.0  ;;  %v3432_v38 = vsel %vm3416_vm8, %v3408_v5, %v3424_v18 }
 0x661   : > { %4647 = vmatprep.mubr.bf16.mxu0 %v3452_v9  ;;  %v3433_v17 = vsel %vm3417_vm14, %v3409_v22, %v3425_v33  ;;  %vm3419_vm11 = vcmp.ge.f32.partialorder %v3411_v27, 0.0  ;;  %v3427_v7 = vmul.f32 0.1, %v3411_v27 }
 0x662   : > { %4646 = vmatpush3.bf16.msra.mxu0 %v5019_v50  ;;  %v3410_v6 = vadd.f32 %v4213_v36, %v3395_v16  ;;  %v3454_v39 = vpack.c.bf16 %v3433_v17, %v3432_v38 }
 0x663   : > { %4622 = vmatpush3.bf16.msra.mxu1 %v5011_v30  ;;  %4655 = vmatprep.subr.bf16.mxu0 %v5020_v61  ;;  %v3435_v14 = vsel %vm3419_vm11, %v3411_v27, %v3427_v7 }
 0x664   : > { %v3426_v30 = vmul.f32 0.1, %v3410_v6  ;;  %vm3418_vm10 = vcmp.ge.f32.partialorder %v3410_v6, 0.0 }
 0x665   : > { %4648 = vmatmul.mubr.bf16.vlgmr.msra.gmra.mrb[0].mxu0 %v3453_v3 }
 0x666   : > { %4624 = vmatmul.mubr.bf16.vlgmr.msra.gmra.mrb[16].mxu1 %v3093_v41  ;;  %4656 = vmatpush3.bf16.msra.mxu0 %v5020_v61  ;;  %v3434_v40 = vsel %vm3418_vm10, %v3410_v6, %v3426_v30  ;;  %v5027_v41 = vld [vmem:[%s7742_s13 + $0x38] sm:$0xff]  }
 0x667   : > { %4627 = vmatprep.mubr.bf16.mxu1 %v3096_v2  ;;  %4657 = vmatprep.subr.bf16.mxu0 %v5021_v26  ;;  %v3455_v53 = vpack.c.bf16 %v3435_v14, %v3434_v40 }
 0x668   : > { %4651 = vmatprep.mubr.bf16.mxu0 %v3454_v39 }
 0x66a   : > { %4658 = vmatpush3.bf16.msra.mxu0 %v5021_v26 }
 0x66b   : > { %4659 = vmatprep.subr.bf16.mxu0 %v5022_v4 }
 0x66d   : > { %4652 = vmatmul.mubr.bf16.gmra.mrb[4].mxu0 %v3455_v53 }
 0x66e   : > { %4628 = vmatmul.mubr.bf16.gmra.mrb[20].mxu1 %v3099_v59  ;;  %4660 = vmatpush3.bf16.msra.mxu0 %v5022_v4 }
 0x66f   : > { %4661 = vmatprep.subr.bf16.mxu0 %v5023_v23 }
 0x672   : > { %4662 = vmatpush3.bf16.msra.mxu0 %v5023_v23 }
 0x673   : > { %4663 = vmatprep.subr.bf16.mxu0 %v5024_v35 }
 0x676   : > { %4664 = vmatpush3.bf16.msra.mxu0 %v5024_v35 }
 0x677   : > { %4665 = vmatprep.subr.bf16.mxu0 %v5025_v12 }
 0x67a   : > { %4666 = vmatpush3.bf16.msra.mxu0 %v5025_v12 }
 0x67b   : > { %4667 = vmatprep.subr.bf16.mxu0 %v5026_v1 }
 0x67e   : > { %4668 = vmatpush3.bf16.msra.mxu0 %v5026_v1 }
 0x67f   : > { %4669 = vmatprep.subr.bf16.mxu0 %v5027_v41 }
 0x682   : > { %4670 = vmatpush3.bf16.msra.mxu0 %v5027_v41 }
 0x719   : > { %v4395_v2 = vpop.f32.mrb[0].mxu1 }
 0x71a   : > { %v4396_v31 = vpop.f32.mrb[1].mxu1 }
 0x71b   : > { %v4397_v46 = vadd.f32 %v4396_v31, %v4395_v2  ;;  %v4398_v32 = vpop.f32.mrb[2].mxu1 }
 0x71c   : > { %v4399_v42 = vpop.f32.mrb[3].mxu1 }
 0x71d   : > { %v4400_v59 = vadd.f32 %v4399_v42, %v4398_v32 }
 0x721   : > { %v4401_v62 = vpop.f32.mrb[4].mxu1 }
 0x722   : > { %v4402_v57 = vpop.f32.mrb[5].mxu1 }
 0x723   : > { %v4403_v19 = vadd.f32 %v4402_v57, %v4401_v62  ;;  %v4404_v13 = vpop.f32.mrb[6].mxu1 }
 0x724   : > { %v4405_v20 = vpop.f32.mrb[7].mxu1 }
 0x725   : > { %v4406_v44 = vadd.f32 %v4405_v20, %v4404_v13 }
 0x729   : > { %v4407_v10 = vpop.f32.mrb[8].mxu1 }
 0x72a   : > { %v4408_v63 = vpop.f32.mrb[9].mxu1 }
 0x72b   : > { %v4409_v43 = vadd.f32 %v4408_v63, %v4407_v10  ;;  %v4410_v52 = vpop.f32.mrb[10].mxu1 }
 0x72c   : > { %v4411_v36 = vpop.f32.mrb[11].mxu1 }
 0x72d   : > { %v4412_v37 = vadd.f32 %v4411_v36, %v4410_v52 }
 0x731   : > { %v4413_v47 = vpop.f32.mrb[12].mxu1 }
 0x732   : > { %v4414_v50 = vpop.f32.mrb[13].mxu1 }
 0x733   : > { %v4415_v60 = vadd.f32 %v4414_v50, %v4413_v47  ;;  %v4416_v21 = vpop.f32.mrb[14].mxu1 }
 0x734   : > { %v4417_v49 = vpop.f32.mrb[15].mxu1 }
 0x735   : > { %v4418_v48 = vadd.f32 %v4417_v49, %v4416_v21 }
 0x739   : > { %v4625_v29 = vpop.f32.mrb[16].mxu1 }
 0x73a   : > { %v3352_v54 = vadd.f32 %v4625_v29, %v4403_v19  ;;  %v3343_v55 = vpop.f32.mrb[17].mxu1 }
 0x73b   : > { %v3344_v58 = vadd.f32 %v4397_v46, %v3343_v55  ;;  %v4626_v61 = vpop.f32.mrb[18].mxu1 }
 0x73c   : > { %v3578_v9 = vmul.f32 %v4222_v34, %v3352_v54  ;;  %v3355_v0 = vadd.f32 %v4626_v61, %v4406_v44  ;;  %v3346_v15 = vpop.f32.mrb[19].mxu1 }
 0x73d   : > { %v3576_v3 = vmul.f32 %v4222_v34, %v3344_v58  ;;  %v3347_v26 = vadd.f32 %v4400_v59, %v3346_v15 }
 0x73e   : > { %v3593_v4 = vadd.f32 %v4223_v56, %v3578_v9  ;;  %v3579_v23 = vmul.f32 %v4222_v34, %v3355_v0 }
 0x73f   : > { %v3591_v8 = vadd.f32 %v4223_v56, %v3576_v3  ;;  %v3577_v45 = vmul.f32 %v4222_v34, %v3347_v26 }
 0x740   : > { %vm3601_vm12 = vcmp.ge.f32.partialorder %v3593_v4, 0.0  ;;  %v3609_v35 = vmul.f32 0.1, %v3593_v4  ;;  %v3594_v28 = vadd.f32 %v4223_v56, %v3579_v23 }
 0x741   : > { %v3607_v51 = vmul.f32 0.1, %v3591_v8  ;;  %v3592_v11 = vadd.f32 %v4223_v56, %v3577_v45  ;;  %v4629_v24 = vpop.f32.mrb[20].mxu1  ;;  %vm3599_vm5 = vcmp.ge.f32.partialorder %v3591_v8, 0.0 }
 0x742   : > { %vm3602_vm3 = vcmp.ge.f32.partialorder %v3594_v28, 0.0  ;;  %v3610_v16 = vmul.f32 0.1, %v3594_v28  ;;  %v3368_v25 = vadd.f32 %v4629_v24, %v4415_v60  ;;  %v3359_v5 = vpop.f32.mrb[21].mxu1  ;;  %v3617_v22 = vsel %vm3601_vm12, %v3593_v4, %v3609_v35 }
 0x743   : > { %v3608_v6 = vmul.f32 0.1, %v3592_v11  ;;  %v3360_v27 = vadd.f32 %v4409_v43, %v3359_v5  ;;  %v4630_v12 = vpop.f32.mrb[22].mxu1  ;;  %vm3600_vm4 = vcmp.ge.f32.partialorder %v3592_v11, 0.0  ;;  %v3615_v17 = vsel %vm3599_vm5, %v3591_v8, %v3607_v51 }
 0x744   : > { %v3618_v18 = vsel %vm3602_vm3, %v3594_v28, %v3610_v16  ;;  %v3582_v33 = vmul.f32 %v4222_v34, %v3368_v25  ;;  %v3371_v30 = vadd.f32 %v4630_v12, %v4418_v48  ;;  %v3362_v38 = vpop.f32.mrb[23].mxu1 }
 0x745   : > { %v3640_v39 = vpack.c.bf16 %v3618_v18, %v3617_v22  ;;  %v3580_v7 = vmul.f32 %v4222_v34, %v3360_v27  ;;  %v3363_v40 = vadd.f32 %v4412_v37, %v3362_v38  ;;  %v3616_v1 = vsel %vm3600_vm4, %v3592_v11, %v3608_v6 }
 0x746   : > { %v3597_v14 = vadd.f32 %v4223_v56, %v3582_v33  ;;  %v3583_v53 = vmul.f32 %v4222_v34, %v3371_v30  ;;  %v3639_v41 = vpack.c.bf16 %v3616_v1, %v3615_v17 }
 0x747   : > { %v3595_v2 = vadd.f32 %v4223_v56, %v3580_v7  ;;  %v3581_v31 = vmul.f32 %v4222_v34, %v3363_v40 }
 0x748   : > { %v3613_v46 = vmul.f32 0.1, %v3597_v14  ;;  %v3598_v32 = vadd.f32 %v4223_v56, %v3583_v53  ;;  %4671 = vmatprep.mubr.bf16.mxu0 %v3639_v41  ;;  %vm3605_vm7 = vcmp.ge.f32.partialorder %v3597_v14, 0.0 }
 0x749   : > { %v3611_v42 = vmul.f32 0.1, %v3595_v2  ;;  %v3596_v59 = vadd.f32 %v4223_v56, %v3581_v31  ;;  %4672 = vmatmul.mubr.bf16.vlgmr.msra.gmra.mrb[0].mxu0 %v3640_v39  ;;  %vm3603_vm0 = vcmp.ge.f32.partialorder %v3595_v2, 0.0 }
 0x74a   : > { %v3614_v62 = vmul.f32 0.1, %v3598_v32  ;;  %vm3606_vm6 = vcmp.ge.f32.partialorder %v3598_v32, 0.0  ;;  %v3621_v19 = vsel %vm3605_vm7, %v3597_v14, %v3613_v46 }
 0x74b   : > { %v3612_v57 = vmul.f32 0.1, %v3596_v59  ;;  %vm3604_vm1 = vcmp.ge.f32.partialorder %v3596_v59, 0.0  ;;  %v3619_v20 = vsel %vm3603_vm0, %v3595_v2, %v3611_v42 }
 0x74c   : > { %v3622_v13 = vsel %vm3606_vm6, %v3598_v32, %v3614_v62 }
 0x74d   : > { %v3620_v44 = vsel %vm3604_vm1, %v3596_v59, %v3612_v57  ;;  %v3642_v10 = vpack.c.bf16 %v3622_v13, %v3621_v19 }
 0x74e   : > { %v3641_v63 = vpack.c.bf16 %v3620_v44, %v3619_v20 }
 0x750   : > { %4675 = vmatprep.mubr.bf16.mxu0 %v3641_v63 }
 0x751   : > { %4676 = vmatmul.mubr.bf16.gmra.mrb[4].mxu0 %v3642_v10 }
 0x81c   : > { %v4673_v43 = vpop.f32.mrb[0].mxu0 }
 0x81d   : > { %3758 = vst [vmem:[%s6441_s24 + $0x10] sm:$0xff] %v4673_v43  ;;  %v3725_v52 = vpop.f32.mrb[1].mxu0 }
 0x81e   : > { %3756 = vst [vmem:[%s6441_s24] sm:$0xff] %v3725_v52  ;;  %v4674_v36 = vpop.f32.mrb[2].mxu0 }
 0x81f   : > { %3759 = vst [vmem:[%s6441_s24 + $0x18] sm:$0xff] %v4674_v36  ;;  %v3728_v37 = vpop.f32.mrb[3].mxu0 }
 0x820   : > { %3757 = vst [vmem:[%s6441_s24 + $0x8] sm:$0xff] %v3728_v37 }
 0x824   : > { %v4677_v47 = vpop.f32.mrb[4].mxu0 }
 0x825   : > { %3762 = vst [vmem:[%s6441_s24 + $0x30] sm:$0xff] %v4677_v47  ;;  %v3741_v50 = vpop.f32.mrb[5].mxu0 }
 0x826   : > { %3760 = vst [vmem:[%s6441_s24 + $0x20] sm:$0xff] %v3741_v50  ;;  %v4678_v60 = vpop.f32.mrb[6].mxu0 }
 0x827   : > { %3763 = vst [vmem:[%s6441_s24 + $0x38] sm:$0xff] %v4678_v60  ;;  %v3744_v21 = vpop.f32.mrb[7].mxu0 }
 0x828   : > { %3761 = vst [vmem:[%s6441_s24 + $0x28] sm:$0xff] %v3744_v21 }
 0x829 PF: > { %s7745_s20 = sld [smem:[#allocation47_spill]]  ;;  %s7746_s0 = sld [smem:[#allocation78_spill]] }
 0x82a   : > { %s3778_s10 = sshll.u32 %s6441_s24, 4  ;;  %s7748_s11 = sand.u32 1, %s5642_s9   ;;  %s7410_s10 = int_to_ptr.vmem [resolvable:$true] %s3778_s10 }
 0x82b   : > { %s7414_s15 = scalar_lea.sflag [#allocation6], %s7748_s11  ;;  %s5508_s2 = scalar_lea.vmem %s7410_s10, 1024 }
 0x82c   : > { %p5509_p3 = scmp.ne.s32.totalorder %s7410_s10, %s5508_s2  ;;  %p7749_p7 = scmp.ne.s32.totalorder %s7606_s18, 0 }
 0x82d   : > { %s5692_s14 = smov [#allocation31]  }
 0x82e   : > { %p5510_p9 = pnand %p5509_p3, %p7749_p7  ;;  %s5512_s27 = sshll.u32 %s5692_s14, 4  ;;  %s5513_s27 = int_to_ptr.vmem [resolvable:$false] %s5512_s27 }
 0x82f   : > { %s4238_s22 = sshll.u32 %s7745_s20, 10  ;;  %s7747_s21 = smov %s7746_s0 }
 0x830   : > { %s7407_s8 = scalar_lea.hbm %s7746_s0, %s4238_s22  ;;  %p5511_p12 = pneg %p5510_p9 }
 0x831   : > { %s5514_s19 = scalar_lea.vmem %s5513_s27, 2048  ;;  %p5515_p13 = scmp.lt.s32.totalorder %s7410_s10, %s5513_s27 }
 0x832   : > { %p5516_p0 = scmp.lt.s32.totalorder %s5514_s19, %s5508_s2 }
 0x834   : > { %p5517_p5 = por %p5516_p0, %p5515_p13 }
 0x836   : > { %p5518_p11 = pnand %p5517_p5, %p5511_p12 }
 0x838   : > { %5521 = shalt.err (!%p5518_p11)
}
 0x839   : > { %s5522_s24 = scalar_lea.hbm %s7407_s8, 1024  ;;  %s5526_s28 = scalar_lea.hbm %s7747_s21, 4096 }
 0x83a   : > { %p5523_p8 = scmp.ne.s32.totalorder %s7407_s8, %s5522_s24  ;;  %p5527_p4 = scmp.lt.u32.totalorder %s7407_s8, %s7747_s21 }
 0x83b   : > { %p5528_p10 = scmp.lt.u32.totalorder %s5526_s28, %s5522_s24  ;;  %p5530_p3 = scmp.lt.u32.totalorder %s5522_s24, %s7407_s8 }
 0x83c   : > { %p5524_p1 = pnand %p5523_p8, %p7749_p7 }
 0x83d   : > { %p5529_p6 = por %p5528_p10, %p5527_p4 }
 0x83e   : > { %p5525_p2 = pneg %p5524_p1 }
 0x83f   : > { %p5531_p9 = por %p5530_p3, %p5529_p6 }
 0x841   : > { %p5532_p12 = pnand %p5531_p9, %p5525_p2 }
 0x843   : > { %5535 = shalt.err (!%p5532_p12)
}
 0x844   : > { %s5693_s22 = smov 128   ;;  %s5694_s7 = smov 8  }
 0x845   : > { %4767 = dma.vmem_to_hbm [thread:$0]  (%p7749_p7), %s7410_s10, 1024, %s7407_s8, %s7414_s15, %s5693_s22, %s5693_s22, %s5694_s7  }
 0x846 PF: > { %s7750_s23 = sld [smem:[#allocation50_spill]]  ;;  %p4857_p13 = scmp.ge.s32.totalorder %s5666_s1, 2 }
 0x847   : > { %s3793_s0 = sand.u32 1, %s5638_s30  }
 0x848   : > { %s3794_s11 = scalar_lea.sflag [#allocation6], %s3793_s0 }
 0x84c   : > { %p7751_p0 = scmp.ne.s32.totalorder %s7750_s23, 0 }
 0x84e   : > { %p4823_p5 = pnand %p4857_p13, %p7751_p0 }
 0x850   : > { %5621 = dma.done.wait (!%p4823_p5), %s3794_s11, 1024  }
 0x851   : > { %5623 = vsyncadd (!%p4823_p5), %s3794_s11, 4294966272  ;;  %s51_s1 = sadd.s32 1, %s5666_s1   ;;  %s7752_s7 = sld [smem:[#allocation44_spill]] }
 0x852   : > { %p48_p11 = scmp.ge.s32.totalorder %s51_s1, 14   ;;  %s7753_s4 = sld [smem:[#allocation45_spill]] }
 0x853   : > { %s7754_s28 = sld [smem:[#allocation48_spill]]  ;;  %s7755_s8 = smov %s7769_s12 }
 0x854   : > { %s7756_s30 = smov %s5642_s9  ;;  %s7757_s9 = smov %s5646_s5 }
 0x855   : > { %s7758_s5 = smov %s6329_s16  ;;  %s7759_s0 = smov %s5662_s29 }
 0x856   : > { %s7760_s10 = smov %s7763_s6  ;;  %s7761_s29 = smov %s7767_s17 }
 0x857   :  { %50 = sbr.rel (!%p48_p11) target bundleno = 46 (0x2e), region = 262 }
 0x85e   :  { %3799 = vsyncpa [#allocation5], 1 }
 0x85f   :  { %3801 = vsyncpa [#allocation5 + $0x1], 1 }
 0x860   :  { %3802 = vsyncpa [#allocation8], 1 }
 0x861   :  { %3804 = vsyncpa [#allocation8 + $0x1], 1 }
 0x862   :  { %3805 = vsyncpa [#allocation11], 1 }
 0x863   :  { %3806 = vsyncpa [#allocation14], 1 }
 0x864   :  { %3807 = vsyncpa [#allocation17], 1 }
 0x865   :  { %3808 = vsyncpa [#allocation20], 1 }
 0x866   :  { %3809 = vsyncpa [#allocation23], 1 }
 0x867   :  { %3810 = vsyncpa [#allocation26], 1 }
 0x868   :  { %3811 = vsyncpa [#allocation29], 1 }
 0x869   :  { %3812 = vsyncpa [#allocation6], 1 }
 0x86a   :  { %3814 = vsyncpa [#allocation6 + $0x1], 1 }

</bundles_post_ra>
